<compile_context>
chip_gen: v7x
topology: tpu7x:2x2x1
jax: 0.10.0
libtpu: 0.0.40
codegen_flags: <defaults>
</compile_context>

<pallas_src>
import functools

import jax
import jax.numpy as jnp
from jax.experimental import pallas as pl
from jax.experimental.pallas import tpu as pltpu

# ----------------------------- static network dims -------------------------
CIN = 50              # input channels
L0 = 224              # input length (forced by Linear(600, 128))
K1, S1 = 10, 2        # conv1 kernel / stride
K2, S2 = 10, 4        # conv2 kernel / stride
L1 = (L0 - K1) // S1 + 1        # 108
L1P = L1 // 2                   # 54  (after MaxPool1d(2,2))
L2 = (L1P - K2) // S2 + 1       # 12
L2P = L2 // 2                   # 6
CONV_C = 100          # true conv output channels
CP = 128              # lane-padded conv channels
H1 = 128              # fc1 width
H2 = 16               # fc2 width (zero-padded to CP in the kernel)
GROUPS = 8            # = pool1 stride (2) * conv2 stride (4)
SLOTS = 7             # ceil(L1P / GROUPS)
RPB = GROUPS * SLOTS  # 56 grouped pooled-conv1 rows per batch (54 valid + 2 pad)
KIN1 = 512            # conv1 im2col width (10*50 = 500, padded to 512)
KIN2 = K2 * CP        # conv2 im2col width (1280)
EPS = 1e-5            # PyTorch BatchNorm1d default


# ---------------------------------------------------------------------------
# Fused per-stream Pallas kernel
# ---------------------------------------------------------------------------
def _stream_kernel(ae_ref, ao_ref, w1_ref, b1_ref, w2_ref, b2_ref,
                   wfc1_ref, bfc1_ref, g1_ref, be1_ref,
                   wfc2_ref, bfc2_ref, g2_ref, be2_ref, w3_ref,
                   out_ref,
                   p1_ref, im2e_ref, im2o_ref, p2_ref, h0_ref, *, batch):
    """conv1->pool->conv2->pool->fc1->BN->fc2->BN->fc3-partial for one stream."""
    f32, bf16 = jnp.float32, jnp.bfloat16

    # ---- conv1 (+bias+ReLU) at even/odd conv positions; taps folded into K=512.
    #      MaxPool1d(2,2) = elementwise max of the two parity results.
    b1 = b1_ref[...]                                   # (1, 128), hoisted once
    w1 = w1_ref[...]
    r_e = jnp.dot(ae_ref[...], w1, preferred_element_type=f32)   # (B*56, 128)
    r_o = jnp.dot(ao_ref[...], w1, preferred_element_type=f32)
    p1_ref[...] = jnp.maximum(jnp.maximum(r_e + b1, 0.0),
                              jnp.maximum(r_o + b1, 0.0))

    # ---- conv2 im2col: p1 rows are residue-mod-8 grouped per batch, so every tap
    #      is a unit-stride 6-row slice -> static contiguous copies only.
    # TODO(synk): for large batch, make batch a second grid axis instead of this
    #             small static copy loop.
    for b in range(batch):
        base = b * RPB
        for k in range(K2):
            me, te = k % GROUPS, k // GROUPS                     # even outputs
            im2e_ref[b * L2P:(b + 1) * L2P, k * CP:(k + 1) * CP] = (
                p1_ref[base + me * SLOTS + te: base + me * SLOTS + te + L2P, :])
            mo, to = (k + S2) % GROUPS, (k + S2) // GROUPS       # odd outputs
            im2o_ref[b * L2P:(b + 1) * L2P, k * CP:(k + 1) * CP] = (
                p1_ref[base + mo * SLOTS + to: base + mo * SLOTS + to + L2P, :])

    # ---- conv2 (+bias+ReLU) with taps folded into K=1280; MaxPool1d(2,2) fused.
    b2 = b2_ref[...]
    w2 = w2_ref[...]
    c2e = jnp.dot(im2e_ref[...].astype(bf16), w2, preferred_element_type=f32)
    c2o = jnp.dot(im2o_ref[...].astype(bf16), w2, preferred_element_type=f32)
    p2_ref[...] = jnp.maximum(jnp.maximum(c2e + b2, 0.0),
                              jnp.maximum(c2o + b2, 0.0))        # (B*6, 128)

    # ---- flatten to (B, 768); channel-major torch order handled by wfc1 layout.
    for b in range(batch):
        for l in range(L2P):
            h0_ref[b:b + 1, l * CP:(l + 1) * CP] = (
                p2_ref[b * L2P + l: b * L2P + l + 1, :])

    # ---- fc1 + ReLU + BatchNorm1d(128) (training-mode batch stats, biased var).
    h1 = jnp.dot(h0_ref[...].astype(bf16), wfc1_ref[...],
                 preferred_element_type=f32)                     # (B, 128)
    h1 = jnp.maximum(h1 + bfc1_ref[...], 0.0)
    mu1 = jnp.mean(h1, axis=0, keepdims=True)
    v1 = jnp.mean(jnp.square(h1 - mu1), axis=0, keepdims=True)
    h1 = (h1 - mu1) * jax.lax.rsqrt(v1 + EPS) * g1_ref[...] + be1_ref[...]

    # ---- fc2 + ReLU + BatchNorm1d(16) (zero-padded to 128 lanes; pads stay 0).
    h2 = jnp.dot(h1.astype(bf16), wfc2_ref[...], preferred_element_type=f32)
    h2 = jnp.maximum(h2 + bfc2_ref[...], 0.0)
    mu2 = jnp.mean(h2, axis=0, keepdims=True)
    v2 = jnp.mean(jnp.square(h2 - mu2), axis=0, keepdims=True)
    h2 = (h2 - mu2) * jax.lax.rsqrt(v2 + EPS) * g2_ref[...] + be2_ref[...]

    # ---- fc3 partial for this stream; final add + bias + BN(4) done in wrapper.
    out_ref[...] = jnp.dot(h2, w3_ref[...], preferred_element_type=f32)


# ---------------------------------------------------------------------------
# pallas_call wrapper
# ---------------------------------------------------------------------------
def _stream_call(ae, ao, p, batch):
    kernel = functools.partial(_stream_kernel, batch=batch)
    args = (ae, ao, p["w1"], p["b1"], p["w2"], p["b2"],
            p["wfc1"], p["bfc1"], p["g1"], p["be1"],
            p["wfc2"], p["bfc2"], p["g2"], p["be2"], p["w3"])

    def spec(a):
        zeros = (0,) * (a.ndim - 1)
        return pl.BlockSpec((None,) + tuple(a.shape[1:]),
                            lambda s, _z=zeros: (s,) + _z)

    flops = 2 * (2 * 2 * (RPB * batch) * KIN1 * CP          # conv1 even+odd
                 + 2 * 2 * (L2P * batch) * KIN2 * CP        # conv2 even+odd
                 + 2 * batch * (L2P * CP) * H1              # fc1
                 + 2 * batch * H1 * CP                      # fc2
                 + 2 * batch * CP * 4)                      # fc3 partial
    bytes_accessed = (sum(a.size * a.dtype.itemsize for a in args)
                      + 2 * batch * 4 * 4)

    return pl.pallas_call(
        kernel,
        out_shape=jax.ShapeDtypeStruct((2, batch, 4), jnp.float32),
        grid=(2,),
        in_specs=[spec(a) for a in args],
        out_specs=pl.BlockSpec((None, batch, 4), lambda s: (s, 0, 0)),
        scratch_shapes=[
            pltpu.VMEM((RPB * batch, CP), jnp.float32),      # pooled conv1 (grouped)
            pltpu.VMEM((L2P * batch, KIN2), jnp.float32),    # conv2 im2col (even)
            pltpu.VMEM((L2P * batch, KIN2), jnp.float32),    # conv2 im2col (odd)
            pltpu.VMEM((L2P * batch, CP), jnp.float32),      # pooled conv2
            pltpu.VMEM((batch, L2P * CP), jnp.float32),      # flattened fc1 input
        ],
        compiler_params=pltpu.CompilerParams(
            dimension_semantics=("parallel",)),
        cost_estimate=pl.CostEstimate(flops=flops, transcendentals=0,
                                      bytes_accessed=bytes_accessed),
    )(*args)


def _build_conv1_im2col(x):
    """x: (2, B, 50, 224) f32 -> even/odd conv1 im2col, each (2, B*56, 512) bf16.

    Row r of a batch block maps to pooled position q = 8*(r % 7) + r // 7
    (residue-mod-8 grouping) so that downstream conv2 taps become unit-stride
    6-row slices inside the kernel.  Even rows hold the window of conv position
    2q (input start 4q), odd rows the window of position 2q+1 (start 4q+2).
    """
    B = x.shape[1]
    xt = jnp.transpose(x, (0, 1, 3, 2))                  # (2, B, 224, 50)
    r = jnp.arange(RPB)
    q = GROUPS * (r % SLOTS) + (r // SLOTS)              # pooled position per row
    valid = q < L1P                                      # 54 valid rows, 2 pad rows

    def build(start):
        pos = jnp.where(valid, start, 0)[:, None] + jnp.arange(K1)[None, :]
        w = xt[:, :, pos, :]                             # (2, B, 56, 10, 50)
        w = jnp.where(valid[None, None, :, None, None], w, 0.0)
        w = w.reshape(2, B * RPB, K1 * CIN)
        w = jnp.pad(w, ((0, 0), (0, 0), (0, KIN1 - K1 * CIN)))
        return w.astype(jnp.bfloat16)

    return build(2 * S1 * q), build(2 * S1 * q + S1)


def student_forward(prep, STI, AMP):
    """STI/AMP: (B, 50, 224) float32 (PyTorch NCL layout) -> (B, 4)."""
    B = STI.shape[0]
    x = jnp.stack([STI, AMP]).astype(jnp.float32)        # (2, B, 50, 224)
    ae, ao = _build_conv1_im2col(x)
    part = _stream_call(ae, ao, prep, B)                 # (2, B, 4) fc3 partials
    y = part[0] + part[1] + prep["b3"]                   # fc3 add + bias
    mu = jnp.mean(y, axis=0, keepdims=True)              # BatchNorm1d(4), train mode
    var = jnp.mean(jnp.square(y - mu), axis=0, keepdims=True)
    return (y - mu) * jax.lax.rsqrt(var + EPS) * prep["g3"] + prep["be3"]


# ---------------------------------------------------------------------------
# One-time parameter preparation (layout / padding / dtype), done outside jit
# ---------------------------------------------------------------------------
def prepare_params(p):
    bf16, f32 = jnp.bfloat16, jnp.float32

    def conv1_mat(w):   # (100, 50, 10) -> (512, 128); row = k*50 + c
        wt = jnp.transpose(w, (2, 1, 0)).reshape(K1 * CIN, CONV_C)
        return jnp.pad(wt, ((0, KIN1 - K1 * CIN), (0, CP - CONV_C))).astype(bf16)

    def conv2_mat(w):   # (100, 100, 10) -> (1280, 128); row = k*128 + c
        wt = jnp.transpose(w, (2, 1, 0))                      # (10, 100, 100)
        wt = jnp.pad(wt, ((0, 0), (0, CP - CONV_C), (0, CP - CONV_C)))
        return wt.reshape(KIN2, CP).astype(bf16)

    def fc1_mat(w):     # (128, 600) torch-col = c*6 + l -> (768, 128); row = l*128 + c
        wt = w.T.reshape(CONV_C, L2P, H1)                     # [c, l, out]
        wt = jnp.transpose(wt, (1, 0, 2))                     # [l, c, out]
        wt = jnp.pad(wt, ((0, 0), (0, CP - CONV_C), (0, 0)))  # (6, 128, 128)
        return wt.reshape(L2P * CP, H1).astype(bf16)

    def fc2_mat(w):     # (16, 128) -> (128, 128) with zero-padded output cols
        return jnp.pad(w.T, ((0, 0), (0, CP - H2))).astype(bf16)

    def vec(v, width):  # 1-D -> (1, width) f32, zero padded (pads MUST stay zero)
        return jnp.pad(v, (0, width - v.shape[0])).reshape(1, width).astype(f32)

    prep = {
        "w1":   jnp.stack([conv1_mat(p["conv_s1_w"]), conv1_mat(p["conv_a1_w"])]),
        "b1":   jnp.stack([vec(p["conv_s1_b"], CP), vec(p["conv_a1_b"], CP)]),
        "w2":   jnp.stack([conv2_mat(p["conv_s2_w"]), conv2_mat(p["conv_a2_w"])]),
        "b2":   jnp.stack([vec(p["conv_s2_b"], CP), vec(p["conv_a2_b"], CP)]),
        "wfc1": jnp.stack([fc1_mat(p["fc_s1_w"]), fc1_mat(p["fc_a1_w"])]),
        "bfc1": jnp.stack([vec(p["fc_s1_b"], H1), vec(p["fc_a1_b"], H1)]),
        "g1":   jnp.stack([vec(p["bn_s1_g"], H1), vec(p["bn_a1_g"], H1)]),
        "be1":  jnp.stack([vec(p["bn_s1_b"], H1), vec(p["bn_a1_b"], H1)]),
        "wfc2": jnp.stack([fc2_mat(p["fc_s2_w"]), fc2_mat(p["fc_a2_w"])]),
        "bfc2": jnp.stack([vec(p["fc_s2_b"], CP), vec(p["fc_a2_b"], CP)]),
        "g2":   jnp.stack([vec(p["bn_s2_g"], CP), vec(p["bn_a2_g"], CP)]),
        "be2":  jnp.stack([vec(p["bn_s2_b"], CP), vec(p["bn_a2_b"], CP)]),
    }
    # fc3 split into per-stream partial weights (rows 0:16 -> STI, 16:32 -> AMP).
    w3t = p["fc3_w"].T.astype(jnp.float32)                    # (32, 4)
    w3_s = jnp.pad(w3t[:H2], ((0, CP - H2), (0, 0)))          # (128, 4)
    w3_a = jnp.pad(w3t[H2:], ((0, CP - H2), (0, 0)))
    prep["w3"] = jnp.stack([w3_s, w3_a])                      # (2, 128, 4)
    prep["b3"] = p["fc3_b"].reshape(1, 4).astype(jnp.float32)
    prep["g3"] = p["bn3_g"].reshape(1, 4).astype(jnp.float32)
    prep["be3"] = p["bn3_b"].reshape(1, 4).astype(jnp.float32)
    return prep


# ---------------------------------------------------------------------------
# Deterministic raw-parameter initialization (PyTorch-default-like uniform)
# ---------------------------------------------------------------------------
def init_params(key):
    def uni(k, shape, fan_in):
        bound = 1.0 / jnp.sqrt(fan_in)
        return jax.random.uniform(k, shape, jnp.float32, -bound, bound)

    keys = iter(jax.random.split(key, 32))
    p = {}
    p["conv_s1_w"] = uni(next(keys), (100, 50, 10), 50 * 10)
    p["conv_s1_b"] = uni(next(keys), (100,), 50 * 10)
    p["conv_a1_w"] = uni(next(keys), (100, 50, 10), 50 * 10)
    p["conv_a1_b"] = uni(next(keys), (100,), 50 * 10)
    p["conv_s2_w"] = uni(next(keys), (100, 100, 10), 100 * 10)
    p["conv_s2_b"] = uni(next(keys), (100,), 100 * 10)
    p["conv_a2_w"] = uni(next(keys), (100, 100, 10), 100 * 10)
    p["conv_a2_b"] = uni(next(keys), (100,), 100 * 10)
    p["fc_s1_w"] = uni(next(keys), (128, 600), 600)
    p["fc_s1_b"] = uni(next(keys), (128,), 600)
    p["fc_a1_w"] = uni(next(keys), (128, 600), 600)
    p["fc_a1_b"] = uni(next(keys), (128,), 600)
    p["fc_s2_w"] = uni(next(keys), (16, 128), 128)
    p["fc_s2_b"] = uni(next(keys), (16,), 128)
    p["fc_a2_w"] = uni(next(keys), (16, 128), 128)
    p["fc_a2_b"] = uni(next(keys), (16,), 128)
    p["fc3_w"] = uni(next(keys), (4, 32), 32)
    p["fc3_b"] = uni(next(keys), (4,), 32)
    for name, c in [("bn_s1", 128), ("bn_a1", 128), ("bn_s2", 16),
                    ("bn_a2", 16), ("bn3", 4)]:
        p[name + "_g"] = jnp.ones((c,), jnp.float32)
        p[name + "_b"] = jnp.zeros((c,), jnp.float32)
    return p


if __name__ == "__main__":
    key = jax.random.PRNGKey(0)
    k_p, k_sti, k_amp = jax.random.split(key, 3)

    raw = init_params(k_p)
    prep = prepare_params(raw)   # one-time layout / padding / bf16 conversion

    # Linear(600, 128) forces 6 spatial positions * 100 channels after the
    # conv/pool stack -> input length 224; batch kept small.
    B = 4
    STI = jax.random.normal(k_sti, (B, CIN, L0), jnp.float32)
    AMP = jax.random.normal(k_amp, (B, CIN, L0), jnp.float32)

    fwd = jax.jit(student_forward)
    out = jax.block_until_ready(fwd(prep, STI, AMP))

    assert out.shape == (B, 4), out.shape
    assert bool(jnp.all(jnp.isfinite(out)))
    print("KERNEL_OK")
</pallas_src>

<mosaic_0001>
module attributes {stable_mosaic.version = 11 : i64} {
  func.func @_stream_kernel(%arg0: i32, %arg1: memref<1x224x512xbf16, #tpu.memory_space<vmem>>, %arg2: memref<1x224x512xbf16, #tpu.memory_space<vmem>>, %arg3: memref<1x512x128xbf16, #tpu.memory_space<vmem>>, %arg4: memref<1x1x128xf32, #tpu.memory_space<vmem>>, %arg5: memref<1x1280x128xbf16, #tpu.memory_space<vmem>>, %arg6: memref<1x1x128xf32, #tpu.memory_space<vmem>>, %arg7: memref<1x768x128xbf16, #tpu.memory_space<vmem>>, %arg8: memref<1x1x128xf32, #tpu.memory_space<vmem>>, %arg9: memref<1x1x128xf32, #tpu.memory_space<vmem>>, %arg10: memref<1x1x128xf32, #tpu.memory_space<vmem>>, %arg11: memref<1x128x128xbf16, #tpu.memory_space<vmem>>, %arg12: memref<1x1x128xf32, #tpu.memory_space<vmem>>, %arg13: memref<1x1x128xf32, #tpu.memory_space<vmem>>, %arg14: memref<1x1x128xf32, #tpu.memory_space<vmem>>, %arg15: memref<1x128x4xf32, #tpu.memory_space<vmem>>, %arg16: memref<1x4x4xf32, #tpu.memory_space<vmem>>, %arg17: memref<224x128xf32, #tpu.memory_space<vmem>>, %arg18: memref<24x1280xf32, #tpu.memory_space<vmem>>, %arg19: memref<24x1280xf32, #tpu.memory_space<vmem>>, %arg20: memref<24x128xf32, #tpu.memory_space<vmem>>, %arg21: memref<4x768xf32, #tpu.memory_space<vmem>>) attributes {dimension_semantics = [#tpu.dimension_semantics<parallel>], iteration_bounds = array<i64: 2>, scalar_prefetch = 0 : i64, scratch_operands = 5 : i64, tpu.core_type = #tpu.core_type<tc>, window_params = [{transform_indices = @transform_0, window_bounds = array<i64: 1, 224, 512>}, {transform_indices = @transform_1, window_bounds = array<i64: 1, 224, 512>}, {transform_indices = @transform_2, window_bounds = array<i64: 1, 512, 128>}, {transform_indices = @transform_3, window_bounds = array<i64: 1, 1, 128>}, {transform_indices = @transform_4, window_bounds = array<i64: 1, 1280, 128>}, {transform_indices = @transform_5, window_bounds = array<i64: 1, 1, 128>}, {transform_indices = @transform_6, window_bounds = array<i64: 1, 768, 128>}, {transform_indices = @transform_7, window_bounds = array<i64: 1, 1, 128>}, {transform_indices = @transform_8, window_bounds = array<i64: 1, 1, 128>}, {transform_indices = @transform_9, window_bounds = array<i64: 1, 1, 128>}, {transform_indices = @transform_10, window_bounds = array<i64: 1, 128, 128>}, {transform_indices = @transform_11, window_bounds = array<i64: 1, 1, 128>}, {transform_indices = @transform_12, window_bounds = array<i64: 1, 1, 128>}, {transform_indices = @transform_13, window_bounds = array<i64: 1, 1, 128>}, {transform_indices = @transform_14, window_bounds = array<i64: 1, 128, 4>}, {transform_indices = @transform_15, window_bounds = array<i64: 1, 4, 4>}]} {
    %c0 = arith.constant 0 : index
    %c0_0 = arith.constant 0 : index
    %c0_1 = arith.constant 0 : index
    %0 = vector.load %arg4[%c0, %c0_0, %c0_1] : memref<1x1x128xf32, #tpu.memory_space<vmem>>, vector<1x1x128xf32>
    %1 = vector.shape_cast %0 : vector<1x1x128xf32> to vector<1x128xf32>
    %c0_2 = arith.constant 0 : index
    %c0_3 = arith.constant 0 : index
    %c0_4 = arith.constant 0 : index
    %2 = vector.load %arg3[%c0_2, %c0_3, %c0_4] : memref<1x512x128xbf16, #tpu.memory_space<vmem>>, vector<1x512x128xbf16>
    %3 = vector.shape_cast %2 : vector<1x512x128xbf16> to vector<512x128xbf16>
    %c0_5 = arith.constant 0 : index
    %c0_6 = arith.constant 0 : index
    %c0_7 = arith.constant 0 : index
    %4 = vector.load %arg1[%c0_5, %c0_6, %c0_7] : memref<1x224x512xbf16, #tpu.memory_space<vmem>>, vector<1x224x512xbf16>
    %5 = vector.shape_cast %4 : vector<1x224x512xbf16> to vector<224x512xbf16>
    %cst = arith.constant dense<0.000000e+00> : vector<224x128xf32>
    %6 = tpu.matmul %5, %3, %cst {dimension_numbers = #tpu.dot_dimension_numbers<[1], [0], [0], [1], [0, 0, 1, 1], [], []>} : vector<224x512xbf16>, vector<512x128xbf16>, vector<224x128xf32> -> vector<224x128xf32>
    %c0_8 = arith.constant 0 : index
    %c0_9 = arith.constant 0 : index
    %c0_10 = arith.constant 0 : index
    %7 = vector.load %arg2[%c0_8, %c0_9, %c0_10] : memref<1x224x512xbf16, #tpu.memory_space<vmem>>, vector<1x224x512xbf16>
    %8 = vector.shape_cast %7 : vector<1x224x512xbf16> to vector<224x512xbf16>
    %cst_11 = arith.constant dense<0.000000e+00> : vector<224x128xf32>
    %9 = tpu.matmul %8, %3, %cst_11 {dimension_numbers = #tpu.dot_dimension_numbers<[1], [0], [0], [1], [0, 0, 1, 1], [], []>} : vector<224x512xbf16>, vector<512x128xbf16>, vector<224x128xf32> -> vector<224x128xf32>
    %10 = vector.broadcast %1 : vector<1x128xf32> to vector<224x128xf32>
    %11 = arith.addf %6, %10 : vector<224x128xf32>
    %cst_12 = arith.constant 0.000000e+00 : f32
    %12 = vector.broadcast %cst_12 : f32 to vector<224x128xf32>
    %13 = arith.maximumf %11, %12 : vector<224x128xf32>
    %14 = vector.broadcast %1 : vector<1x128xf32> to vector<224x128xf32>
    %15 = arith.addf %9, %14 : vector<224x128xf32>
    %cst_13 = arith.constant 0.000000e+00 : f32
    %16 = vector.broadcast %cst_13 : f32 to vector<224x128xf32>
    %17 = arith.maximumf %15, %16 : vector<224x128xf32>
    %18 = arith.maximumf %13, %17 : vector<224x128xf32>
    %c0_14 = arith.constant 0 : index
    %c0_15 = arith.constant 0 : index
    %19 = vector.load %arg17[%c0_14, %c0_15] : memref<224x128xf32, #tpu.memory_space<vmem>>, vector<224x128xf32>
    tpu.vector_store %arg17[%c0_14, %c0_15], %18 {strides = array<i32>} : memref<224x128xf32, #tpu.memory_space<vmem>>, vector<224x128xf32>,
    %c0_16 = arith.constant 0 : index
    %c0_17 = arith.constant 0 : index
    %20 = vector.load %arg17[%c0_16, %c0_17] : memref<224x128xf32, #tpu.memory_space<vmem>>, vector<6x128xf32>
    %c0_18 = arith.constant 0 : index
    %c0_19 = arith.constant 0 : index
    %21 = vector.load %arg18[%c0_18, %c0_19] : memref<24x1280xf32, #tpu.memory_space<vmem>>, vector<6x128xf32>
    tpu.vector_store %arg18[%c0_18, %c0_19], %20 {strides = array<i32>} : memref<24x1280xf32, #tpu.memory_space<vmem>>, vector<6x128xf32>,
    %c28 = arith.constant 28 : index
    %c0_20 = arith.constant 0 : index
    %22 = vector.load %arg17[%c28, %c0_20] : memref<224x128xf32, #tpu.memory_space<vmem>>, vector<6x128xf32>
    %c0_21 = arith.constant 0 : index
    %c0_22 = arith.constant 0 : index
    %23 = vector.load %arg19[%c0_21, %c0_22] : memref<24x1280xf32, #tpu.memory_space<vmem>>, vector<6x128xf32>
    tpu.vector_store %arg19[%c0_21, %c0_22], %22 {strides = array<i32>} : memref<24x1280xf32, #tpu.memory_space<vmem>>, vector<6x128xf32>,
    %c7 = arith.constant 7 : index
    %c0_23 = arith.constant 0 : index
    %24 = vector.load %arg17[%c7, %c0_23] : memref<224x128xf32, #tpu.memory_space<vmem>>, vector<6x128xf32>
    %c0_24 = arith.constant 0 : index
    %c128 = arith.constant 128 : index
    %25 = vector.load %arg18[%c0_24, %c128] : memref<24x1280xf32, #tpu.memory_space<vmem>>, vector<6x128xf32>
    tpu.vector_store %arg18[%c0_24, %c128], %24 {strides = array<i32>} : memref<24x1280xf32, #tpu.memory_space<vmem>>, vector<6x128xf32>,
    %c35 = arith.constant 35 : index
    %c0_25 = arith.constant 0 : index
    %26 = vector.load %arg17[%c35, %c0_25] : memref<224x128xf32, #tpu.memory_space<vmem>>, vector<6x128xf32>
    %c0_26 = arith.constant 0 : index
    %c128_27 = arith.constant 128 : index
    %27 = vector.load %arg19[%c0_26, %c128_27] : memref<24x1280xf32, #tpu.memory_space<vmem>>, vector<6x128xf32>
    tpu.vector_store %arg19[%c0_26, %c128_27], %26 {strides = array<i32>} : memref<24x1280xf32, #tpu.memory_space<vmem>>, vector<6x128xf32>,
    %c14 = arith.constant 14 : index
    %c0_28 = arith.constant 0 : index
    %28 = vector.load %arg17[%c14, %c0_28] : memref<224x128xf32, #tpu.memory_space<vmem>>, vector<6x128xf32>
    %c0_29 = arith.constant 0 : index
    %c256 = arith.constant 256 : index
    %29 = vector.load %arg18[%c0_29, %c256] : memref<24x1280xf32, #tpu.memory_space<vmem>>, vector<6x128xf32>
    tpu.vector_store %arg18[%c0_29, %c256], %28 {strides = array<i32>} : memref<24x1280xf32, #tpu.memory_space<vmem>>, vector<6x128xf32>,
    %c42 = arith.constant 42 : index
    %c0_30 = arith.constant 0 : index
    %30 = vector.load %arg17[%c42, %c0_30] : memref<224x128xf32, #tpu.memory_space<vmem>>, vector<6x128xf32>
    %c0_31 = arith.constant 0 : index
    %c256_32 = arith.constant 256 : index
    %31 = vector.load %arg19[%c0_31, %c256_32] : memref<24x1280xf32, #tpu.memory_space<vmem>>, vector<6x128xf32>
    tpu.vector_store %arg19[%c0_31, %c256_32], %30 {strides = array<i32>} : memref<24x1280xf32, #tpu.memory_space<vmem>>, vector<6x128xf32>,
    %c21 = arith.constant 21 : index
    %c0_33 = arith.constant 0 : index
    %32 = vector.load %arg17[%c21, %c0_33] : memref<224x128xf32, #tpu.memory_space<vmem>>, vector<6x128xf32>
    %c0_34 = arith.constant 0 : index
    %c384 = arith.constant 384 : index
    %33 = vector.load %arg18[%c0_34, %c384] : memref<24x1280xf32, #tpu.memory_space<vmem>>, vector<6x128xf32>
    tpu.vector_store %arg18[%c0_34, %c384], %32 {strides = array<i32>} : memref<24x1280xf32, #tpu.memory_space<vmem>>, vector<6x128xf32>,
    %c49 = arith.constant 49 : index
    %c0_35 = arith.constant 0 : index
    %34 = vector.load %arg17[%c49, %c0_35] : memref<224x128xf32, #tpu.memory_space<vmem>>, vector<6x128xf32>
    %c0_36 = arith.constant 0 : index
    %c384_37 = arith.constant 384 : index
    %35 = vector.load %arg19[%c0_36, %c384_37] : memref<24x1280xf32, #tpu.memory_space<vmem>>, vector<6x128xf32>
    tpu.vector_store %arg19[%c0_36, %c384_37], %34 {strides = array<i32>} : memref<24x1280xf32, #tpu.memory_space<vmem>>, vector<6x128xf32>,
    %c28_38 = arith.constant 28 : index
    %c0_39 = arith.constant 0 : index
    %36 = vector.load %arg17[%c28_38, %c0_39] : memref<224x128xf32, #tpu.memory_space<vmem>>, vector<6x128xf32>
    %c0_40 = arith.constant 0 : index
    %c512 = arith.constant 512 : index
    %37 = vector.load %arg18[%c0_40, %c512] : memref<24x1280xf32, #tpu.memory_space<vmem>>, vector<6x128xf32>
    tpu.vector_store %arg18[%c0_40, %c512], %36 {strides = array<i32>} : memref<24x1280xf32, #tpu.memory_space<vmem>>, vector<6x128xf32>,
    %c1 = arith.constant 1 : index
    %c0_41 = arith.constant 0 : index
    %38 = vector.load %arg17[%c1, %c0_41] : memref<224x128xf32, #tpu.memory_space<vmem>>, vector<6x128xf32>
    %c0_42 = arith.constant 0 : index
    %c512_43 = arith.constant 512 : index
    %39 = vector.load %arg19[%c0_42, %c512_43] : memref<24x1280xf32, #tpu.memory_space<vmem>>, vector<6x128xf32>
    tpu.vector_store %arg19[%c0_42, %c512_43], %38 {strides = array<i32>} : memref<24x1280xf32, #tpu.memory_space<vmem>>, vector<6x128xf32>,
    %c35_44 = arith.constant 35 : index
    %c0_45 = arith.constant 0 : index
    %40 = vector.load %arg17[%c35_44, %c0_45] : memref<224x128xf32, #tpu.memory_space<vmem>>, vector<6x128xf32>
    %c0_46 = arith.constant 0 : index
    %c640 = arith.constant 640 : index
    %41 = vector.load %arg18[%c0_46, %c640] : memref<24x1280xf32, #tpu.memory_space<vmem>>, vector<6x128xf32>
    tpu.vector_store %arg18[%c0_46, %c640], %40 {strides = array<i32>} : memref<24x1280xf32, #tpu.memory_space<vmem>>, vector<6x128xf32>,
    %c8 = arith.constant 8 : index
    %c0_47 = arith.constant 0 : index
    %42 = vector.load %arg17[%c8, %c0_47] : memref<224x128xf32, #tpu.memory_space<vmem>>, vector<6x128xf32>
    %c0_48 = arith.constant 0 : index
    %c640_49 = arith.constant 640 : index
    %43 = vector.load %arg19[%c0_48, %c640_49] : memref<24x1280xf32, #tpu.memory_space<vmem>>, vector<6x128xf32>
    tpu.vector_store %arg19[%c0_48, %c640_49], %42 {strides = array<i32>} : memref<24x1280xf32, #tpu.memory_space<vmem>>, vector<6x128xf32>,
    %c42_50 = arith.constant 42 : index
    %c0_51 = arith.constant 0 : index
    %44 = vector.load %arg17[%c42_50, %c0_51] : memref<224x128xf32, #tpu.memory_space<vmem>>, vector<6x128xf32>
    %c0_52 = arith.constant 0 : index
    %c768 = arith.constant 768 : index
    %45 = vector.load %arg18[%c0_52, %c768] : memref<24x1280xf32, #tpu.memory_space<vmem>>, vector<6x128xf32>
    tpu.vector_store %arg18[%c0_52, %c768], %44 {strides = array<i32>} : memref<24x1280xf32, #tpu.memory_space<vmem>>, vector<6x128xf32>,
    %c15 = arith.constant 15 : index
    %c0_53 = arith.constant 0 : index
    %46 = vector.load %arg17[%c15, %c0_53] : memref<224x128xf32, #tpu.memory_space<vmem>>, vector<6x128xf32>
    %c0_54 = arith.constant 0 : index
    %c768_55 = arith.constant 768 : index
    %47 = vector.load %arg19[%c0_54, %c768_55] : memref<24x1280xf32, #tpu.memory_space<vmem>>, vector<6x128xf32>
    tpu.vector_store %arg19[%c0_54, %c768_55], %46 {strides = array<i32>} : memref<24x1280xf32, #tpu.memory_space<vmem>>, vector<6x128xf32>,
    %c49_56 = arith.constant 49 : index
    %c0_57 = arith.constant 0 : index
    %48 = vector.load %arg17[%c49_56, %c0_57] : memref<224x128xf32, #tpu.memory_space<vmem>>, vector<6x128xf32>
    %c0_58 = arith.constant 0 : index
    %c896 = arith.constant 896 : index
    %49 = vector.load %arg18[%c0_58, %c896] : memref<24x1280xf32, #tpu.memory_space<vmem>>, vector<6x128xf32>
    tpu.vector_store %arg18[%c0_58, %c896], %48 {strides = array<i32>} : memref<24x1280xf32, #tpu.memory_space<vmem>>, vector<6x128xf32>,
    %c22 = arith.constant 22 : index
    %c0_59 = arith.constant 0 : index
    %50 = vector.load %arg17[%c22, %c0_59] : memref<224x128xf32, #tpu.memory_space<vmem>>, vector<6x128xf32>
    %c0_60 = arith.constant 0 : index
    %c896_61 = arith.constant 896 : index
    %51 = vector.load %arg19[%c0_60, %c896_61] : memref<24x1280xf32, #tpu.memory_space<vmem>>, vector<6x128xf32>
    tpu.vector_store %arg19[%c0_60, %c896_61], %50 {strides = array<i32>} : memref<24x1280xf32, #tpu.memory_space<vmem>>, vector<6x128xf32>,
    %c1_62 = arith.constant 1 : index
    %c0_63 = arith.constant 0 : index
    %52 = vector.load %arg17[%c1_62, %c0_63] : memref<224x128xf32, #tpu.memory_space<vmem>>, vector<6x128xf32>
    %c0_64 = arith.constant 0 : index
    %c1024 = arith.constant 1024 : index
    %53 = vector.load %arg18[%c0_64, %c1024] : memref<24x1280xf32, #tpu.memory_space<vmem>>, vector<6x128xf32>
    tpu.vector_store %arg18[%c0_64, %c1024], %52 {strides = array<i32>} : memref<24x1280xf32, #tpu.memory_space<vmem>>, vector<6x128xf32>,
    %c29 = arith.constant 29 : index
    %c0_65 = arith.constant 0 : index
    %54 = vector.load %arg17[%c29, %c0_65] : memref<224x128xf32, #tpu.memory_space<vmem>>, vector<6x128xf32>
    %c0_66 = arith.constant 0 : index
    %c1024_67 = arith.constant 1024 : index
    %55 = vector.load %arg19[%c0_66, %c1024_67] : memref<24x1280xf32, #tpu.memory_space<vmem>>, vector<6x128xf32>
    tpu.vector_store %arg19[%c0_66, %c1024_67], %54 {strides = array<i32>} : memref<24x1280xf32, #tpu.memory_space<vmem>>, vector<6x128xf32>,
    %c8_68 = arith.constant 8 : index
    %c0_69 = arith.constant 0 : index
    %56 = vector.load %arg17[%c8_68, %c0_69] : memref<224x128xf32, #tpu.memory_space<vmem>>, vector<6x128xf32>
    %c0_70 = arith.constant 0 : index
    %c1152 = arith.constant 1152 : index
    %57 = vector.load %arg18[%c0_70, %c1152] : memref<24x1280xf32, #tpu.memory_space<vmem>>, vector<6x128xf32>
    tpu.vector_store %arg18[%c0_70, %c1152], %56 {strides = array<i32>} : memref<24x1280xf32, #tpu.memory_space<vmem>>, vector<6x128xf32>,
    %c36 = arith.constant 36 : index
    %c0_71 = arith.constant 0 : index
    %58 = vector.load %arg17[%c36, %c0_71] : memref<224x128xf32, #tpu.memory_space<vmem>>, vector<6x128xf32>
    %c0_72 = arith.constant 0 : index
    %c1152_73 = arith.constant 1152 : index
    %59 = vector.load %arg19[%c0_72, %c1152_73] : memref<24x1280xf32, #tpu.memory_space<vmem>>, vector<6x128xf32>
    tpu.vector_store %arg19[%c0_72, %c1152_73], %58 {strides = array<i32>} : memref<24x1280xf32, #tpu.memory_space<vmem>>, vector<6x128xf32>,
    %c56 = arith.constant 56 : index
    %c0_74 = arith.constant 0 : index
    %60 = vector.load %arg17[%c56, %c0_74] : memref<224x128xf32, #tpu.memory_space<vmem>>, vector<6x128xf32>
    %c6 = arith.constant 6 : index
    %c0_75 = arith.constant 0 : index
    %61 = vector.load %arg18[%c6, %c0_75] : memref<24x1280xf32, #tpu.memory_space<vmem>>, vector<6x128xf32>
    tpu.vector_store %arg18[%c6, %c0_75], %60 {strides = array<i32>} : memref<24x1280xf32, #tpu.memory_space<vmem>>, vector<6x128xf32>,
    %c84 = arith.constant 84 : index
    %c0_76 = arith.constant 0 : index
    %62 = vector.load %arg17[%c84, %c0_76] : memref<224x128xf32, #tpu.memory_space<vmem>>, vector<6x128xf32>
    %c6_77 = arith.constant 6 : index
    %c0_78 = arith.constant 0 : index
    %63 = vector.load %arg19[%c6_77, %c0_78] : memref<24x1280xf32, #tpu.memory_space<vmem>>, vector<6x128xf32>
    tpu.vector_store %arg19[%c6_77, %c0_78], %62 {strides = array<i32>} : memref<24x1280xf32, #tpu.memory_space<vmem>>, vector<6x128xf32>,
    %c63 = arith.constant 63 : index
    %c0_79 = arith.constant 0 : index
    %64 = vector.load %arg17[%c63, %c0_79] : memref<224x128xf32, #tpu.memory_space<vmem>>, vector<6x128xf32>
    %c6_80 = arith.constant 6 : index
    %c128_81 = arith.constant 128 : index
    %65 = vector.load %arg18[%c6_80, %c128_81] : memref<24x1280xf32, #tpu.memory_space<vmem>>, vector<6x128xf32>
    tpu.vector_store %arg18[%c6_80, %c128_81], %64 {strides = array<i32>} : memref<24x1280xf32, #tpu.memory_space<vmem>>, vector<6x128xf32>,
    %c91 = arith.constant 91 : index
    %c0_82 = arith.constant 0 : index
    %66 = vector.load %arg17[%c91, %c0_82] : memref<224x128xf32, #tpu.memory_space<vmem>>, vector<6x128xf32>
    %c6_83 = arith.constant 6 : index
    %c128_84 = arith.constant 128 : index
    %67 = vector.load %arg19[%c6_83, %c128_84] : memref<24x1280xf32, #tpu.memory_space<vmem>>, vector<6x128xf32>
    tpu.vector_store %arg19[%c6_83, %c128_84], %66 {strides = array<i32>} : memref<24x1280xf32, #tpu.memory_space<vmem>>, vector<6x128xf32>,
    %c70 = arith.constant 70 : index
    %c0_85 = arith.constant 0 : index
    %68 = vector.load %arg17[%c70, %c0_85] : memref<224x128xf32, #tpu.memory_space<vmem>>, vector<6x128xf32>
    %c6_86 = arith.constant 6 : index
    %c256_87 = arith.constant 256 : index
    %69 = vector.load %arg18[%c6_86, %c256_87] : memref<24x1280xf32, #tpu.memory_space<vmem>>, vector<6x128xf32>
    tpu.vector_store %arg18[%c6_86, %c256_87], %68 {strides = array<i32>} : memref<24x1280xf32, #tpu.memory_space<vmem>>, vector<6x128xf32>,
    %c98 = arith.constant 98 : index
    %c0_88 = arith.constant 0 : index
    %70 = vector.load %arg17[%c98, %c0_88] : memref<224x128xf32, #tpu.memory_space<vmem>>, vector<6x128xf32>
    %c6_89 = arith.constant 6 : index
    %c256_90 = arith.constant 256 : index
    %71 = vector.load %arg19[%c6_89, %c256_90] : memref<24x1280xf32, #tpu.memory_space<vmem>>, vector<6x128xf32>
    tpu.vector_store %arg19[%c6_89, %c256_90], %70 {strides = array<i32>} : memref<24x1280xf32, #tpu.memory_space<vmem>>, vector<6x128xf32>,
    %c77 = arith.constant 77 : index
    %c0_91 = arith.constant 0 : index
    %72 = vector.load %arg17[%c77, %c0_91] : memref<224x128xf32, #tpu.memory_space<vmem>>, vector<6x128xf32>
    %c6_92 = arith.constant 6 : index
    %c384_93 = arith.constant 384 : index
    %73 = vector.load %arg18[%c6_92, %c384_93] : memref<24x1280xf32, #tpu.memory_space<vmem>>, vector<6x128xf32>
    tpu.vector_store %arg18[%c6_92, %c384_93], %72 {strides = array<i32>} : memref<24x1280xf32, #tpu.memory_space<vmem>>, vector<6x128xf32>,
    %c105 = arith.constant 105 : index
    %c0_94 = arith.constant 0 : index
    %74 = vector.load %arg17[%c105, %c0_94] : memref<224x128xf32, #tpu.memory_space<vmem>>, vector<6x128xf32>
    %c6_95 = arith.constant 6 : index
    %c384_96 = arith.constant 384 : index
    %75 = vector.load %arg19[%c6_95, %c384_96] : memref<24x1280xf32, #tpu.memory_space<vmem>>, vector<6x128xf32>
    tpu.vector_store %arg19[%c6_95, %c384_96], %74 {strides = array<i32>} : memref<24x1280xf32, #tpu.memory_space<vmem>>, vector<6x128xf32>,
    %c84_97 = arith.constant 84 : index
    %c0_98 = arith.constant 0 : index
    %76 = vector.load %arg17[%c84_97, %c0_98] : memref<224x128xf32, #tpu.memory_space<vmem>>, vector<6x128xf32>
    %c6_99 = arith.constant 6 : index
    %c512_100 = arith.constant 512 : index
    %77 = vector.load %arg18[%c6_99, %c512_100] : memref<24x1280xf32, #tpu.memory_space<vmem>>, vector<6x128xf32>
    tpu.vector_store %arg18[%c6_99, %c512_100], %76 {strides = array<i32>} : memref<24x1280xf32, #tpu.memory_space<vmem>>, vector<6x128xf32>,
    %c57 = arith.constant 57 : index
    %c0_101 = arith.constant 0 : index
    %78 = vector.load %arg17[%c57, %c0_101] : memref<224x128xf32, #tpu.memory_space<vmem>>, vector<6x128xf32>
    %c6_102 = arith.constant 6 : index
    %c512_103 = arith.constant 512 : index
    %79 = vector.load %arg19[%c6_102, %c512_103] : memref<24x1280xf32, #tpu.memory_space<vmem>>, vector<6x128xf32>
    tpu.vector_store %arg19[%c6_102, %c512_103], %78 {strides = array<i32>} : memref<24x1280xf32, #tpu.memory_space<vmem>>, vector<6x128xf32>,
    %c91_104 = arith.constant 91 : index
    %c0_105 = arith.constant 0 : index
    %80 = vector.load %arg17[%c91_104, %c0_105] : memref<224x128xf32, #tpu.memory_space<vmem>>, vector<6x128xf32>
    %c6_106 = arith.constant 6 : index
    %c640_107 = arith.constant 640 : index
    %81 = vector.load %arg18[%c6_106, %c640_107] : memref<24x1280xf32, #tpu.memory_space<vmem>>, vector<6x128xf32>
    tpu.vector_store %arg18[%c6_106, %c640_107], %80 {strides = array<i32>} : memref<24x1280xf32, #tpu.memory_space<vmem>>, vector<6x128xf32>,
    %c64 = arith.constant 64 : index
    %c0_108 = arith.constant 0 : index
    %82 = vector.load %arg17[%c64, %c0_108] : memref<224x128xf32, #tpu.memory_space<vmem>>, vector<6x128xf32>
    %c6_109 = arith.constant 6 : index
    %c640_110 = arith.constant 640 : index
    %83 = vector.load %arg19[%c6_109, %c640_110] : memref<24x1280xf32, #tpu.memory_space<vmem>>, vector<6x128xf32>
    tpu.vector_store %arg19[%c6_109, %c640_110], %82 {strides = array<i32>} : memref<24x1280xf32, #tpu.memory_space<vmem>>, vector<6x128xf32>,
    %c98_111 = arith.constant 98 : index
    %c0_112 = arith.constant 0 : index
    %84 = vector.load %arg17[%c98_111, %c0_112] : memref<224x128xf32, #tpu.memory_space<vmem>>, vector<6x128xf32>
    %c6_113 = arith.constant 6 : index
    %c768_114 = arith.constant 768 : index
    %85 = vector.load %arg18[%c6_113, %c768_114] : memref<24x1280xf32, #tpu.memory_space<vmem>>, vector<6x128xf32>
    tpu.vector_store %arg18[%c6_113, %c768_114], %84 {strides = array<i32>} : memref<24x1280xf32, #tpu.memory_space<vmem>>, vector<6x128xf32>,
    %c71 = arith.constant 71 : index
    %c0_115 = arith.constant 0 : index
    %86 = vector.load %arg17[%c71, %c0_115] : memref<224x128xf32, #tpu.memory_space<vmem>>, vector<6x128xf32>
    %c6_116 = arith.constant 6 : index
    %c768_117 = arith.constant 768 : index
    %87 = vector.load %arg19[%c6_116, %c768_117] : memref<24x1280xf32, #tpu.memory_space<vmem>>, vector<6x128xf32>
    tpu.vector_store %arg19[%c6_116, %c768_117], %86 {strides = array<i32>} : memref<24x1280xf32, #tpu.memory_space<vmem>>, vector<6x128xf32>,
    %c105_118 = arith.constant 105 : index
    %c0_119 = arith.constant 0 : index
    %88 = vector.load %arg17[%c105_118, %c0_119] : memref<224x128xf32, #tpu.memory_space<vmem>>, vector<6x128xf32>
    %c6_120 = arith.constant 6 : index
    %c896_121 = arith.constant 896 : index
    %89 = vector.load %arg18[%c6_120, %c896_121] : memref<24x1280xf32, #tpu.memory_space<vmem>>, vector<6x128xf32>
    tpu.vector_store %arg18[%c6_120, %c896_121], %88 {strides = array<i32>} : memref<24x1280xf32, #tpu.memory_space<vmem>>, vector<6x128xf32>,
    %c78 = arith.constant 78 : index
    %c0_122 = arith.constant 0 : index
    %90 = vector.load %arg17[%c78, %c0_122] : memref<224x128xf32, #tpu.memory_space<vmem>>, vector<6x128xf32>
    %c6_123 = arith.constant 6 : index
    %c896_124 = arith.constant 896 : index
    %91 = vector.load %arg19[%c6_123, %c896_124] : memref<24x1280xf32, #tpu.memory_space<vmem>>, vector<6x128xf32>
    tpu.vector_store %arg19[%c6_123, %c896_124], %90 {strides = array<i32>} : memref<24x1280xf32, #tpu.memory_space<vmem>>, vector<6x128xf32>,
    %c57_125 = arith.constant 57 : index
    %c0_126 = arith.constant 0 : index
    %92 = vector.load %arg17[%c57_125, %c0_126] : memref<224x128xf32, #tpu.memory_space<vmem>>, vector<6x128xf32>
    %c6_127 = arith.constant 6 : index
    %c1024_128 = arith.constant 1024 : index
    %93 = vector.load %arg18[%c6_127, %c1024_128] : memref<24x1280xf32, #tpu.memory_space<vmem>>, vector<6x128xf32>
    tpu.vector_store %arg18[%c6_127, %c1024_128], %92 {strides = array<i32>} : memref<24x1280xf32, #tpu.memory_space<vmem>>, vector<6x128xf32>,
    %c85 = arith.constant 85 : index
    %c0_129 = arith.constant 0 : index
    %94 = vector.load %arg17[%c85, %c0_129] : memref<224x128xf32, #tpu.memory_space<vmem>>, vector<6x128xf32>
    %c6_130 = arith.constant 6 : index
    %c1024_131 = arith.constant 1024 : index
    %95 = vector.load %arg19[%c6_130, %c1024_131] : memref<24x1280xf32, #tpu.memory_space<vmem>>, vector<6x128xf32>
    tpu.vector_store %arg19[%c6_130, %c1024_131], %94 {strides = array<i32>} : memref<24x1280xf32, #tpu.memory_space<vmem>>, vector<6x128xf32>,
    %c64_132 = arith.constant 64 : index
    %c0_133 = arith.constant 0 : index
    %96 = vector.load %arg17[%c64_132, %c0_133] : memref<224x128xf32, #tpu.memory_space<vmem>>, vector<6x128xf32>
    %c6_134 = arith.constant 6 : index
    %c1152_135 = arith.constant 1152 : index
    %97 = vector.load %arg18[%c6_134, %c1152_135] : memref<24x1280xf32, #tpu.memory_space<vmem>>, vector<6x128xf32>
    tpu.vector_store %arg18[%c6_134, %c1152_135], %96 {strides = array<i32>} : memref<24x1280xf32, #tpu.memory_space<vmem>>, vector<6x128xf32>,
    %c92 = arith.constant 92 : index
    %c0_136 = arith.constant 0 : index
    %98 = vector.load %arg17[%c92, %c0_136] : memref<224x128xf32, #tpu.memory_space<vmem>>, vector<6x128xf32>
    %c6_137 = arith.constant 6 : index
    %c1152_138 = arith.constant 1152 : index
    %99 = vector.load %arg19[%c6_137, %c1152_138] : memref<24x1280xf32, #tpu.memory_space<vmem>>, vector<6x128xf32>
    tpu.vector_store %arg19[%c6_137, %c1152_138], %98 {strides = array<i32>} : memref<24x1280xf32, #tpu.memory_space<vmem>>, vector<6x128xf32>,
    %c112 = arith.constant 112 : index
    %c0_139 = arith.constant 0 : index
    %100 = vector.load %arg17[%c112, %c0_139] : memref<224x128xf32, #tpu.memory_space<vmem>>, vector<6x128xf32>
    %c12 = arith.constant 12 : index
    %c0_140 = arith.constant 0 : index
    %101 = vector.load %arg18[%c12, %c0_140] : memref<24x1280xf32, #tpu.memory_space<vmem>>, vector<6x128xf32>
    tpu.vector_store %arg18[%c12, %c0_140], %100 {strides = array<i32>} : memref<24x1280xf32, #tpu.memory_space<vmem>>, vector<6x128xf32>,
    %c140 = arith.constant 140 : index
    %c0_141 = arith.constant 0 : index
    %102 = vector.load %arg17[%c140, %c0_141] : memref<224x128xf32, #tpu.memory_space<vmem>>, vector<6x128xf32>
    %c12_142 = arith.constant 12 : index
    %c0_143 = arith.constant 0 : index
    %103 = vector.load %arg19[%c12_142, %c0_143] : memref<24x1280xf32, #tpu.memory_space<vmem>>, vector<6x128xf32>
    tpu.vector_store %arg19[%c12_142, %c0_143], %102 {strides = array<i32>} : memref<24x1280xf32, #tpu.memory_space<vmem>>, vector<6x128xf32>,
    %c119 = arith.constant 119 : index
    %c0_144 = arith.constant 0 : index
    %104 = vector.load %arg17[%c119, %c0_144] : memref<224x128xf32, #tpu.memory_space<vmem>>, vector<6x128xf32>
    %c12_145 = arith.constant 12 : index
    %c128_146 = arith.constant 128 : index
    %105 = vector.load %arg18[%c12_145, %c128_146] : memref<24x1280xf32, #tpu.memory_space<vmem>>, vector<6x128xf32>
    tpu.vector_store %arg18[%c12_145, %c128_146], %104 {strides = array<i32>} : memref<24x1280xf32, #tpu.memory_space<vmem>>, vector<6x128xf32>,
    %c147 = arith.constant 147 : index
    %c0_147 = arith.constant 0 : index
    %106 = vector.load %arg17[%c147, %c0_147] : memref<224x128xf32, #tpu.memory_space<vmem>>, vector<6x128xf32>
    %c12_148 = arith.constant 12 : index
    %c128_149 = arith.constant 128 : index
    %107 = vector.load %arg19[%c12_148, %c128_149] : memref<24x1280xf32, #tpu.memory_space<vmem>>, vector<6x128xf32>
    tpu.vector_store %arg19[%c12_148, %c128_149], %106 {strides = array<i32>} : memref<24x1280xf32, #tpu.memory_space<vmem>>, vector<6x128xf32>,
    %c126 = arith.constant 126 : index
    %c0_150 = arith.constant 0 : index
    %108 = vector.load %arg17[%c126, %c0_150] : memref<224x128xf32, #tpu.memory_space<vmem>>, vector<6x128xf32>
    %c12_151 = arith.constant 12 : index
    %c256_152 = arith.constant 256 : index
    %109 = vector.load %arg18[%c12_151, %c256_152] : memref<24x1280xf32, #tpu.memory_space<vmem>>, vector<6x128xf32>
    tpu.vector_store %arg18[%c12_151, %c256_152], %108 {strides = array<i32>} : memref<24x1280xf32, #tpu.memory_space<vmem>>, vector<6x128xf32>,
    %c154 = arith.constant 154 : index
    %c0_153 = arith.constant 0 : index
    %110 = vector.load %arg17[%c154, %c0_153] : memref<224x128xf32, #tpu.memory_space<vmem>>, vector<6x128xf32>
    %c12_154 = arith.constant 12 : index
    %c256_155 = arith.constant 256 : index
    %111 = vector.load %arg19[%c12_154, %c256_155] : memref<24x1280xf32, #tpu.memory_space<vmem>>, vector<6x128xf32>
    tpu.vector_store %arg19[%c12_154, %c256_155], %110 {strides = array<i32>} : memref<24x1280xf32, #tpu.memory_space<vmem>>, vector<6x128xf32>,
    %c133 = arith.constant 133 : index
    %c0_156 = arith.constant 0 : index
    %112 = vector.load %arg17[%c133, %c0_156] : memref<224x128xf32, #tpu.memory_space<vmem>>, vector<6x128xf32>
    %c12_157 = arith.constant 12 : index
    %c384_158 = arith.constant 384 : index
    %113 = vector.load %arg18[%c12_157, %c384_158] : memref<24x1280xf32, #tpu.memory_space<vmem>>, vector<6x128xf32>
    tpu.vector_store %arg18[%c12_157, %c384_158], %112 {strides = array<i32>} : memref<24x1280xf32, #tpu.memory_space<vmem>>, vector<6x128xf32>,
    %c161 = arith.constant 161 : index
    %c0_159 = arith.constant 0 : index
    %114 = vector.load %arg17[%c161, %c0_159] : memref<224x128xf32, #tpu.memory_space<vmem>>, vector<6x128xf32>
    %c12_160 = arith.constant 12 : index
    %c384_161 = arith.constant 384 : index
    %115 = vector.load %arg19[%c12_160, %c384_161] : memref<24x1280xf32, #tpu.memory_space<vmem>>, vector<6x128xf32>
    tpu.vector_store %arg19[%c12_160, %c384_161], %114 {strides = array<i32>} : memref<24x1280xf32, #tpu.memory_space<vmem>>, vector<6x128xf32>,
    %c140_162 = arith.constant 140 : index
    %c0_163 = arith.constant 0 : index
    %116 = vector.load %arg17[%c140_162, %c0_163] : memref<224x128xf32, #tpu.memory_space<vmem>>, vector<6x128xf32>
    %c12_164 = arith.constant 12 : index
    %c512_165 = arith.constant 512 : index
    %117 = vector.load %arg18[%c12_164, %c512_165] : memref<24x1280xf32, #tpu.memory_space<vmem>>, vector<6x128xf32>
    tpu.vector_store %arg18[%c12_164, %c512_165], %116 {strides = array<i32>} : memref<24x1280xf32, #tpu.memory_space<vmem>>, vector<6x128xf32>,
    %c113 = arith.constant 113 : index
    %c0_166 = arith.constant 0 : index
    %118 = vector.load %arg17[%c113, %c0_166] : memref<224x128xf32, #tpu.memory_space<vmem>>, vector<6x128xf32>
    %c12_167 = arith.constant 12 : index
    %c512_168 = arith.constant 512 : index
    %119 = vector.load %arg19[%c12_167, %c512_168] : memref<24x1280xf32, #tpu.memory_space<vmem>>, vector<6x128xf32>
    tpu.vector_store %arg19[%c12_167, %c512_168], %118 {strides = array<i32>} : memref<24x1280xf32, #tpu.memory_space<vmem>>, vector<6x128xf32>,
    %c147_169 = arith.constant 147 : index
    %c0_170 = arith.constant 0 : index
    %120 = vector.load %arg17[%c147_169, %c0_170] : memref<224x128xf32, #tpu.memory_space<vmem>>, vector<6x128xf32>
    %c12_171 = arith.constant 12 : index
    %c640_172 = arith.constant 640 : index
    %121 = vector.load %arg18[%c12_171, %c640_172] : memref<24x1280xf32, #tpu.memory_space<vmem>>, vector<6x128xf32>
    tpu.vector_store %arg18[%c12_171, %c640_172], %120 {strides = array<i32>} : memref<24x1280xf32, #tpu.memory_space<vmem>>, vector<6x128xf32>,
    %c120 = arith.constant 120 : index
    %c0_173 = arith.constant 0 : index
    %122 = vector.load %arg17[%c120, %c0_173] : memref<224x128xf32, #tpu.memory_space<vmem>>, vector<6x128xf32>
    %c12_174 = arith.constant 12 : index
    %c640_175 = arith.constant 640 : index
    %123 = vector.load %arg19[%c12_174, %c640_175] : memref<24x1280xf32, #tpu.memory_space<vmem>>, vector<6x128xf32>
    tpu.vector_store %arg19[%c12_174, %c640_175], %122 {strides = array<i32>} : memref<24x1280xf32, #tpu.memory_space<vmem>>, vector<6x128xf32>,
    %c154_176 = arith.constant 154 : index
    %c0_177 = arith.constant 0 : index
    %124 = vector.load %arg17[%c154_176, %c0_177] : memref<224x128xf32, #tpu.memory_space<vmem>>, vector<6x128xf32>
    %c12_178 = arith.constant 12 : index
    %c768_179 = arith.constant 768 : index
    %125 = vector.load %arg18[%c12_178, %c768_179] : memref<24x1280xf32, #tpu.memory_space<vmem>>, vector<6x128xf32>
    tpu.vector_store %arg18[%c12_178, %c768_179], %124 {strides = array<i32>} : memref<24x1280xf32, #tpu.memory_space<vmem>>, vector<6x128xf32>,
    %c127 = arith.constant 127 : index
    %c0_180 = arith.constant 0 : index
    %126 = vector.load %arg17[%c127, %c0_180] : memref<224x128xf32, #tpu.memory_space<vmem>>, vector<6x128xf32>
    %c12_181 = arith.constant 12 : index
    %c768_182 = arith.constant 768 : index
    %127 = vector.load %arg19[%c12_181, %c768_182] : memref<24x1280xf32, #tpu.memory_space<vmem>>, vector<6x128xf32>
    tpu.vector_store %arg19[%c12_181, %c768_182], %126 {strides = array<i32>} : memref<24x1280xf32, #tpu.memory_space<vmem>>, vector<6x128xf32>,
    %c161_183 = arith.constant 161 : index
    %c0_184 = arith.constant 0 : index
    %128 = vector.load %arg17[%c161_183, %c0_184] : memref<224x128xf32, #tpu.memory_space<vmem>>, vector<6x128xf32>
    %c12_185 = arith.constant 12 : index
    %c896_186 = arith.constant 896 : index
    %129 = vector.load %arg18[%c12_185, %c896_186] : memref<24x1280xf32, #tpu.memory_space<vmem>>, vector<6x128xf32>
    tpu.vector_store %arg18[%c12_185, %c896_186], %128 {strides = array<i32>} : memref<24x1280xf32, #tpu.memory_space<vmem>>, vector<6x128xf32>,
    %c134 = arith.constant 134 : index
    %c0_187 = arith.constant 0 : index
    %130 = vector.load %arg17[%c134, %c0_187] : memref<224x128xf32, #tpu.memory_space<vmem>>, vector<6x128xf32>
    %c12_188 = arith.constant 12 : index
    %c896_189 = arith.constant 896 : index
    %131 = vector.load %arg19[%c12_188, %c896_189] : memref<24x1280xf32, #tpu.memory_space<vmem>>, vector<6x128xf32>
    tpu.vector_store %arg19[%c12_188, %c896_189], %130 {strides = array<i32>} : memref<24x1280xf32, #tpu.memory_space<vmem>>, vector<6x128xf32>,
    %c113_190 = arith.constant 113 : index
    %c0_191 = arith.constant 0 : index
    %132 = vector.load %arg17[%c113_190, %c0_191] : memref<224x128xf32, #tpu.memory_space<vmem>>, vector<6x128xf32>
    %c12_192 = arith.constant 12 : index
    %c1024_193 = arith.constant 1024 : index
    %133 = vector.load %arg18[%c12_192, %c1024_193] : memref<24x1280xf32, #tpu.memory_space<vmem>>, vector<6x128xf32>
    tpu.vector_store %arg18[%c12_192, %c1024_193], %132 {strides = array<i32>} : memref<24x1280xf32, #tpu.memory_space<vmem>>, vector<6x128xf32>,
    %c141 = arith.constant 141 : index
    %c0_194 = arith.constant 0 : index
    %134 = vector.load %arg17[%c141, %c0_194] : memref<224x128xf32, #tpu.memory_space<vmem>>, vector<6x128xf32>
    %c12_195 = arith.constant 12 : index
    %c1024_196 = arith.constant 1024 : index
    %135 = vector.load %arg19[%c12_195, %c1024_196] : memref<24x1280xf32, #tpu.memory_space<vmem>>, vector<6x128xf32>
    tpu.vector_store %arg19[%c12_195, %c1024_196], %134 {strides = array<i32>} : memref<24x1280xf32, #tpu.memory_space<vmem>>, vector<6x128xf32>,
    %c120_197 = arith.constant 120 : index
    %c0_198 = arith.constant 0 : index
    %136 = vector.load %arg17[%c120_197, %c0_198] : memref<224x128xf32, #tpu.memory_space<vmem>>, vector<6x128xf32>
    %c12_199 = arith.constant 12 : index
    %c1152_200 = arith.constant 1152 : index
    %137 = vector.load %arg18[%c12_199, %c1152_200] : memref<24x1280xf32, #tpu.memory_space<vmem>>, vector<6x128xf32>
    tpu.vector_store %arg18[%c12_199, %c1152_200], %136 {strides = array<i32>} : memref<24x1280xf32, #tpu.memory_space<vmem>>, vector<6x128xf32>,
    %c148 = arith.constant 148 : index
    %c0_201 = arith.constant 0 : index
    %138 = vector.load %arg17[%c148, %c0_201] : memref<224x128xf32, #tpu.memory_space<vmem>>, vector<6x128xf32>
    %c12_202 = arith.constant 12 : index
    %c1152_203 = arith.constant 1152 : index
    %139 = vector.load %arg19[%c12_202, %c1152_203] : memref<24x1280xf32, #tpu.memory_space<vmem>>, vector<6x128xf32>
    tpu.vector_store %arg19[%c12_202, %c1152_203], %138 {strides = array<i32>} : memref<24x1280xf32, #tpu.memory_space<vmem>>, vector<6x128xf32>,
    %c168 = arith.constant 168 : index
    %c0_204 = arith.constant 0 : index
    %140 = vector.load %arg17[%c168, %c0_204] : memref<224x128xf32, #tpu.memory_space<vmem>>, vector<6x128xf32>
    %c18 = arith.constant 18 : index
    %c0_205 = arith.constant 0 : index
    %141 = vector.load %arg18[%c18, %c0_205] : memref<24x1280xf32, #tpu.memory_space<vmem>>, vector<6x128xf32>
    tpu.vector_store %arg18[%c18, %c0_205], %140 {strides = array<i32>} : memref<24x1280xf32, #tpu.memory_space<vmem>>, vector<6x128xf32>,
    %c196 = arith.constant 196 : index
    %c0_206 = arith.constant 0 : index
    %142 = vector.load %arg17[%c196, %c0_206] : memref<224x128xf32, #tpu.memory_space<vmem>>, vector<6x128xf32>
    %c18_207 = arith.constant 18 : index
    %c0_208 = arith.constant 0 : index
    %143 = vector.load %arg19[%c18_207, %c0_208] : memref<24x1280xf32, #tpu.memory_space<vmem>>, vector<6x128xf32>
    tpu.vector_store %arg19[%c18_207, %c0_208], %142 {strides = array<i32>} : memref<24x1280xf32, #tpu.memory_space<vmem>>, vector<6x128xf32>,
    %c175 = arith.constant 175 : index
    %c0_209 = arith.constant 0 : index
    %144 = vector.load %arg17[%c175, %c0_209] : memref<224x128xf32, #tpu.memory_space<vmem>>, vector<6x128xf32>
    %c18_210 = arith.constant 18 : index
    %c128_211 = arith.constant 128 : index
    %145 = vector.load %arg18[%c18_210, %c128_211] : memref<24x1280xf32, #tpu.memory_space<vmem>>, vector<6x128xf32>
    tpu.vector_store %arg18[%c18_210, %c128_211], %144 {strides = array<i32>} : memref<24x1280xf32, #tpu.memory_space<vmem>>, vector<6x128xf32>,
    %c203 = arith.constant 203 : index
    %c0_212 = arith.constant 0 : index
    %146 = vector.load %arg17[%c203, %c0_212] : memref<224x128xf32, #tpu.memory_space<vmem>>, vector<6x128xf32>
    %c18_213 = arith.constant 18 : index
    %c128_214 = arith.constant 128 : index
    %147 = vector.load %arg19[%c18_213, %c128_214] : memref<24x1280xf32, #tpu.memory_space<vmem>>, vector<6x128xf32>
    tpu.vector_store %arg19[%c18_213, %c128_214], %146 {strides = array<i32>} : memref<24x1280xf32, #tpu.memory_space<vmem>>, vector<6x128xf32>,
    %c182 = arith.constant 182 : index
    %c0_215 = arith.constant 0 : index
    %148 = vector.load %arg17[%c182, %c0_215] : memref<224x128xf32, #tpu.memory_space<vmem>>, vector<6x128xf32>
    %c18_216 = arith.constant 18 : index
    %c256_217 = arith.constant 256 : index
    %149 = vector.load %arg18[%c18_216, %c256_217] : memref<24x1280xf32, #tpu.memory_space<vmem>>, vector<6x128xf32>
    tpu.vector_store %arg18[%c18_216, %c256_217], %148 {strides = array<i32>} : memref<24x1280xf32, #tpu.memory_space<vmem>>, vector<6x128xf32>,
    %c210 = arith.constant 210 : index
    %c0_218 = arith.constant 0 : index
    %150 = vector.load %arg17[%c210, %c0_218] : memref<224x128xf32, #tpu.memory_space<vmem>>, vector<6x128xf32>
    %c18_219 = arith.constant 18 : index
    %c256_220 = arith.constant 256 : index
    %151 = vector.load %arg19[%c18_219, %c256_220] : memref<24x1280xf32, #tpu.memory_space<vmem>>, vector<6x128xf32>
    tpu.vector_store %arg19[%c18_219, %c256_220], %150 {strides = array<i32>} : memref<24x1280xf32, #tpu.memory_space<vmem>>, vector<6x128xf32>,
    %c189 = arith.constant 189 : index
    %c0_221 = arith.constant 0 : index
    %152 = vector.load %arg17[%c189, %c0_221] : memref<224x128xf32, #tpu.memory_space<vmem>>, vector<6x128xf32>
    %c18_222 = arith.constant 18 : index
    %c384_223 = arith.constant 384 : index
    %153 = vector.load %arg18[%c18_222, %c384_223] : memref<24x1280xf32, #tpu.memory_space<vmem>>, vector<6x128xf32>
    tpu.vector_store %arg18[%c18_222, %c384_223], %152 {strides = array<i32>} : memref<24x1280xf32, #tpu.memory_space<vmem>>, vector<6x128xf32>,
    %c217 = arith.constant 217 : index
    %c0_224 = arith.constant 0 : index
    %154 = vector.load %arg17[%c217, %c0_224] : memref<224x128xf32, #tpu.memory_space<vmem>>, vector<6x128xf32>
    %c18_225 = arith.constant 18 : index
    %c384_226 = arith.constant 384 : index
    %155 = vector.load %arg19[%c18_225, %c384_226] : memref<24x1280xf32, #tpu.memory_space<vmem>>, vector<6x128xf32>
    tpu.vector_store %arg19[%c18_225, %c384_226], %154 {strides = array<i32>} : memref<24x1280xf32, #tpu.memory_space<vmem>>, vector<6x128xf32>,
    %c196_227 = arith.constant 196 : index
    %c0_228 = arith.constant 0 : index
    %156 = vector.load %arg17[%c196_227, %c0_228] : memref<224x128xf32, #tpu.memory_space<vmem>>, vector<6x128xf32>
    %c18_229 = arith.constant 18 : index
    %c512_230 = arith.constant 512 : index
    %157 = vector.load %arg18[%c18_229, %c512_230] : memref<24x1280xf32, #tpu.memory_space<vmem>>, vector<6x128xf32>
    tpu.vector_store %arg18[%c18_229, %c512_230], %156 {strides = array<i32>} : memref<24x1280xf32, #tpu.memory_space<vmem>>, vector<6x128xf32>,
    %c169 = arith.constant 169 : index
    %c0_231 = arith.constant 0 : index
    %158 = vector.load %arg17[%c169, %c0_231] : memref<224x128xf32, #tpu.memory_space<vmem>>, vector<6x128xf32>
    %c18_232 = arith.constant 18 : index
    %c512_233 = arith.constant 512 : index
    %159 = vector.load %arg19[%c18_232, %c512_233] : memref<24x1280xf32, #tpu.memory_space<vmem>>, vector<6x128xf32>
    tpu.vector_store %arg19[%c18_232, %c512_233], %158 {strides = array<i32>} : memref<24x1280xf32, #tpu.memory_space<vmem>>, vector<6x128xf32>,
    %c203_234 = arith.constant 203 : index
    %c0_235 = arith.constant 0 : index
    %160 = vector.load %arg17[%c203_234, %c0_235] : memref<224x128xf32, #tpu.memory_space<vmem>>, vector<6x128xf32>
    %c18_236 = arith.constant 18 : index
    %c640_237 = arith.constant 640 : index
    %161 = vector.load %arg18[%c18_236, %c640_237] : memref<24x1280xf32, #tpu.memory_space<vmem>>, vector<6x128xf32>
    tpu.vector_store %arg18[%c18_236, %c640_237], %160 {strides = array<i32>} : memref<24x1280xf32, #tpu.memory_space<vmem>>, vector<6x128xf32>,
    %c176 = arith.constant 176 : index
    %c0_238 = arith.constant 0 : index
    %162 = vector.load %arg17[%c176, %c0_238] : memref<224x128xf32, #tpu.memory_space<vmem>>, vector<6x128xf32>
    %c18_239 = arith.constant 18 : index
    %c640_240 = arith.constant 640 : index
    %163 = vector.load %arg19[%c18_239, %c640_240] : memref<24x1280xf32, #tpu.memory_space<vmem>>, vector<6x128xf32>
    tpu.vector_store %arg19[%c18_239, %c640_240], %162 {strides = array<i32>} : memref<24x1280xf32, #tpu.memory_space<vmem>>, vector<6x128xf32>,
    %c210_241 = arith.constant 210 : index
    %c0_242 = arith.constant 0 : index
    %164 = vector.load %arg17[%c210_241, %c0_242] : memref<224x128xf32, #tpu.memory_space<vmem>>, vector<6x128xf32>
    %c18_243 = arith.constant 18 : index
    %c768_244 = arith.constant 768 : index
    %165 = vector.load %arg18[%c18_243, %c768_244] : memref<24x1280xf32, #tpu.memory_space<vmem>>, vector<6x128xf32>
    tpu.vector_store %arg18[%c18_243, %c768_244], %164 {strides = array<i32>} : memref<24x1280xf32, #tpu.memory_space<vmem>>, vector<6x128xf32>,
    %c183 = arith.constant 183 : index
    %c0_245 = arith.constant 0 : index
    %166 = vector.load %arg17[%c183, %c0_245] : memref<224x128xf32, #tpu.memory_space<vmem>>, vector<6x128xf32>
    %c18_246 = arith.constant 18 : index
    %c768_247 = arith.constant 768 : index
    %167 = vector.load %arg19[%c18_246, %c768_247] : memref<24x1280xf32, #tpu.memory_space<vmem>>, vector<6x128xf32>
    tpu.vector_store %arg19[%c18_246, %c768_247], %166 {strides = array<i32>} : memref<24x1280xf32, #tpu.memory_space<vmem>>, vector<6x128xf32>,
    %c217_248 = arith.constant 217 : index
    %c0_249 = arith.constant 0 : index
    %168 = vector.load %arg17[%c217_248, %c0_249] : memref<224x128xf32, #tpu.memory_space<vmem>>, vector<6x128xf32>
    %c18_250 = arith.constant 18 : index
    %c896_251 = arith.constant 896 : index
    %169 = vector.load %arg18[%c18_250, %c896_251] : memref<24x1280xf32, #tpu.memory_space<vmem>>, vector<6x128xf32>
    tpu.vector_store %arg18[%c18_250, %c896_251], %168 {strides = array<i32>} : memref<24x1280xf32, #tpu.memory_space<vmem>>, vector<6x128xf32>,
    %c190 = arith.constant 190 : index
    %c0_252 = arith.constant 0 : index
    %170 = vector.load %arg17[%c190, %c0_252] : memref<224x128xf32, #tpu.memory_space<vmem>>, vector<6x128xf32>
    %c18_253 = arith.constant 18 : index
    %c896_254 = arith.constant 896 : index
    %171 = vector.load %arg19[%c18_253, %c896_254] : memref<24x1280xf32, #tpu.memory_space<vmem>>, vector<6x128xf32>
    tpu.vector_store %arg19[%c18_253, %c896_254], %170 {strides = array<i32>} : memref<24x1280xf32, #tpu.memory_space<vmem>>, vector<6x128xf32>,
    %c169_255 = arith.constant 169 : index
    %c0_256 = arith.constant 0 : index
    %172 = vector.load %arg17[%c169_255, %c0_256] : memref<224x128xf32, #tpu.memory_space<vmem>>, vector<6x128xf32>
    %c18_257 = arith.constant 18 : index
    %c1024_258 = arith.constant 1024 : index
    %173 = vector.load %arg18[%c18_257, %c1024_258] : memref<24x1280xf32, #tpu.memory_space<vmem>>, vector<6x128xf32>
    tpu.vector_store %arg18[%c18_257, %c1024_258], %172 {strides = array<i32>} : memref<24x1280xf32, #tpu.memory_space<vmem>>, vector<6x128xf32>,
    %c197 = arith.constant 197 : index
    %c0_259 = arith.constant 0 : index
    %174 = vector.load %arg17[%c197, %c0_259] : memref<224x128xf32, #tpu.memory_space<vmem>>, vector<6x128xf32>
    %c18_260 = arith.constant 18 : index
    %c1024_261 = arith.constant 1024 : index
    %175 = vector.load %arg19[%c18_260, %c1024_261] : memref<24x1280xf32, #tpu.memory_space<vmem>>, vector<6x128xf32>
    tpu.vector_store %arg19[%c18_260, %c1024_261], %174 {strides = array<i32>} : memref<24x1280xf32, #tpu.memory_space<vmem>>, vector<6x128xf32>,
    %c176_262 = arith.constant 176 : index
    %c0_263 = arith.constant 0 : index
    %176 = vector.load %arg17[%c176_262, %c0_263] : memref<224x128xf32, #tpu.memory_space<vmem>>, vector<6x128xf32>
    %c18_264 = arith.constant 18 : index
    %c1152_265 = arith.constant 1152 : index
    %177 = vector.load %arg18[%c18_264, %c1152_265] : memref<24x1280xf32, #tpu.memory_space<vmem>>, vector<6x128xf32>
    tpu.vector_store %arg18[%c18_264, %c1152_265], %176 {strides = array<i32>} : memref<24x1280xf32, #tpu.memory_space<vmem>>, vector<6x128xf32>,
    %c204 = arith.constant 204 : index
    %c0_266 = arith.constant 0 : index
    %178 = vector.load %arg17[%c204, %c0_266] : memref<224x128xf32, #tpu.memory_space<vmem>>, vector<6x128xf32>
    %c18_267 = arith.constant 18 : index
    %c1152_268 = arith.constant 1152 : index
    %179 = vector.load %arg19[%c18_267, %c1152_268] : memref<24x1280xf32, #tpu.memory_space<vmem>>, vector<6x128xf32>
    tpu.vector_store %arg19[%c18_267, %c1152_268], %178 {strides = array<i32>} : memref<24x1280xf32, #tpu.memory_space<vmem>>, vector<6x128xf32>,
    %c0_269 = arith.constant 0 : index
    %c0_270 = arith.constant 0 : index
    %c0_271 = arith.constant 0 : index
    %180 = vector.load %arg6[%c0_269, %c0_270, %c0_271] : memref<1x1x128xf32, #tpu.memory_space<vmem>>, vector<1x1x128xf32>
    %181 = vector.shape_cast %180 : vector<1x1x128xf32> to vector<1x128xf32>
    %c0_272 = arith.constant 0 : index
    %c0_273 = arith.constant 0 : index
    %c0_274 = arith.constant 0 : index
    %182 = vector.load %arg5[%c0_272, %c0_273, %c0_274] : memref<1x1280x128xbf16, #tpu.memory_space<vmem>>, vector<1x1280x128xbf16>
    %183 = vector.shape_cast %182 : vector<1x1280x128xbf16> to vector<1280x128xbf16>
    %c0_275 = arith.constant 0 : index
    %c0_276 = arith.constant 0 : index
    %184 = vector.load %arg18[%c0_275, %c0_276] : memref<24x1280xf32, #tpu.memory_space<vmem>>, vector<24x1280xf32>
    %185 = arith.truncf %184 : vector<24x1280xf32> to vector<24x1280xbf16>
    %cst_277 = arith.constant dense<0.000000e+00> : vector<24x128xf32>
    %186 = tpu.matmul %185, %183, %cst_277 {dimension_numbers = #tpu.dot_dimension_numbers<[1], [0], [0], [1], [0, 0, 1, 1], [], []>} : vector<24x1280xbf16>, vector<1280x128xbf16>, vector<24x128xf32> -> vector<24x128xf32>
    %c0_278 = arith.constant 0 : index
    %c0_279 = arith.constant 0 : index
    %187 = vector.load %arg19[%c0_278, %c0_279] : memref<24x1280xf32, #tpu.memory_space<vmem>>, vector<24x1280xf32>
    %188 = arith.truncf %187 : vector<24x1280xf32> to vector<24x1280xbf16>
    %cst_280 = arith.constant dense<0.000000e+00> : vector<24x128xf32>
    %189 = tpu.matmul %188, %183, %cst_280 {dimension_numbers = #tpu.dot_dimension_numbers<[1], [0], [0], [1], [0, 0, 1, 1], [], []>} : vector<24x1280xbf16>, vector<1280x128xbf16>, vector<24x128xf32> -> vector<24x128xf32>
    %190 = vector.broadcast %181 : vector<1x128xf32> to vector<24x128xf32>
    %191 = arith.addf %186, %190 : vector<24x128xf32>
    %cst_281 = arith.constant 0.000000e+00 : f32
    %192 = vector.broadcast %cst_281 : f32 to vector<24x128xf32>
    %193 = arith.maximumf %191, %192 : vector<24x128xf32>
    %194 = vector.broadcast %181 : vector<1x128xf32> to vector<24x128xf32>
    %195 = arith.addf %189, %194 : vector<24x128xf32>
    %cst_282 = arith.constant 0.000000e+00 : f32
    %196 = vector.broadcast %cst_282 : f32 to vector<24x128xf32>
    %197 = arith.maximumf %195, %196 : vector<24x128xf32>
    %198 = arith.maximumf %193, %197 : vector<24x128xf32>
    %c0_283 = arith.constant 0 : index
    %c0_284 = arith.constant 0 : index
    %199 = vector.load %arg20[%c0_283, %c0_284] : memref<24x128xf32, #tpu.memory_space<vmem>>, vector<24x128xf32>
    tpu.vector_store %arg20[%c0_283, %c0_284], %198 {strides = array<i32>} : memref<24x128xf32, #tpu.memory_space<vmem>>, vector<24x128xf32>,
    %c0_285 = arith.constant 0 : index
    %c0_286 = arith.constant 0 : index
    %200 = vector.load %arg20[%c0_285, %c0_286] : memref<24x128xf32, #tpu.memory_space<vmem>>, vector<1x128xf32>
    %c0_287 = arith.constant 0 : index
    %c0_288 = arith.constant 0 : index
    %201 = vector.load %arg21[%c0_287, %c0_288] : memref<4x768xf32, #tpu.memory_space<vmem>>, vector<1x128xf32>
    tpu.vector_store %arg21[%c0_287, %c0_288], %200 {strides = array<i32>} : memref<4x768xf32, #tpu.memory_space<vmem>>, vector<1x128xf32>,
    %c1_289 = arith.constant 1 : index
    %c0_290 = arith.constant 0 : index
    %202 = vector.load %arg20[%c1_289, %c0_290] : memref<24x128xf32, #tpu.memory_space<vmem>>, vector<1x128xf32>
    %c0_291 = arith.constant 0 : index
    %c128_292 = arith.constant 128 : index
    %203 = vector.load %arg21[%c0_291, %c128_292] : memref<4x768xf32, #tpu.memory_space<vmem>>, vector<1x128xf32>
    tpu.vector_store %arg21[%c0_291, %c128_292], %202 {strides = array<i32>} : memref<4x768xf32, #tpu.memory_space<vmem>>, vector<1x128xf32>,
    %c2 = arith.constant 2 : index
    %c0_293 = arith.constant 0 : index
    %204 = vector.load %arg20[%c2, %c0_293] : memref<24x128xf32, #tpu.memory_space<vmem>>, vector<1x128xf32>
    %c0_294 = arith.constant 0 : index
    %c256_295 = arith.constant 256 : index
    %205 = vector.load %arg21[%c0_294, %c256_295] : memref<4x768xf32, #tpu.memory_space<vmem>>, vector<1x128xf32>
    tpu.vector_store %arg21[%c0_294, %c256_295], %204 {strides = array<i32>} : memref<4x768xf32, #tpu.memory_space<vmem>>, vector<1x128xf32>,
    %c3 = arith.constant 3 : index
    %c0_296 = arith.constant 0 : index
    %206 = vector.load %arg20[%c3, %c0_296] : memref<24x128xf32, #tpu.memory_space<vmem>>, vector<1x128xf32>
    %c0_297 = arith.constant 0 : index
    %c384_298 = arith.constant 384 : index
    %207 = vector.load %arg21[%c0_297, %c384_298] : memref<4x768xf32, #tpu.memory_space<vmem>>, vector<1x128xf32>
    tpu.vector_store %arg21[%c0_297, %c384_298], %206 {strides = array<i32>} : memref<4x768xf32, #tpu.memory_space<vmem>>, vector<1x128xf32>,
    %c4 = arith.constant 4 : index
    %c0_299 = arith.constant 0 : index
    %208 = vector.load %arg20[%c4, %c0_299] : memref<24x128xf32, #tpu.memory_space<vmem>>, vector<1x128xf32>
    %c0_300 = arith.constant 0 : index
    %c512_301 = arith.constant 512 : index
    %209 = vector.load %arg21[%c0_300, %c512_301] : memref<4x768xf32, #tpu.memory_space<vmem>>, vector<1x128xf32>
    tpu.vector_store %arg21[%c0_300, %c512_301], %208 {strides = array<i32>} : memref<4x768xf32, #tpu.memory_space<vmem>>, vector<1x128xf32>,
    %c5 = arith.constant 5 : index
    %c0_302 = arith.constant 0 : index
    %210 = vector.load %arg20[%c5, %c0_302] : memref<24x128xf32, #tpu.memory_space<vmem>>, vector<1x128xf32>
    %c0_303 = arith.constant 0 : index
    %c640_304 = arith.constant 640 : index
    %211 = vector.load %arg21[%c0_303, %c640_304] : memref<4x768xf32, #tpu.memory_space<vmem>>, vector<1x128xf32>
    tpu.vector_store %arg21[%c0_303, %c640_304], %210 {strides = array<i32>} : memref<4x768xf32, #tpu.memory_space<vmem>>, vector<1x128xf32>,
    %c6_305 = arith.constant 6 : index
    %c0_306 = arith.constant 0 : index
    %212 = vector.load %arg20[%c6_305, %c0_306] : memref<24x128xf32, #tpu.memory_space<vmem>>, vector<1x128xf32>
    %c1_307 = arith.constant 1 : index
    %c0_308 = arith.constant 0 : index
    %213 = vector.load %arg21[%c1_307, %c0_308] : memref<4x768xf32, #tpu.memory_space<vmem>>, vector<1x128xf32>
    tpu.vector_store %arg21[%c1_307, %c0_308], %212 {strides = array<i32>} : memref<4x768xf32, #tpu.memory_space<vmem>>, vector<1x128xf32>,
    %c7_309 = arith.constant 7 : index
    %c0_310 = arith.constant 0 : index
    %214 = vector.load %arg20[%c7_309, %c0_310] : memref<24x128xf32, #tpu.memory_space<vmem>>, vector<1x128xf32>
    %c1_311 = arith.constant 1 : index
    %c128_312 = arith.constant 128 : index
    %215 = vector.load %arg21[%c1_311, %c128_312] : memref<4x768xf32, #tpu.memory_space<vmem>>, vector<1x128xf32>
    tpu.vector_store %arg21[%c1_311, %c128_312], %214 {strides = array<i32>} : memref<4x768xf32, #tpu.memory_space<vmem>>, vector<1x128xf32>,
    %c8_313 = arith.constant 8 : index
    %c0_314 = arith.constant 0 : index
    %216 = vector.load %arg20[%c8_313, %c0_314] : memref<24x128xf32, #tpu.memory_space<vmem>>, vector<1x128xf32>
    %c1_315 = arith.constant 1 : index
    %c256_316 = arith.constant 256 : index
    %217 = vector.load %arg21[%c1_315, %c256_316] : memref<4x768xf32, #tpu.memory_space<vmem>>, vector<1x128xf32>
    tpu.vector_store %arg21[%c1_315, %c256_316], %216 {strides = array<i32>} : memref<4x768xf32, #tpu.memory_space<vmem>>, vector<1x128xf32>,
    %c9 = arith.constant 9 : index
    %c0_317 = arith.constant 0 : index
    %218 = vector.load %arg20[%c9, %c0_317] : memref<24x128xf32, #tpu.memory_space<vmem>>, vector<1x128xf32>
    %c1_318 = arith.constant 1 : index
    %c384_319 = arith.constant 384 : index
    %219 = vector.load %arg21[%c1_318, %c384_319] : memref<4x768xf32, #tpu.memory_space<vmem>>, vector<1x128xf32>
    tpu.vector_store %arg21[%c1_318, %c384_319], %218 {strides = array<i32>} : memref<4x768xf32, #tpu.memory_space<vmem>>, vector<1x128xf32>,
    %c10 = arith.constant 10 : index
    %c0_320 = arith.constant 0 : index
    %220 = vector.load %arg20[%c10, %c0_320] : memref<24x128xf32, #tpu.memory_space<vmem>>, vector<1x128xf32>
    %c1_321 = arith.constant 1 : index
    %c512_322 = arith.constant 512 : index
    %221 = vector.load %arg21[%c1_321, %c512_322] : memref<4x768xf32, #tpu.memory_space<vmem>>, vector<1x128xf32>
    tpu.vector_store %arg21[%c1_321, %c512_322], %220 {strides = array<i32>} : memref<4x768xf32, #tpu.memory_space<vmem>>, vector<1x128xf32>,
    %c11 = arith.constant 11 : index
    %c0_323 = arith.constant 0 : index
    %222 = vector.load %arg20[%c11, %c0_323] : memref<24x128xf32, #tpu.memory_space<vmem>>, vector<1x128xf32>
    %c1_324 = arith.constant 1 : index
    %c640_325 = arith.constant 640 : index
    %223 = vector.load %arg21[%c1_324, %c640_325] : memref<4x768xf32, #tpu.memory_space<vmem>>, vector<1x128xf32>
    tpu.vector_store %arg21[%c1_324, %c640_325], %222 {strides = array<i32>} : memref<4x768xf32, #tpu.memory_space<vmem>>, vector<1x128xf32>,
    %c12_326 = arith.constant 12 : index
    %c0_327 = arith.constant 0 : index
    %224 = vector.load %arg20[%c12_326, %c0_327] : memref<24x128xf32, #tpu.memory_space<vmem>>, vector<1x128xf32>
    %c2_328 = arith.constant 2 : index
    %c0_329 = arith.constant 0 : index
    %225 = vector.load %arg21[%c2_328, %c0_329] : memref<4x768xf32, #tpu.memory_space<vmem>>, vector<1x128xf32>
    tpu.vector_store %arg21[%c2_328, %c0_329], %224 {strides = array<i32>} : memref<4x768xf32, #tpu.memory_space<vmem>>, vector<1x128xf32>,
    %c13 = arith.constant 13 : index
    %c0_330 = arith.constant 0 : index
    %226 = vector.load %arg20[%c13, %c0_330] : memref<24x128xf32, #tpu.memory_space<vmem>>, vector<1x128xf32>
    %c2_331 = arith.constant 2 : index
    %c128_332 = arith.constant 128 : index
    %227 = vector.load %arg21[%c2_331, %c128_332] : memref<4x768xf32, #tpu.memory_space<vmem>>, vector<1x128xf32>
    tpu.vector_store %arg21[%c2_331, %c128_332], %226 {strides = array<i32>} : memref<4x768xf32, #tpu.memory_space<vmem>>, vector<1x128xf32>,
    %c14_333 = arith.constant 14 : index
    %c0_334 = arith.constant 0 : index
    %228 = vector.load %arg20[%c14_333, %c0_334] : memref<24x128xf32, #tpu.memory_space<vmem>>, vector<1x128xf32>
    %c2_335 = arith.constant 2 : index
    %c256_336 = arith.constant 256 : index
    %229 = vector.load %arg21[%c2_335, %c256_336] : memref<4x768xf32, #tpu.memory_space<vmem>>, vector<1x128xf32>
    tpu.vector_store %arg21[%c2_335, %c256_336], %228 {strides = array<i32>} : memref<4x768xf32, #tpu.memory_space<vmem>>, vector<1x128xf32>,
    %c15_337 = arith.constant 15 : index
    %c0_338 = arith.constant 0 : index
    %230 = vector.load %arg20[%c15_337, %c0_338] : memref<24x128xf32, #tpu.memory_space<vmem>>, vector<1x128xf32>
    %c2_339 = arith.constant 2 : index
    %c384_340 = arith.constant 384 : index
    %231 = vector.load %arg21[%c2_339, %c384_340] : memref<4x768xf32, #tpu.memory_space<vmem>>, vector<1x128xf32>
    tpu.vector_store %arg21[%c2_339, %c384_340], %230 {strides = array<i32>} : memref<4x768xf32, #tpu.memory_space<vmem>>, vector<1x128xf32>,
    %c16 = arith.constant 16 : index
    %c0_341 = arith.constant 0 : index
    %232 = vector.load %arg20[%c16, %c0_341] : memref<24x128xf32, #tpu.memory_space<vmem>>, vector<1x128xf32>
    %c2_342 = arith.constant 2 : index
    %c512_343 = arith.constant 512 : index
    %233 = vector.load %arg21[%c2_342, %c512_343] : memref<4x768xf32, #tpu.memory_space<vmem>>, vector<1x128xf32>
    tpu.vector_store %arg21[%c2_342, %c512_343], %232 {strides = array<i32>} : memref<4x768xf32, #tpu.memory_space<vmem>>, vector<1x128xf32>,
    %c17 = arith.constant 17 : index
    %c0_344 = arith.constant 0 : index
    %234 = vector.load %arg20[%c17, %c0_344] : memref<24x128xf32, #tpu.memory_space<vmem>>, vector<1x128xf32>
    %c2_345 = arith.constant 2 : index
    %c640_346 = arith.constant 640 : index
    %235 = vector.load %arg21[%c2_345, %c640_346] : memref<4x768xf32, #tpu.memory_space<vmem>>, vector<1x128xf32>
    tpu.vector_store %arg21[%c2_345, %c640_346], %234 {strides = array<i32>} : memref<4x768xf32, #tpu.memory_space<vmem>>, vector<1x128xf32>,
    %c18_347 = arith.constant 18 : index
    %c0_348 = arith.constant 0 : index
    %236 = vector.load %arg20[%c18_347, %c0_348] : memref<24x128xf32, #tpu.memory_space<vmem>>, vector<1x128xf32>
    %c3_349 = arith.constant 3 : index
    %c0_350 = arith.constant 0 : index
    %237 = vector.load %arg21[%c3_349, %c0_350] : memref<4x768xf32, #tpu.memory_space<vmem>>, vector<1x128xf32>
    tpu.vector_store %arg21[%c3_349, %c0_350], %236 {strides = array<i32>} : memref<4x768xf32, #tpu.memory_space<vmem>>, vector<1x128xf32>,
    %c19 = arith.constant 19 : index
    %c0_351 = arith.constant 0 : index
    %238 = vector.load %arg20[%c19, %c0_351] : memref<24x128xf32, #tpu.memory_space<vmem>>, vector<1x128xf32>
    %c3_352 = arith.constant 3 : index
    %c128_353 = arith.constant 128 : index
    %239 = vector.load %arg21[%c3_352, %c128_353] : memref<4x768xf32, #tpu.memory_space<vmem>>, vector<1x128xf32>
    tpu.vector_store %arg21[%c3_352, %c128_353], %238 {strides = array<i32>} : memref<4x768xf32, #tpu.memory_space<vmem>>, vector<1x128xf32>,
    %c20 = arith.constant 20 : index
    %c0_354 = arith.constant 0 : index
    %240 = vector.load %arg20[%c20, %c0_354] : memref<24x128xf32, #tpu.memory_space<vmem>>, vector<1x128xf32>
    %c3_355 = arith.constant 3 : index
    %c256_356 = arith.constant 256 : index
    %241 = vector.load %arg21[%c3_355, %c256_356] : memref<4x768xf32, #tpu.memory_space<vmem>>, vector<1x128xf32>
    tpu.vector_store %arg21[%c3_355, %c256_356], %240 {strides = array<i32>} : memref<4x768xf32, #tpu.memory_space<vmem>>, vector<1x128xf32>,
    %c21_357 = arith.constant 21 : index
    %c0_358 = arith.constant 0 : index
    %242 = vector.load %arg20[%c21_357, %c0_358] : memref<24x128xf32, #tpu.memory_space<vmem>>, vector<1x128xf32>
    %c3_359 = arith.constant 3 : index
    %c384_360 = arith.constant 384 : index
    %243 = vector.load %arg21[%c3_359, %c384_360] : memref<4x768xf32, #tpu.memory_space<vmem>>, vector<1x128xf32>
    tpu.vector_store %arg21[%c3_359, %c384_360], %242 {strides = array<i32>} : memref<4x768xf32, #tpu.memory_space<vmem>>, vector<1x128xf32>,
    %c22_361 = arith.constant 22 : index
    %c0_362 = arith.constant 0 : index
    %244 = vector.load %arg20[%c22_361, %c0_362] : memref<24x128xf32, #tpu.memory_space<vmem>>, vector<1x128xf32>
    %c3_363 = arith.constant 3 : index
    %c512_364 = arith.constant 512 : index
    %245 = vector.load %arg21[%c3_363, %c512_364] : memref<4x768xf32, #tpu.memory_space<vmem>>, vector<1x128xf32>
    tpu.vector_store %arg21[%c3_363, %c512_364], %244 {strides = array<i32>} : memref<4x768xf32, #tpu.memory_space<vmem>>, vector<1x128xf32>,
    %c23 = arith.constant 23 : index
    %c0_365 = arith.constant 0 : index
    %246 = vector.load %arg20[%c23, %c0_365] : memref<24x128xf32, #tpu.memory_space<vmem>>, vector<1x128xf32>
    %c3_366 = arith.constant 3 : index
    %c640_367 = arith.constant 640 : index
    %247 = vector.load %arg21[%c3_366, %c640_367] : memref<4x768xf32, #tpu.memory_space<vmem>>, vector<1x128xf32>
    tpu.vector_store %arg21[%c3_366, %c640_367], %246 {strides = array<i32>} : memref<4x768xf32, #tpu.memory_space<vmem>>, vector<1x128xf32>,
    %c0_368 = arith.constant 0 : index
    %c0_369 = arith.constant 0 : index
    %248 = vector.load %arg21[%c0_368, %c0_369] : memref<4x768xf32, #tpu.memory_space<vmem>>, vector<4x768xf32>
    %249 = arith.truncf %248 : vector<4x768xf32> to vector<4x768xbf16>
    %c0_370 = arith.constant 0 : index
    %c0_371 = arith.constant 0 : index
    %c0_372 = arith.constant 0 : index
    %250 = vector.load %arg7[%c0_370, %c0_371, %c0_372] : memref<1x768x128xbf16, #tpu.memory_space<vmem>>, vector<1x768x128xbf16>
    %251 = vector.shape_cast %250 : vector<1x768x128xbf16> to vector<768x128xbf16>
    %cst_373 = arith.constant dense<0.000000e+00> : vector<4x128xf32>
    %252 = tpu.matmul %249, %251, %cst_373 {dimension_numbers = #tpu.dot_dimension_numbers<[1], [0], [0], [1], [0, 0, 1, 1], [], []>} : vector<4x768xbf16>, vector<768x128xbf16>, vector<4x128xf32> -> vector<4x128xf32>
    %c0_374 = arith.constant 0 : index
    %c0_375 = arith.constant 0 : index
    %c0_376 = arith.constant 0 : index
    %253 = vector.load %arg8[%c0_374, %c0_375, %c0_376] : memref<1x1x128xf32, #tpu.memory_space<vmem>>, vector<1x1x128xf32>
    %254 = vector.shape_cast %253 : vector<1x1x128xf32> to vector<1x128xf32>
    %255 = vector.broadcast %254 : vector<1x128xf32> to vector<4x128xf32>
    %256 = arith.addf %252, %255 : vector<4x128xf32>
    %cst_377 = arith.constant 0.000000e+00 : f32
    %257 = vector.broadcast %cst_377 : f32 to vector<4x128xf32>
    %258 = arith.maximumf %256, %257 : vector<4x128xf32>
    %cst_378 = arith.constant dense<0.000000e+00> : vector<128xf32>
    %259 = vector.multi_reduction <add>, %258, %cst_378 [0] : vector<4x128xf32> to vector<128xf32>
    %260 = vector.shape_cast %259 : vector<128xf32> to vector<1x128xf32>
    %cst_379 = arith.constant 4.000000e+00 : f32
    %261 = vector.broadcast %cst_379 : f32 to vector<1x128xf32>
    %262 = arith.divf %260, %261 : vector<1x128xf32>
    %263 = vector.broadcast %262 : vector<1x128xf32> to vector<4x128xf32>
    %264 = arith.subf %258, %263 : vector<4x128xf32>
    %265 = arith.mulf %264, %264 : vector<4x128xf32>
    %cst_380 = arith.constant dense<0.000000e+00> : vector<128xf32>
    %266 = vector.multi_reduction <add>, %265, %cst_380 [0] : vector<4x128xf32> to vector<128xf32>
    %267 = vector.shape_cast %266 : vector<128xf32> to vector<1x128xf32>
    %cst_381 = arith.constant 4.000000e+00 : f32
    %268 = vector.broadcast %cst_381 : f32 to vector<1x128xf32>
    %269 = arith.divf %267, %268 : vector<1x128xf32>
    %270 = vector.broadcast %262 : vector<1x128xf32> to vector<4x128xf32>
    %271 = arith.subf %258, %270 : vector<4x128xf32>
    %cst_382 = arith.constant 9.99999974E-6 : f32
    %272 = vector.broadcast %cst_382 : f32 to vector<1x128xf32>
    %273 = arith.addf %269, %272 : vector<1x128xf32>
    %274 = math.rsqrt %273 : vector<1x128xf32>
    %275 = vector.broadcast %274 : vector<1x128xf32> to vector<4x128xf32>
    %276 = arith.mulf %271, %275 : vector<4x128xf32>
    %c0_383 = arith.constant 0 : index
    %c0_384 = arith.constant 0 : index
    %c0_385 = arith.constant 0 : index
    %277 = vector.load %arg9[%c0_383, %c0_384, %c0_385] : memref<1x1x128xf32, #tpu.memory_space<vmem>>, vector<1x1x128xf32>
    %278 = vector.shape_cast %277 : vector<1x1x128xf32> to vector<1x128xf32>
    %279 = vector.broadcast %278 : vector<1x128xf32> to vector<4x128xf32>
    %280 = arith.mulf %276, %279 : vector<4x128xf32>
    %c0_386 = arith.constant 0 : index
    %c0_387 = arith.constant 0 : index
    %c0_388 = arith.constant 0 : index
    %281 = vector.load %arg10[%c0_386, %c0_387, %c0_388] : memref<1x1x128xf32, #tpu.memory_space<vmem>>, vector<1x1x128xf32>
    %282 = vector.shape_cast %281 : vector<1x1x128xf32> to vector<1x128xf32>
    %283 = vector.broadcast %282 : vector<1x128xf32> to vector<4x128xf32>
    %284 = arith.addf %280, %283 : vector<4x128xf32>
    %285 = arith.truncf %284 : vector<4x128xf32> to vector<4x128xbf16>
    %c0_389 = arith.constant 0 : index
    %c0_390 = arith.constant 0 : index
    %c0_391 = arith.constant 0 : index
    %286 = vector.load %arg11[%c0_389, %c0_390, %c0_391] : memref<1x128x128xbf16, #tpu.memory_space<vmem>>, vector<1x128x128xbf16>
    %287 = vector.shape_cast %286 : vector<1x128x128xbf16> to vector<128x128xbf16>
    %cst_392 = arith.constant dense<0.000000e+00> : vector<4x128xf32>
    %288 = tpu.matmul %285, %287, %cst_392 {dimension_numbers = #tpu.dot_dimension_numbers<[1], [0], [0], [1], [0, 0, 1, 1], [], []>} : vector<4x128xbf16>, vector<128x128xbf16>, vector<4x128xf32> -> vector<4x128xf32>
    %c0_393 = arith.constant 0 : index
    %c0_394 = arith.constant 0 : index
    %c0_395 = arith.constant 0 : index
    %289 = vector.load %arg12[%c0_393, %c0_394, %c0_395] : memref<1x1x128xf32, #tpu.memory_space<vmem>>, vector<1x1x128xf32>
    %290 = vector.shape_cast %289 : vector<1x1x128xf32> to vector<1x128xf32>
    %291 = vector.broadcast %290 : vector<1x128xf32> to vector<4x128xf32>
    %292 = arith.addf %288, %291 : vector<4x128xf32>
    %cst_396 = arith.constant 0.000000e+00 : f32
    %293 = vector.broadcast %cst_396 : f32 to vector<4x128xf32>
    %294 = arith.maximumf %292, %293 : vector<4x128xf32>
    %cst_397 = arith.constant dense<0.000000e+00> : vector<128xf32>
    %295 = vector.multi_reduction <add>, %294, %cst_397 [0] : vector<4x128xf32> to vector<128xf32>
    %296 = vector.shape_cast %295 : vector<128xf32> to vector<1x128xf32>
    %cst_398 = arith.constant 4.000000e+00 : f32
    %297 = vector.broadcast %cst_398 : f32 to vector<1x128xf32>
    %298 = arith.divf %296, %297 : vector<1x128xf32>
    %299 = vector.broadcast %298 : vector<1x128xf32> to vector<4x128xf32>
    %300 = arith.subf %294, %299 : vector<4x128xf32>
    %301 = arith.mulf %300, %300 : vector<4x128xf32>
    %cst_399 = arith.constant dense<0.000000e+00> : vector<128xf32>
    %302 = vector.multi_reduction <add>, %301, %cst_399 [0] : vector<4x128xf32> to vector<128xf32>
    %303 = vector.shape_cast %302 : vector<128xf32> to vector<1x128xf32>
    %cst_400 = arith.constant 4.000000e+00 : f32
    %304 = vector.broadcast %cst_400 : f32 to vector<1x128xf32>
    %305 = arith.divf %303, %304 : vector<1x128xf32>
    %306 = vector.broadcast %298 : vector<1x128xf32> to vector<4x128xf32>
    %307 = arith.subf %294, %306 : vector<4x128xf32>
    %cst_401 = arith.constant 9.99999974E-6 : f32
    %308 = vector.broadcast %cst_401 : f32 to vector<1x128xf32>
    %309 = arith.addf %305, %308 : vector<1x128xf32>
    %310 = math.rsqrt %309 : vector<1x128xf32>
    %311 = vector.broadcast %310 : vector<1x128xf32> to vector<4x128xf32>
    %312 = arith.mulf %307, %311 : vector<4x128xf32>
    %c0_402 = arith.constant 0 : index
    %c0_403 = arith.constant 0 : index
    %c0_404 = arith.constant 0 : index
    %313 = vector.load %arg13[%c0_402, %c0_403, %c0_404] : memref<1x1x128xf32, #tpu.memory_space<vmem>>, vector<1x1x128xf32>
    %314 = vector.shape_cast %313 : vector<1x1x128xf32> to vector<1x128xf32>
    %315 = vector.broadcast %314 : vector<1x128xf32> to vector<4x128xf32>
    %316 = arith.mulf %312, %315 : vector<4x128xf32>
    %c0_405 = arith.constant 0 : index
    %c0_406 = arith.constant 0 : index
    %c0_407 = arith.constant 0 : index
    %317 = vector.load %arg14[%c0_405, %c0_406, %c0_407] : memref<1x1x128xf32, #tpu.memory_space<vmem>>, vector<1x1x128xf32>
    %318 = vector.shape_cast %317 : vector<1x1x128xf32> to vector<1x128xf32>
    %319 = vector.broadcast %318 : vector<1x128xf32> to vector<4x128xf32>
    %320 = arith.addf %316, %319 : vector<4x128xf32>
    %c0_408 = arith.constant 0 : index
    %c0_409 = arith.constant 0 : index
    %c0_410 = arith.constant 0 : index
    %321 = vector.load %arg15[%c0_408, %c0_409, %c0_410] : memref<1x128x4xf32, #tpu.memory_space<vmem>>, vector<1x128x4xf32>
    %322 = vector.shape_cast %321 : vector<1x128x4xf32> to vector<128x4xf32>
    %cst_411 = arith.constant dense<0.000000e+00> : vector<4x4xf32>
    %323 = tpu.matmul %320, %322, %cst_411 {dimension_numbers = #tpu.dot_dimension_numbers<[1], [0], [0], [1], [0, 0, 1, 1], [], []>} : vector<4x128xf32>, vector<128x4xf32>, vector<4x4xf32> -> vector<4x4xf32>
    %c0_412 = arith.constant 0 : index
    %c0_413 = arith.constant 0 : index
    %c0_414 = arith.constant 0 : index
    %324 = vector.load %arg16[%c0_412, %c0_413, %c0_414] : memref<1x4x4xf32, #tpu.memory_space<vmem>>, vector<1x4x4xf32>
    %325 = vector.shape_cast %324 : vector<1x4x4xf32> to vector<4x4xf32>
    %326 = vector.shape_cast %323 : vector<4x4xf32> to vector<1x4x4xf32>
    tpu.vector_store %arg16[%c0_412, %c0_413, %c0_414], %326 {strides = array<i32>} : memref<1x4x4xf32, #tpu.memory_space<vmem>>, vector<1x4x4xf32>,
    return
  }
  func.func @transform_0(%arg0: i32) -> (i32, i32, i32) {
    %c0_i32 = arith.constant 0 : i32
    %c0_i32_0 = arith.constant 0 : i32
    %c0_i32_1 = arith.constant 0 : i32
    return %arg0, %c0_i32, %c0_i32_0 : i32, i32, i32
  }
  func.func @transform_1(%arg0: i32) -> (i32, i32, i32) {
    %c0_i32 = arith.constant 0 : i32
    %c0_i32_0 = arith.constant 0 : i32
    %c0_i32_1 = arith.constant 0 : i32
    return %arg0, %c0_i32, %c0_i32_0 : i32, i32, i32
  }
  func.func @transform_2(%arg0: i32) -> (i32, i32, i32) {
    %c0_i32 = arith.constant 0 : i32
    %c0_i32_0 = arith.constant 0 : i32
    %c0_i32_1 = arith.constant 0 : i32
    return %arg0, %c0_i32, %c0_i32_0 : i32, i32, i32
  }
  func.func @transform_3(%arg0: i32) -> (i32, i32, i32) {
    %c0_i32 = arith.constant 0 : i32
    %c0_i32_0 = arith.constant 0 : i32
    %c0_i32_1 = arith.constant 0 : i32
    return %arg0, %c0_i32, %c0_i32_0 : i32, i32, i32
  }
  func.func @transform_4(%arg0: i32) -> (i32, i32, i32) {
    %c0_i32 = arith.constant 0 : i32
    %c0_i32_0 = arith.constant 0 : i32
    %c0_i32_1 = arith.constant 0 : i32
    return %arg0, %c0_i32, %c0_i32_0 : i32, i32, i32
  }
  func.func @transform_5(%arg0: i32) -> (i32, i32, i32) {
    %c0_i32 = arith.constant 0 : i32
    %c0_i32_0 = arith.constant 0 : i32
    %c0_i32_1 = arith.constant 0 : i32
    return %arg0, %c0_i32, %c0_i32_0 : i32, i32, i32
  }
  func.func @transform_6(%arg0: i32) -> (i32, i32, i32) {
    %c0_i32 = arith.constant 0 : i32
    %c0_i32_0 = arith.constant 0 : i32
    %c0_i32_1 = arith.constant 0 : i32
    return %arg0, %c0_i32, %c0_i32_0 : i32, i32, i32
  }
  func.func @transform_7(%arg0: i32) -> (i32, i32, i32) {
    %c0_i32 = arith.constant 0 : i32
    %c0_i32_0 = arith.constant 0 : i32
    %c0_i32_1 = arith.constant 0 : i32
    return %arg0, %c0_i32, %c0_i32_0 : i32, i32, i32
  }
  func.func @transform_8(%arg0: i32) -> (i32, i32, i32) {
    %c0_i32 = arith.constant 0 : i32
    %c0_i32_0 = arith.constant 0 : i32
    %c0_i32_1 = arith.constant 0 : i32
    return %arg0, %c0_i32, %c0_i32_0 : i32, i32, i32
  }
  func.func @transform_9(%arg0: i32) -> (i32, i32, i32) {
    %c0_i32 = arith.constant 0 : i32
    %c0_i32_0 = arith.constant 0 : i32
    %c0_i32_1 = arith.constant 0 : i32
    return %arg0, %c0_i32, %c0_i32_0 : i32, i32, i32
  }
  func.func @transform_10(%arg0: i32) -> (i32, i32, i32) {
    %c0_i32 = arith.constant 0 : i32
    %c0_i32_0 = arith.constant 0 : i32
    %c0_i32_1 = arith.constant 0 : i32
    return %arg0, %c0_i32, %c0_i32_0 : i32, i32, i32
  }
  func.func @transform_11(%arg0: i32) -> (i32, i32, i32) {
    %c0_i32 = arith.constant 0 : i32
    %c0_i32_0 = arith.constant 0 : i32
    %c0_i32_1 = arith.constant 0 : i32
    return %arg0, %c0_i32, %c0_i32_0 : i32, i32, i32
  }
  func.func @transform_12(%arg0: i32) -> (i32, i32, i32) {
    %c0_i32 = arith.constant 0 : i32
    %c0_i32_0 = arith.constant 0 : i32
    %c0_i32_1 = arith.constant 0 : i32
    return %arg0, %c0_i32, %c0_i32_0 : i32, i32, i32
  }
  func.func @transform_13(%arg0: i32) -> (i32, i32, i32) {
    %c0_i32 = arith.constant 0 : i32
    %c0_i32_0 = arith.constant 0 : i32
    %c0_i32_1 = arith.constant 0 : i32
    return %arg0, %c0_i32, %c0_i32_0 : i32, i32, i32
  }
  func.func @transform_14(%arg0: i32) -> (i32, i32, i32) {
    %c0_i32 = arith.constant 0 : i32
    %c0_i32_0 = arith.constant 0 : i32
    %c0_i32_1 = arith.constant 0 : i32
    return %arg0, %c0_i32, %c0_i32_0 : i32, i32, i32
  }
  func.func @transform_15(%arg0: i32) -> (i32, i32, i32) {
    %c0_i32 = arith.constant 0 : i32
    %c0_i32_0 = arith.constant 0 : i32
    %c0_i32_1 = arith.constant 0 : i32
    return %arg0, %c0_i32, %c0_i32_0 : i32, i32, i32
  }
}

</mosaic_0001>

<bundles_post_ra>
// kernel: student_forward.1
= control target key start
LH: loop header
LB: loop body
LE: loop exit
PB: predicated region body
PF: predicated region fallthrough
CT: control target
= control target key end

     0   :  { %s6667_s18 = smov 0   ;;  %s7562_s0 = inlined_call_operand.vmem [shape: bf16[2,224,512], index: 0, kind: input, shape index: {}]   ;;  %s7563_s1 = inlined_call_operand.vmem [shape: bf16[2,224,512], index: 1, kind: input, shape index: {}]   ;;  %s7564_s2 = inlined_call_operand.vmem [shape: bf16[2,512,128], index: 2, kind: input, shape index: {}]   ;;  %s7565_s3 = inlined_call_operand.vmem [shape: f32[2,1,128], index: 3, kind: input, shape index: {}]   ;;  %s7566_s4 = inlined_call_operand.vmem [shape: bf16[2,1280,128], index: 4, kind: input, shape index: {}]   ;;  %s7567_s5 = inlined_call_operand.vmem [shape: f32[2,1,128], index: 5, kind: input, shape index: {}]   ;;  %s7568_s6 = inlined_call_operand.vmem [shape: bf16[2,768,128], index: 6, kind: input, shape index: {}]   ;;  %s7569_s7 = inlined_call_operand.vmem [shape: f32[2,1,128], index: 7, kind: input, shape index: {}]   ;;  %s7570_s8 = inlined_call_operand.vmem [shape: f32[2,1,128], index: 8, kind: input, shape index: {}]   ;;  %s7571_s9 = inlined_call_operand.vmem [shape: f32[2,1,128], index: 9, kind: input, shape index: {}]   ;;  %s7572_s10 = inlined_call_operand.vmem [shape: bf16[2,128,128], index: 10, kind: input, shape index: {}]   ;;  %s7573_s11 = inlined_call_operand.vmem [shape: f32[2,1,128], index: 11, kind: input, shape index: {}]   ;;  %s7574_s12 = inlined_call_operand.vmem [shape: f32[2,1,128], index: 12, kind: input, shape index: {}]   ;;  %s7575_s13 = inlined_call_operand.vmem [shape: f32[2,1,128], index: 13, kind: input, shape index: {}]   ;;  %s7576_s14 = inlined_call_operand.vmem [shape: f32[2,128,4], index: 14, kind: input, shape index: {}]   ;;  %s7577_s15 = inlined_call_operand.vmem [shape: f32[2,4,4], index: 15, kind: output, shape index: {}]  }
   0x1 LB: > { %s5024_s19 = sadd.s32 4294967295, %s6582_s18   ;;  %p5028_p0 = scmp.ge.s32.totalorder %s6582_s18, 1  ;;  %s6582_s18 = sphi %s6667_s18, %s25_s18  }
   0x2   : > { %p561_p1 = scmp.lt.s32.totalorder %s6582_s18, 3 }
   0x4   : > { %p562_p2 = pnand %p5028_p0, %p561_p1 }
   0x5   : > { %p662_p3 = scmp.lt.s32.totalorder (!%p562_p2), %s5024_s19, 1  ;;  %vm6585_vm0 = vmmov (!%p562_p2), 0   ;;  %vm4550_vm1 = vcmask (!%p562_p2), 1043456   ;;  %vm4825_vm2 = vcmask (!%p562_p2), 27648  }
   0x6   : > { %565 = sbr.rel (%p562_p2) target bundleno = 1658 (0x67a), region = 80 }
   0xd   : > { %s7579_s19 = smov (!%p662_p3, %s5024_s19), 1 }
   0xe   : > { %s5330_s20 = sshll.u32 %s7579_s19, 8  ;;  %s6184_s24 = smul.u32 448, %s7579_s19 }
   0xf   : > { %s6681_s23 = scalar_lea.vmem %s7564_s2, %s5330_s20  ;;  %s6185_s16 = smul.u32 640, %s7579_s19 }
  0x10   : > { %v6684_v0 = vld [vmem:[%s6681_s23 + $0x40] sm:$0xff]   ;;  %v6699_v4 = vld [vmem:[%s6681_s23 + $0x48] sm:$0xff]   ;;  %v6715_v8 = vld [vmem:[%s6681_s23 + $0x50] sm:$0xff]   ;;  %s6807_s27 = scalar_lea.vmem %s7562_s0, %s6184_s24  ;;  %s6878_s30 = scalar_lea.vmem %s7563_s1, %s6184_s24 }
  0x11   : > { %v6687_v1 = vld [vmem:[%s6681_s23 + $0xc0] sm:$0xff]   ;;  %5333 = vmatprep.subr.bf16.mxu0 %v6684_v0  ;;  %v6703_v5 = vld [vmem:[%s6681_s23 + $0xc8] sm:$0xff]   ;;  %v6719_v9 = vld [vmem:[%s6681_s23 + $0xd0] sm:$0xff]   ;;  %s6964_s21 = scalar_lea.vmem %s7566_s4, %s6185_s16  ;;  %s6982_s24 = scalar_lea.vmem %s7565_s3, %s7579_s19 }
  0x12   : > { %v6691_v2 = vld [vmem:[%s6681_s23] sm:$0xff]   ;;  %5433 = vmatprep.subr.bf16.mxu1 %v6687_v1  ;;  %v6707_v6 = vld [vmem:[%s6681_s23 + $0x8] sm:$0xff]   ;;  %v6723_v10 = vld [vmem:[%s6681_s23 + $0x10] sm:$0xff]   ;;  %s6186_s28 = smul.u32 384, %s7579_s19  ;;  %s5331_s17 = sshll.u32 %s7579_s19, 6 }
  0x13   : > { %v6695_v3 = vld [vmem:[%s6681_s23 + $0x80] sm:$0xff]   ;;  %5334 = vmatpush3.bf16.msra.mxu0 %v6691_v2  ;;  %v6711_v7 = vld [vmem:[%s6681_s23 + $0x88] sm:$0xff]   ;;  %v6727_v11 = vld [vmem:[%s6681_s23 + $0x90] sm:$0xff]   ;;  %s706_s22 = scalar_lea.vmem %s7572_s10, %s5331_s17  ;;  %s695_s25 = scalar_lea.vmem %s7569_s7, %s7579_s19 }
  0x14   : > { %5434 = vmatpush3.bf16.msra.mxu1 %v6695_v3  ;;  %5335 = vmatprep.subr.bf16.mxu0 %v6699_v4  ;;  %v6731_v12 = vld [vmem:[%s6681_s23 + $0x58] sm:$0xff]   ;;  %v6747_v16 = vld [vmem:[%s6681_s23 + $0x60] sm:$0xff]   ;;  %v6763_v20 = vld [vmem:[%s6681_s23 + $0x68] sm:$0xff]   ;;  %s7438_s16 = scalar_lea.vmem %s7568_s6, %s6186_s28  ;;  %s698_s28 = scalar_lea.vmem %s7570_s8, %s7579_s19 }
  0x15   : > { %5435 = vmatprep.subr.bf16.mxu1 %v6703_v5  ;;  %v6735_v13 = vld [vmem:[%s6681_s23 + $0xd8] sm:$0xff]   ;;  %v6751_v17 = vld [vmem:[%s6681_s23 + $0xe0] sm:$0xff]   ;;  %v6767_v21 = vld [vmem:[%s6681_s23 + $0xe8] sm:$0xff]   ;;  %s5332_s17 = sshll.u32 %s7579_s19, 7 }
  0x16   : > { %v6739_v14 = vld [vmem:[%s6681_s23 + $0x18] sm:$0xff]   ;;  %v6755_v18 = vld [vmem:[%s6681_s23 + $0x20] sm:$0xff]   ;;  %v6771_v22 = vld [vmem:[%s6681_s23 + $0x28] sm:$0xff]  }
  0x17   : > { %5336 = vmatpush3.bf16.msra.mxu0 %v6707_v6  ;;  %v6743_v15 = vld [vmem:[%s6681_s23 + $0x98] sm:$0xff]   ;;  %v6759_v19 = vld [vmem:[%s6681_s23 + $0xa0] sm:$0xff]   ;;  %v6775_v23 = vld [vmem:[%s6681_s23 + $0xa8] sm:$0xff]  }
  0x18   : > { %5436 = vmatpush3.bf16.msra.mxu1 %v6711_v7  ;;  %5337 = vmatprep.subr.bf16.mxu0 %v6715_v8  ;;  %v6779_v24 = vld [vmem:[%s6681_s23 + $0x70] sm:$0xff]   ;;  %v6796_v28 = vld [vmem:[%s6681_s23 + $0x78] sm:$0xff]  }
  0x19   : > { %5437 = vmatprep.subr.bf16.mxu1 %v6719_v9  ;;  %v6783_v25 = vld [vmem:[%s6681_s23 + $0xf0] sm:$0xff]   ;;  %v6800_v29 = vld [vmem:[%s6681_s23 + $0xf8] sm:$0xff]  }
  0x1a   : > { %v6788_v26 = vld [vmem:[%s6681_s23 + $0x30] sm:$0xff]   ;;  %v6811_v30 = vld [vmem:[%s6681_s23 + $0x38] sm:$0xff]  }
  0x1b   : > { %5338 = vmatpush3.bf16.msra.mxu0 %v6723_v10  ;;  %v6792_v27 = vld [vmem:[%s6681_s23 + $0xb0] sm:$0xff]   ;;  %v6815_v31 = vld [vmem:[%s6681_s23 + $0xb8] sm:$0xff]  }
  0x1c   : > { %5438 = vmatpush3.bf16.msra.mxu1 %v6727_v11  ;;  %5339 = vmatprep.subr.bf16.mxu0 %v6731_v12  ;;  %v6230_v32 = vld [vmem:[%s6807_s27] ss:$16 sps:$4 sm:$0xff]   ;;  %v6232_v33 = vld [vmem:[%s6807_s27 + $0x4] ss:$16 sps:$4 sm:$0xff]   ;;  %v6233_v34 = vld [vmem:[%s6807_s27 + $0x8] ss:$16 sps:$4 sm:$0xff]  }
  0x1d   : > { %5439 = vmatprep.subr.bf16.mxu1 %v6735_v13  ;;  %v6235_v35 = vld [vmem:[%s6807_s27 + $0xc] ss:$16 sps:$4 sm:$0xff]   ;;  %1413 = vmatprep.mubr.bf16.mxu0 %v6232_v33  ;;  %v6236_v36 = vld [vmem:[%s6807_s27 + $0x24] ss:$16 sps:$4 sm:$0xff]   ;;  %v6240_v38 = vld [vmem:[%s6807_s27 + $0x20] ss:$16 sps:$4 sm:$0xff]  }
  0x1e   : > { %1558 = vmatprep.mubr.bf16.mxu1 %v6235_v35  ;;  %v6238_v37 = vld [vmem:[%s6807_s27 + $0x2c] ss:$16 sps:$4 sm:$0xff]   ;;  %v6241_v39 = vld [vmem:[%s6807_s27 + $0x28] ss:$16 sps:$4 sm:$0xff]   ;;  %v6242_v40 = vld [vmem:[%s6807_s27 + $0x44] ss:$16 sps:$4 sm:$0xff]  }
  0x1f   : > { %5340 = vmatpush3.bf16.msra.mxu0 %v6739_v14  ;;  %v6244_v41 = vld [vmem:[%s6807_s27 + $0x4c] ss:$16 sps:$4 sm:$0xff]   ;;  %v6246_v42 = vld [vmem:[%s6807_s27 + $0x40] ss:$16 sps:$4 sm:$0xff]   ;;  %v6247_v43 = vld [vmem:[%s6807_s27 + $0x48] ss:$16 sps:$4 sm:$0xff]  }
  0x20   : > { %5440 = vmatpush3.bf16.msra.mxu1 %v6743_v15  ;;  %5341 = vmatprep.subr.bf16.mxu0 %v6747_v16  ;;  %v6248_v44 = vld [vmem:[%s6807_s27 + $0x64] ss:$16 sps:$4 sm:$0xff]   ;;  %v6250_v45 = vld [vmem:[%s6807_s27 + $0x6c] ss:$16 sps:$4 sm:$0xff]   ;;  %v6252_v46 = vld [vmem:[%s6807_s27 + $0x60] ss:$16 sps:$4 sm:$0xff]  }
  0x21   : > { %5441 = vmatprep.subr.bf16.mxu1 %v6751_v17  ;;  %v6253_v47 = vld [vmem:[%s6807_s27 + $0x68] ss:$16 sps:$4 sm:$0xff]   ;;  %v6254_v48 = vld [vmem:[%s6807_s27 + $0x84] ss:$16 sps:$4 sm:$0xff]   ;;  %v6256_v49 = vld [vmem:[%s6807_s27 + $0x8c] ss:$16 sps:$4 sm:$0xff]  }
  0x22   : > { %v6258_v50 = vld [vmem:[%s6807_s27 + $0x80] ss:$16 sps:$4 sm:$0xff]   ;;  %v6259_v51 = vld [vmem:[%s6807_s27 + $0x88] ss:$16 sps:$4 sm:$0xff]   ;;  %v6260_v52 = vld [vmem:[%s6807_s27 + $0xa4] ss:$16 sps:$4 sm:$0xff]  }
  0x23   : > { %5342 = vmatpush3.bf16.msra.mxu0 %v6755_v18  ;;  %v6262_v53 = vld [vmem:[%s6807_s27 + $0xac] ss:$16 sps:$4 sm:$0xff]   ;;  %v6264_v54 = vld [vmem:[%s6807_s27 + $0xa0] ss:$16 sps:$4 sm:$0xff]   ;;  %v6265_v55 = vld [vmem:[%s6807_s27 + $0xa8] ss:$16 sps:$4 sm:$0xff]  }
  0x24   : > { %5442 = vmatpush3.bf16.msra.mxu1 %v6759_v19  ;;  %5343 = vmatprep.subr.bf16.mxu0 %v6763_v20  ;;  %v6266_v56 = vld [vmem:[%s6807_s27 + $0xc4] ss:$16 sps:$4 sm:$0xff]   ;;  %v6268_v57 = vld [vmem:[%s6807_s27 + $0xcc] ss:$16 sps:$4 sm:$0xff]   ;;  %v6270_v58 = vld [vmem:[%s6807_s27 + $0xc0] ss:$16 sps:$4 sm:$0xff]  }
  0x25   : > { %5443 = vmatprep.subr.bf16.mxu1 %v6767_v21  ;;  %v6271_v59 = vld [vmem:[%s6807_s27 + $0xc8] ss:$16 sps:$4 sm:$0xff]   ;;  %v6272_v60 = vld [vmem:[%s6807_s27 + $0xe4] ss:$16 sps:$4 sm:$0xff]   ;;  %v6274_v61 = vld [vmem:[%s6807_s27 + $0xec] ss:$16 sps:$4 sm:$0xff]  }
  0x26   : > { %v6276_v62 = vld [vmem:[%s6807_s27 + $0xe0] ss:$16 sps:$4 sm:$0xff]   ;;  %v6277_v63 = vld [vmem:[%s6807_s27 + $0xe8] ss:$16 sps:$4 sm:$0xff]   ;;  %v6328_v33 = vld [vmem:[%s6878_s30 + $0x4c] ss:$16 sps:$4 sm:$0xff]  }
  0x27   : > { %5344 = vmatpush3.bf16.msra.mxu0 %v6771_v22  ;;  %v6331_v35 = vld [vmem:[%s6878_s30 + $0x48] ss:$16 sps:$4 sm:$0xff]  }
  0x28   : > { %5444 = vmatpush3.bf16.msra.mxu1 %v6775_v23  ;;  %5345 = vmatprep.subr.bf16.mxu0 %v6779_v24 }
  0x29   : > { %5445 = vmatprep.subr.bf16.mxu1 %v6783_v25 }
  0x2b   : > { %5346 = vmatpush3.bf16.msra.mxu0 %v6788_v26 }
  0x2c   : > { %5446 = vmatpush3.bf16.msra.mxu1 %v6792_v27  ;;  %5347 = vmatprep.subr.bf16.mxu0 %v6796_v28 }
  0x2d   : > { %5447 = vmatprep.subr.bf16.mxu1 %v6800_v29 }
  0x2f   : > { %5348 = vmatpush3.bf16.msra.mxu0 %v6811_v30 }
  0x30   : > { %5448 = vmatpush3.bf16.msra.mxu1 %v6815_v31  ;;  %5533 = vmatprep.subr.bf16.mxu0 %v6684_v0  ;;  %v6278_v0 = vld [vmem:[%s6807_s27 + $0x104] ss:$16 sps:$4 sm:$0xff]  }
  0x31   : > { %5633 = vmatprep.subr.bf16.mxu1 %v6687_v1  ;;  %v6280_v1 = vld [vmem:[%s6807_s27 + $0x10c] ss:$16 sps:$4 sm:$0xff]  }
  0x32   : > { %1414 = vmatmul.mubr.bf16.vlgmr.msra.gmra.mrb[0].mxu0 %v6230_v32  ;;  %v6326_v32 = vld [vmem:[%s6878_s30 + $0x44] ss:$16 sps:$4 sm:$0xff]  }
  0x33   : > { %1559 = vmatmul.mubr.bf16.vlgmr.msra.gmra.mrb[0].mxu1 %v6233_v34  ;;  %5534 = vmatpush3.bf16.msra.mxu0 %v6691_v2  ;;  %v6282_v2 = vld [vmem:[%s6807_s27 + $0x100] ss:$16 sps:$4 sm:$0xff]  }
  0x34   : > { %5634 = vmatpush3.bf16.msra.mxu1 %v6695_v3  ;;  %1421 = vmatprep.mubr.bf16.mxu0 %v6236_v36  ;;  %v6283_v3 = vld [vmem:[%s6807_s27 + $0x108] ss:$16 sps:$4 sm:$0xff]   ;;  %v6330_v34 = vld [vmem:[%s6878_s30 + $0x40] ss:$16 sps:$4 sm:$0xff]   ;;  %v6332_v36 = vld [vmem:[%s6878_s30 + $0x64] ss:$16 sps:$4 sm:$0xff]  }
  0x35   : > { %1566 = vmatprep.mubr.bf16.mxu1 %v6238_v37  ;;  %5535 = vmatprep.subr.bf16.mxu0 %v6699_v4  ;;  %v6284_v4 = vld [vmem:[%s6807_s27 + $0x124] ss:$16 sps:$4 sm:$0xff]   ;;  %v6334_v37 = vld [vmem:[%s6878_s30 + $0x6c] ss:$16 sps:$4 sm:$0xff]  }
  0x36   : > { %5635 = vmatprep.subr.bf16.mxu1 %v6703_v5  ;;  %v6286_v5 = vld [vmem:[%s6807_s27 + $0x12c] ss:$16 sps:$4 sm:$0xff]  }
  0x37   : > { %5536 = vmatpush3.bf16.msra.mxu0 %v6707_v6  ;;  %v6288_v6 = vld [vmem:[%s6807_s27 + $0x120] ss:$16 sps:$4 sm:$0xff]  }
  0x38   : > { %5636 = vmatpush3.bf16.msra.mxu1 %v6711_v7  ;;  %5537 = vmatprep.subr.bf16.mxu0 %v6715_v8  ;;  %v6289_v7 = vld [vmem:[%s6807_s27 + $0x128] ss:$16 sps:$4 sm:$0xff]   ;;  %v6290_v8 = vld [vmem:[%s6807_s27 + $0x144] ss:$16 sps:$4 sm:$0xff]  }
  0x39   : > { %5637 = vmatprep.subr.bf16.mxu1 %v6719_v9  ;;  %v6292_v9 = vld [vmem:[%s6807_s27 + $0x14c] ss:$16 sps:$4 sm:$0xff]  }
  0x3a   : > { %1422 = vmatmul.mubr.bf16.gmra.mrb[4].mxu0 %v6240_v38  ;;  %v6336_v38 = vld [vmem:[%s6878_s30 + $0x60] ss:$16 sps:$4 sm:$0xff]  }
  0x3b   : > { %1567 = vmatmul.mubr.bf16.gmra.mrb[4].mxu1 %v6241_v39  ;;  %1429 = vmatprep.mubr.bf16.mxu0 %v6242_v40  ;;  %v6337_v39 = vld [vmem:[%s6878_s30 + $0x68] ss:$16 sps:$4 sm:$0xff]   ;;  %v6338_v40 = vld [vmem:[%s6878_s30 + $0x84] ss:$16 sps:$4 sm:$0xff]  }
  0x3c   : > { %1574 = vmatprep.mubr.bf16.mxu1 %v6244_v41  ;;  %5538 = vmatpush3.bf16.msra.mxu0 %v6723_v10  ;;  %v6294_v10 = vld [vmem:[%s6807_s27 + $0x140] ss:$16 sps:$4 sm:$0xff]   ;;  %v6340_v41 = vld [vmem:[%s6878_s30 + $0x8c] ss:$16 sps:$4 sm:$0xff]  }
  0x3d   : > { %5638 = vmatpush3.bf16.msra.mxu1 %v6727_v11  ;;  %5539 = vmatprep.subr.bf16.mxu0 %v6731_v12  ;;  %v6295_v11 = vld [vmem:[%s6807_s27 + $0x148] ss:$16 sps:$4 sm:$0xff]   ;;  %v6296_v12 = vld [vmem:[%s6807_s27 + $0x164] ss:$16 sps:$4 sm:$0xff]  }
  0x3e   : > { %5639 = vmatprep.subr.bf16.mxu1 %v6735_v13  ;;  %v6298_v13 = vld [vmem:[%s6807_s27 + $0x16c] ss:$16 sps:$4 sm:$0xff]  }
  0x40   : > { %5540 = vmatpush3.bf16.msra.mxu0 %v6739_v14  ;;  %v6300_v14 = vld [vmem:[%s6807_s27 + $0x160] ss:$16 sps:$4 sm:$0xff]  }
  0x41   : > { %5640 = vmatpush3.bf16.msra.mxu1 %v6743_v15  ;;  %5541 = vmatprep.subr.bf16.mxu0 %v6747_v16  ;;  %v6301_v15 = vld [vmem:[%s6807_s27 + $0x168] ss:$16 sps:$4 sm:$0xff]   ;;  %v6302_v16 = vld [vmem:[%s6807_s27 + $0x184] ss:$16 sps:$4 sm:$0xff]  }
  0x42   : > { %1430 = vmatmul.mubr.bf16.gmra.mrb[8].mxu0 %v6246_v42  ;;  %5641 = vmatprep.subr.bf16.mxu1 %v6751_v17  ;;  %v6304_v17 = vld [vmem:[%s6807_s27 + $0x18c] ss:$16 sps:$4 sm:$0xff]   ;;  %v6342_v42 = vld [vmem:[%s6878_s30 + $0x80] ss:$16 sps:$4 sm:$0xff]  }
  0x43   : > { %1575 = vmatmul.mubr.bf16.gmra.mrb[8].mxu1 %v6247_v43  ;;  %1437 = vmatprep.mubr.bf16.mxu0 %v6248_v44  ;;  %v6343_v43 = vld [vmem:[%s6878_s30 + $0x88] ss:$16 sps:$4 sm:$0xff]   ;;  %v6344_v44 = vld [vmem:[%s6878_s30 + $0xa4] ss:$16 sps:$4 sm:$0xff]  }
  0x44   : > { %1582 = vmatprep.mubr.bf16.mxu1 %v6250_v45  ;;  %5542 = vmatpush3.bf16.msra.mxu0 %v6755_v18  ;;  %v6306_v18 = vld [vmem:[%s6807_s27 + $0x180] ss:$16 sps:$4 sm:$0xff]   ;;  %v6346_v45 = vld [vmem:[%s6878_s30 + $0xac] ss:$16 sps:$4 sm:$0xff]  }
  0x45   : > { %5642 = vmatpush3.bf16.msra.mxu1 %v6759_v19  ;;  %5543 = vmatprep.subr.bf16.mxu0 %v6763_v20  ;;  %v6307_v19 = vld [vmem:[%s6807_s27 + $0x188] ss:$16 sps:$4 sm:$0xff]   ;;  %v6308_v20 = vld [vmem:[%s6807_s27 + $0x1a4] ss:$16 sps:$4 sm:$0xff]  }
  0x46   : > { %5643 = vmatprep.subr.bf16.mxu1 %v6767_v21  ;;  %v6310_v21 = vld [vmem:[%s6807_s27 + $0x1ac] ss:$16 sps:$4 sm:$0xff]  }
  0x48   : > { %5544 = vmatpush3.bf16.msra.mxu0 %v6771_v22  ;;  %v6312_v22 = vld [vmem:[%s6807_s27 + $0x1a0] ss:$16 sps:$4 sm:$0xff]  }
  0x49   : > { %5644 = vmatpush3.bf16.msra.mxu1 %v6775_v23  ;;  %5545 = vmatprep.subr.bf16.mxu0 %v6779_v24  ;;  %v6313_v23 = vld [vmem:[%s6807_s27 + $0x1a8] ss:$16 sps:$4 sm:$0xff]   ;;  %v6316_v24 = vld [vmem:[%s6878_s30 + $0x4] ss:$16 sps:$4 sm:$0xff]   ;;  %s687_s27 = scalar_lea.vmem %s7567_s5, %s7579_s19 }
  0x4a   : > { %1438 = vmatmul.mubr.bf16.gmra.mrb[12].mxu0 %v6252_v46  ;;  %5645 = vmatprep.subr.bf16.mxu1 %v6783_v25  ;;  %v6319_v25 = vld [vmem:[%s6878_s30 + $0xc] ss:$16 sps:$4 sm:$0xff]   ;;  %v6348_v46 = vld [vmem:[%s6878_s30 + $0xa0] ss:$16 sps:$4 sm:$0xff]  }
  0x4b   : > { %1583 = vmatmul.mubr.bf16.gmra.mrb[12].mxu1 %v6253_v47  ;;  %1445 = vmatprep.mubr.bf16.mxu0 %v6254_v48  ;;  %v6349_v47 = vld [vmem:[%s6878_s30 + $0xa8] ss:$16 sps:$4 sm:$0xff]   ;;  %v6350_v48 = vld [vmem:[%s6878_s30 + $0xc4] ss:$16 sps:$4 sm:$0xff]  }
  0x4c   : > { %1590 = vmatprep.mubr.bf16.mxu1 %v6256_v49  ;;  %5546 = vmatpush3.bf16.msra.mxu0 %v6788_v26  ;;  %v6314_v26 = vld [vmem:[%s6878_s30] ss:$16 sps:$4 sm:$0xff]   ;;  %v6352_v49 = vld [vmem:[%s6878_s30 + $0xcc] ss:$16 sps:$4 sm:$0xff]  }
  0x4d   : > { %5646 = vmatpush3.bf16.msra.mxu1 %v6792_v27  ;;  %5547 = vmatprep.subr.bf16.mxu0 %v6796_v28  ;;  %v6317_v27 = vld [vmem:[%s6878_s30 + $0x8] ss:$16 sps:$4 sm:$0xff]   ;;  %v6320_v28 = vld [vmem:[%s6878_s30 + $0x24] ss:$16 sps:$4 sm:$0xff]  }
  0x4e   : > { %5647 = vmatprep.subr.bf16.mxu1 %v6800_v29  ;;  %v6322_v29 = vld [vmem:[%s6878_s30 + $0x2c] ss:$16 sps:$4 sm:$0xff]  }
  0x50   : > { %5548 = vmatpush3.bf16.msra.mxu0 %v6811_v30  ;;  %v6324_v30 = vld [vmem:[%s6878_s30 + $0x20] ss:$16 sps:$4 sm:$0xff]  }
  0x51   : > { %5648 = vmatpush3.bf16.msra.mxu1 %v6815_v31  ;;  %v6325_v31 = vld [vmem:[%s6878_s30 + $0x28] ss:$16 sps:$4 sm:$0xff]  }
  0x52   : > { %1446 = vmatmul.mubr.bf16.gmra.mrb[16].mxu0 %v6258_v50  ;;  %v6354_v50 = vld [vmem:[%s6878_s30 + $0xc0] ss:$16 sps:$4 sm:$0xff]  }
  0x53   : > { %1591 = vmatmul.mubr.bf16.gmra.mrb[16].mxu1 %v6259_v51  ;;  %1453 = vmatprep.mubr.bf16.mxu0 %v6260_v52  ;;  %v6355_v51 = vld [vmem:[%s6878_s30 + $0xc8] ss:$16 sps:$4 sm:$0xff]   ;;  %v6356_v52 = vld [vmem:[%s6878_s30 + $0xe4] ss:$16 sps:$4 sm:$0xff]  }
  0x54   : > { %1598 = vmatprep.mubr.bf16.mxu1 %v6262_v53  ;;  %v6358_v53 = vld [vmem:[%s6878_s30 + $0xec] ss:$16 sps:$4 sm:$0xff]  }
  0x5a   : > { %1454 = vmatmul.mubr.bf16.gmra.mrb[20].mxu0 %v6264_v54  ;;  %v6360_v54 = vld [vmem:[%s6878_s30 + $0xe0] ss:$16 sps:$4 sm:$0xff]  }
  0x5b   : > { %1599 = vmatmul.mubr.bf16.gmra.mrb[20].mxu1 %v6265_v55  ;;  %1461 = vmatprep.mubr.bf16.mxu0 %v6266_v56  ;;  %v6361_v55 = vld [vmem:[%s6878_s30 + $0xe8] ss:$16 sps:$4 sm:$0xff]   ;;  %v6362_v56 = vld [vmem:[%s6878_s30 + $0x104] ss:$16 sps:$4 sm:$0xff]  }
  0x5c   : > { %1606 = vmatprep.mubr.bf16.mxu1 %v6268_v57  ;;  %v6364_v57 = vld [vmem:[%s6878_s30 + $0x10c] ss:$16 sps:$4 sm:$0xff]  }
  0x62   : > { %1462 = vmatmul.mubr.bf16.gmra.mrb[24].mxu0 %v6270_v58  ;;  %v6366_v58 = vld [vmem:[%s6878_s30 + $0x100] ss:$16 sps:$4 sm:$0xff]  }
  0x63   : > { %1607 = vmatmul.mubr.bf16.gmra.mrb[24].mxu1 %v6271_v59  ;;  %1469 = vmatprep.mubr.bf16.mxu0 %v6272_v60  ;;  %v6367_v59 = vld [vmem:[%s6878_s30 + $0x108] ss:$16 sps:$4 sm:$0xff]   ;;  %v6368_v60 = vld [vmem:[%s6878_s30 + $0x124] ss:$16 sps:$4 sm:$0xff]  }
  0x64   : > { %1614 = vmatprep.mubr.bf16.mxu1 %v6274_v61  ;;  %v6370_v61 = vld [vmem:[%s6878_s30 + $0x12c] ss:$16 sps:$4 sm:$0xff]  }
  0x6a   : > { %1470 = vmatmul.mubr.bf16.gmra.mrb[28].mxu0 %v6276_v62  ;;  %v6372_v62 = vld [vmem:[%s6878_s30 + $0x120] ss:$16 sps:$4 sm:$0xff]  }
  0x6b   : > { %1615 = vmatmul.mubr.bf16.gmra.mrb[28].mxu1 %v6277_v63  ;;  %1477 = vmatprep.mubr.bf16.mxu0 %v6278_v0  ;;  %v6373_v63 = vld [vmem:[%s6878_s30 + $0x128] ss:$16 sps:$4 sm:$0xff]   ;;  %v6374_v0 = vld [vmem:[%s6878_s30 + $0x144] ss:$16 sps:$4 sm:$0xff]  }
  0x6c   : > { %1622 = vmatprep.mubr.bf16.mxu1 %v6280_v1  ;;  %v6376_v1 = vld [vmem:[%s6878_s30 + $0x14c] ss:$16 sps:$4 sm:$0xff]  }
  0x72   : > { %1478 = vmatmul.mubr.bf16.gmra.mrb[32].mxu0 %v6282_v2  ;;  %v6378_v2 = vld [vmem:[%s6878_s30 + $0x140] ss:$16 sps:$4 sm:$0xff]  }
  0x73   : > { %1623 = vmatmul.mubr.bf16.gmra.mrb[32].mxu1 %v6283_v3  ;;  %1485 = vmatprep.mubr.bf16.mxu0 %v6284_v4  ;;  %v6379_v3 = vld [vmem:[%s6878_s30 + $0x148] ss:$16 sps:$4 sm:$0xff]   ;;  %v6380_v4 = vld [vmem:[%s6878_s30 + $0x164] ss:$16 sps:$4 sm:$0xff]  }
  0x74   : > { %1630 = vmatprep.mubr.bf16.mxu1 %v6286_v5  ;;  %v6382_v5 = vld [vmem:[%s6878_s30 + $0x16c] ss:$16 sps:$4 sm:$0xff]  }
  0x7a   : > { %1486 = vmatmul.mubr.bf16.gmra.mrb[36].mxu0 %v6288_v6  ;;  %v6398_v6 = vld [vmem:[%s6964_s21 + $0x40] sm:$0xff]  }
  0x7b   : > { %1631 = vmatmul.mubr.bf16.gmra.mrb[36].mxu1 %v6289_v7  ;;  %1493 = vmatprep.mubr.bf16.mxu0 %v6290_v8  ;;  %v6399_v7 = vld [vmem:[%s6964_s21] sm:$0xff]  }
  0x7c   : > { %1638 = vmatprep.mubr.bf16.mxu1 %v6292_v9  ;;  %v6384_v8 = vld [vmem:[%s6878_s30 + $0x160] ss:$16 sps:$4 sm:$0xff]   ;;  %5733 = vmatprep.subr.bf16.mxu0 %v6398_v6  ;;  %v6385_v9 = vld [vmem:[%s6878_s30 + $0x168] ss:$16 sps:$4 sm:$0xff]  }
  0x82   : > { %1494 = vmatmul.mubr.bf16.gmra.mrb[40].mxu0 %v6294_v10  ;;  %v6386_v10 = vld [vmem:[%s6878_s30 + $0x184] ss:$16 sps:$4 sm:$0xff]  }
  0x83   : > { %1639 = vmatmul.mubr.bf16.gmra.mrb[40].mxu1 %v6295_v11  ;;  %1501 = vmatprep.mubr.bf16.mxu0 %v6296_v12  ;;  %v6400_v11 = vld [vmem:[%s6964_s21 + $0xc0] sm:$0xff]  }
  0x84   : > { %1646 = vmatprep.mubr.bf16.mxu1 %v6298_v13  ;;  %v6401_v12 = vld [vmem:[%s6964_s21 + $0x80] sm:$0xff]   ;;  %v6388_v13 = vld [vmem:[%s6878_s30 + $0x18c] ss:$16 sps:$4 sm:$0xff]   ;;  %5761 = vmatprep.subr.bf16.mxu1 %v6400_v11 }
  0x8a   : > { %1502 = vmatmul.mubr.bf16.gmra.mrb[44].mxu0 %v6300_v14  ;;  %v6390_v14 = vld [vmem:[%s6878_s30 + $0x180] ss:$16 sps:$4 sm:$0xff]  }
  0x8b   : > { %1647 = vmatmul.mubr.bf16.gmra.mrb[44].mxu1 %v6301_v15  ;;  %1509 = vmatprep.mubr.bf16.mxu0 %v6302_v16  ;;  %v6391_v15 = vld [vmem:[%s6878_s30 + $0x188] ss:$16 sps:$4 sm:$0xff]   ;;  %v6392_v16 = vld [vmem:[%s6878_s30 + $0x1a4] ss:$16 sps:$4 sm:$0xff]  }
  0x8c   : > { %1654 = vmatprep.mubr.bf16.mxu1 %v6304_v17  ;;  %v6395_v17 = vld [vmem:[%s6878_s30 + $0x1ac] ss:$16 sps:$4 sm:$0xff]  }
  0x92   : > { %1510 = vmatmul.mubr.bf16.gmra.mrb[48].mxu0 %v6306_v18  ;;  %v6985_v18 = vld [vmem:[%s6982_s24] ss:$0 sm:$0xff] }
  0x93   : > { %1655 = vmatmul.mubr.bf16.gmra.mrb[48].mxu1 %v6307_v19  ;;  %1517 = vmatprep.mubr.bf16.mxu0 %v6308_v20  ;;  %v6394_v19 = vld [vmem:[%s6878_s30 + $0x1a0] ss:$16 sps:$4 sm:$0xff]  }
  0x94   : > { %1662 = vmatprep.mubr.bf16.mxu1 %v6310_v21  ;;  %v6397_v21 = vld [vmem:[%s6878_s30 + $0x1a8] ss:$16 sps:$4 sm:$0xff]  }
  0x9a   : > { %1518 = vmatmul.mubr.bf16.gmra.mrb[52].mxu0 %v6312_v22 }
  0x9b   : > { %1663 = vmatmul.mubr.bf16.gmra.mrb[52].mxu1 %v6313_v23  ;;  %2011 = vmatprep.mubr.bf16.mxu0 %v6316_v24 }
  0x9c   : > { %2156 = vmatprep.mubr.bf16.mxu1 %v6319_v25 }
  0xa2   : > { %2012 = vmatmul.mubr.bf16.vlgmr.msra.gmra.mrb[56].mxu0 %v6314_v26 }
  0xa3   : > { %2157 = vmatmul.mubr.bf16.vlgmr.msra.gmra.mrb[56].mxu1 %v6317_v27  ;;  %2019 = vmatprep.mubr.bf16.mxu0 %v6320_v28 }
  0xa4   : > { %2164 = vmatprep.mubr.bf16.mxu1 %v6322_v29  ;;  %5734 = vmatpush3.bf16.msra.mxu0 %v6399_v7 }
  0xa5   : > { %5762 = vmatpush3.bf16.msra.mxu1 %v6401_v12 }
  0xaa   : > { %2020 = vmatmul.mubr.bf16.gmra.mrb[60].mxu0 %v6324_v30 }
  0xab   : > { %2165 = vmatmul.mubr.bf16.gmra.mrb[60].mxu1 %v6325_v31  ;;  %2027 = vmatprep.mubr.bf16.mxu0 %v6326_v32 }
  0xac   : > { %2172 = vmatprep.mubr.bf16.mxu1 %v6328_v33  ;;  %v6402_v33 = vld [vmem:[%s6964_s21 + $0x48] sm:$0xff]  }
  0xad   : > { %5735 = vmatprep.subr.bf16.mxu0 %v6402_v33 }
  0xb2   : > { %2028 = vmatmul.mubr.bf16.gmra.mrb[64].mxu0 %v6330_v34  ;;  %v6403_v34 = vld [vmem:[%s6964_s21 + $0x8] sm:$0xff]  }
  0xb3   : > { %2173 = vmatmul.mubr.bf16.gmra.mrb[64].mxu1 %v6331_v35  ;;  %2035 = vmatprep.mubr.bf16.mxu0 %v6332_v36  ;;  %v6404_v35 = vld [vmem:[%s6964_s21 + $0xc8] sm:$0xff]  }
  0xb4   : > { %2180 = vmatprep.mubr.bf16.mxu1 %v6334_v37  ;;  %v6405_v37 = vld [vmem:[%s6964_s21 + $0x88] sm:$0xff]   ;;  %5736 = vmatpush3.bf16.msra.mxu0 %v6403_v34 }
  0xb5   : > { %5763 = vmatprep.subr.bf16.mxu1 %v6404_v35 }
  0xb6   : > { %5764 = vmatpush3.bf16.msra.mxu1 %v6405_v37 }
  0xba   : > { %2036 = vmatmul.mubr.bf16.gmra.mrb[68].mxu0 %v6336_v38 }
  0xbb   : > { %2181 = vmatmul.mubr.bf16.gmra.mrb[68].mxu1 %v6337_v39  ;;  %2043 = vmatprep.mubr.bf16.mxu0 %v6338_v40 }
  0xbc   : > { %2188 = vmatprep.mubr.bf16.mxu1 %v6340_v41 }
  0xc2   : > { %2044 = vmatmul.mubr.bf16.gmra.mrb[72].mxu0 %v6342_v42 }
  0xc3   : > { %2189 = vmatmul.mubr.bf16.gmra.mrb[72].mxu1 %v6343_v43  ;;  %2051 = vmatprep.mubr.bf16.mxu0 %v6344_v44 }
  0xc4   : > { %2196 = vmatprep.mubr.bf16.mxu1 %v6346_v45 }
  0xca   : > { %2052 = vmatmul.mubr.bf16.gmra.mrb[76].mxu0 %v6348_v46 }
  0xcb   : > { %2197 = vmatmul.mubr.bf16.gmra.mrb[76].mxu1 %v6349_v47  ;;  %2059 = vmatprep.mubr.bf16.mxu0 %v6350_v48 }
  0xcc   : > { %2204 = vmatprep.mubr.bf16.mxu1 %v6352_v49 }
  0xd2   : > { %2060 = vmatmul.mubr.bf16.gmra.mrb[80].mxu0 %v6354_v50 }
  0xd3   : > { %2205 = vmatmul.mubr.bf16.gmra.mrb[80].mxu1 %v6355_v51  ;;  %2067 = vmatprep.mubr.bf16.mxu0 %v6356_v52 }
  0xd4   : > { %2212 = vmatprep.mubr.bf16.mxu1 %v6358_v53 }
  0xda   : > { %2068 = vmatmul.mubr.bf16.gmra.mrb[84].mxu0 %v6360_v54 }
  0xdb   : > { %2213 = vmatmul.mubr.bf16.gmra.mrb[84].mxu1 %v6361_v55  ;;  %2075 = vmatprep.mubr.bf16.mxu0 %v6362_v56 }
  0xdc   : > { %2220 = vmatprep.mubr.bf16.mxu1 %v6364_v57 }
  0xe2   : > { %2076 = vmatmul.mubr.bf16.gmra.mrb[88].mxu0 %v6366_v58 }
  0xe3   : > { %2221 = vmatmul.mubr.bf16.gmra.mrb[88].mxu1 %v6367_v59  ;;  %2083 = vmatprep.mubr.bf16.mxu0 %v6368_v60 }
  0xe4   : > { %2228 = vmatprep.mubr.bf16.mxu1 %v6370_v61 }
  0xea   : > { %2084 = vmatmul.mubr.bf16.gmra.mrb[92].mxu0 %v6372_v62 }
  0xeb   : > { %2229 = vmatmul.mubr.bf16.gmra.mrb[92].mxu1 %v6373_v63  ;;  %2091 = vmatprep.mubr.bf16.mxu0 %v6374_v0 }
  0xec   : > { %2236 = vmatprep.mubr.bf16.mxu1 %v6376_v1 }
  0xf2   : > { %2092 = vmatmul.mubr.bf16.gmra.mrb[96].mxu0 %v6378_v2 }
  0xf3   : > { %2237 = vmatmul.mubr.bf16.gmra.mrb[96].mxu1 %v6379_v3  ;;  %2099 = vmatprep.mubr.bf16.mxu0 %v6380_v4 }
  0xf4   : > { %2244 = vmatprep.mubr.bf16.mxu1 %v6382_v5 }
  0xfa   : > { %2100 = vmatmul.mubr.bf16.gmra.mrb[100].mxu0 %v6384_v8  ;;  %v6406_v8 = vld [vmem:[%s6964_s21 + $0x50] sm:$0xff]  }
  0xfb   : > { %2245 = vmatmul.mubr.bf16.gmra.mrb[100].mxu1 %v6385_v9  ;;  %2107 = vmatprep.mubr.bf16.mxu0 %v6386_v10  ;;  %v6407_v9 = vld [vmem:[%s6964_s21 + $0x10] sm:$0xff]  }
  0xfc   : > { %2252 = vmatprep.mubr.bf16.mxu1 %v6388_v13  ;;  %v6408_v10 = vld [vmem:[%s6964_s21 + $0xd0] sm:$0xff]   ;;  %5737 = vmatprep.subr.bf16.mxu0 %v6406_v8 }
  0xfd   : > { %v6409_v13 = vld [vmem:[%s6964_s21 + $0x90] sm:$0xff]   ;;  %5765 = vmatprep.subr.bf16.mxu1 %v6408_v10  ;;  %5738 = vmatpush3.bf16.msra.mxu0 %v6407_v9 }
  0xfe   : > { %5766 = vmatpush3.bf16.msra.mxu1 %v6409_v13 }
 0x102   : > { %2108 = vmatmul.mubr.bf16.gmra.mrb[104].mxu0 %v6390_v14 }
 0x103   : > { %2253 = vmatmul.mubr.bf16.gmra.mrb[104].mxu1 %v6391_v15  ;;  %2115 = vmatprep.mubr.bf16.mxu0 %v6392_v16 }
 0x104   : > { %2260 = vmatprep.mubr.bf16.mxu1 %v6395_v17 }
 0x105   : > { %v5349_v20 = vpop.f32.mrb[0].mxu0 }
 0x106   : > { %v5449_v22 = vpop.f32.mrb[0].mxu1  ;;  %v5350_v23 = vpop.f32.mrb[1].mxu0 }
 0x107   : > { %v5351_v24 = vadd.f32 %v5350_v23, %v5349_v20  ;;  %v5450_v25 = vpop.f32.mrb[1].mxu1  ;;  %v5352_v26 = vpop.f32.mrb[2].mxu0 }
 0x108   : > { %v5451_v27 = vadd.f32 %v5450_v25, %v5449_v22  ;;  %v5452_v28 = vpop.f32.mrb[2].mxu1  ;;  %v5353_v29 = vpop.f32.mrb[3].mxu0 }
 0x109   : > { %v1416_v30 = vadd.f32 %v5351_v24, %v6985_v18  ;;  %v5354_v31 = vadd.f32 %v5353_v29, %v5352_v26  ;;  %v5453_v32 = vpop.f32.mrb[3].mxu1 }
 0x10a   : > { %v5454_v36 = vadd.f32 %v5453_v32, %v5452_v28  ;;  %2116 = vmatmul.mubr.bf16.gmra.mrb[108].mxu0 %v6394_v19 }
 0x10b   : > { %v6994_v38 = vadd.f32 %v5451_v27, %v1416_v30  ;;  %v1419_v39 = vadd.f32 %v5354_v31, %v6985_v18  ;;  %2261 = vmatmul.mubr.bf16.gmra.mrb[108].mxu1 %v6397_v21 }
 0x10d   : > { %v6997_v40 = vadd.f32 %v5454_v36, %v1419_v39  ;;  %v5355_v41 = vpop.f32.mrb[4].mxu0 }
 0x10e   : > { %v5455_v42 = vpop.f32.mrb[4].mxu1  ;;  %v5356_v43 = vpop.f32.mrb[5].mxu0 }
 0x10f   : > { %v5357_v44 = vadd.f32 %v5356_v43, %v5355_v41  ;;  %v5456_v45 = vpop.f32.mrb[5].mxu1  ;;  %v5358_v46 = vpop.f32.mrb[6].mxu0 }
 0x110   : > { %v5457_v47 = vadd.f32 %v5456_v45, %v5455_v42  ;;  %v5458_v48 = vpop.f32.mrb[6].mxu1  ;;  %v5359_v49 = vpop.f32.mrb[7].mxu0 }
 0x111   : > { %v1424_v50 = vadd.f32 %v5357_v44, %v6985_v18  ;;  %v5360_v51 = vadd.f32 %v5359_v49, %v5358_v46  ;;  %v5459_v52 = vpop.f32.mrb[7].mxu1 }
 0x112   : > { %v5460_v53 = vadd.f32 %v5459_v52, %v5458_v48  ;;  %v6411_v48 = vld [vmem:[%s6964_s21 + $0x18] sm:$0xff]  }
 0x113   : > { %v7000_v54 = vadd.f32 %v5457_v47, %v1424_v50  ;;  %v1427_v55 = vadd.f32 %v5360_v51, %v6985_v18  ;;  %v6410_v47 = vld [vmem:[%s6964_s21 + $0x58] sm:$0xff]  }
 0x114   : > { %5739 = vmatprep.subr.bf16.mxu0 %v6410_v47 }
 0x115   : > { %v7003_v56 = vadd.f32 %v5460_v53, %v1427_v55  ;;  %v5361_v57 = vpop.f32.mrb[8].mxu0  ;;  %5740 = vmatpush3.bf16.msra.mxu0 %v6411_v48  ;;  %v6412_v53 = vld [vmem:[%s6964_s21 + $0xd8] sm:$0xff]  }
 0x116   : > { %v5461_v58 = vpop.f32.mrb[8].mxu1  ;;  %v5362_v59 = vpop.f32.mrb[9].mxu0  ;;  %v6413_v55 = vld [vmem:[%s6964_s21 + $0x98] sm:$0xff]   ;;  %5767 = vmatprep.subr.bf16.mxu1 %v6412_v53 }
 0x117   : > { %v5363_v60 = vadd.f32 %v5362_v59, %v5361_v57  ;;  %v5462_v61 = vpop.f32.mrb[9].mxu1  ;;  %v5364_v62 = vpop.f32.mrb[10].mxu0  ;;  %5768 = vmatpush3.bf16.msra.mxu1 %v6413_v55 }
 0x118   : > { %v5463_v63 = vadd.f32 %v5462_v61, %v5461_v58  ;;  %v5464_v0 = vpop.f32.mrb[10].mxu1  ;;  %v5365_v1 = vpop.f32.mrb[11].mxu0 }
 0x119   : > { %v1432_v2 = vadd.f32 %v5363_v60, %v6985_v18  ;;  %v5366_v3 = vadd.f32 %v5365_v1, %v5364_v62  ;;  %v5465_v4 = vpop.f32.mrb[11].mxu1 }
 0x11a   : > { %v5466_v5 = vadd.f32 %v5465_v4, %v5464_v0 }
 0x11b   : > { %v7006_v6 = vadd.f32 %v5463_v63, %v1432_v2  ;;  %v1435_v7 = vadd.f32 %v5366_v3, %v6985_v18 }
 0x11d   : > { %v7012_v11 = vadd.f32 %v5466_v5, %v1435_v7  ;;  %v5367_v12 = vpop.f32.mrb[12].mxu0 }
 0x11e   : > { %v5467_v14 = vpop.f32.mrb[12].mxu1  ;;  %v5368_v15 = vpop.f32.mrb[13].mxu0 }
 0x11f   : > { %v5369_v16 = vadd.f32 %v5368_v15, %v5367_v12  ;;  %v5468_v17 = vpop.f32.mrb[13].mxu1  ;;  %v5370_v19 = vpop.f32.mrb[14].mxu0  ;;  %v6415_v15 = vld [vmem:[%s6964_s21 + $0x20] sm:$0xff]  }
 0x120   : > { %v5469_v20 = vadd.f32 %v5468_v17, %v5467_v14  ;;  %v5470_v21 = vpop.f32.mrb[14].mxu1  ;;  %v5371_v22 = vpop.f32.mrb[15].mxu0  ;;  %v6414_v14 = vld [vmem:[%s6964_s21 + $0x60] sm:$0xff]  }
 0x121   : > { %v1440_v23 = vadd.f32 %v5369_v16, %v6985_v18  ;;  %v5372_v24 = vadd.f32 %v5371_v22, %v5370_v19  ;;  %v5471_v25 = vpop.f32.mrb[15].mxu1  ;;  %5741 = vmatprep.subr.bf16.mxu0 %v6414_v14 }
 0x122   : > { %v5472_v26 = vadd.f32 %v5471_v25, %v5470_v21  ;;  %5742 = vmatpush3.bf16.msra.mxu0 %v6415_v15 }
 0x123   : > { %v7016_v27 = vadd.f32 %v5469_v20, %v1440_v23  ;;  %v1443_v28 = vadd.f32 %v5372_v24, %v6985_v18 }
 0x125   : > { %v7019_v29 = vadd.f32 %v5472_v26, %v1443_v28  ;;  %v5373_v30 = vpop.f32.mrb[16].mxu0 }
 0x126   : > { %v5473_v31 = vpop.f32.mrb[16].mxu1  ;;  %v5374_v32 = vpop.f32.mrb[17].mxu0 }
 0x127   : > { %v5375_v33 = vadd.f32 %v5374_v32, %v5373_v30  ;;  %v5474_v34 = vpop.f32.mrb[17].mxu1  ;;  %v5376_v35 = vpop.f32.mrb[18].mxu0  ;;  %v6416_v32 = vld [vmem:[%s6964_s21 + $0xe0] sm:$0xff]  }
 0x128   : > { %v5475_v36 = vadd.f32 %v5474_v34, %v5473_v31  ;;  %v5476_v37 = vpop.f32.mrb[18].mxu1  ;;  %v5377_v39 = vpop.f32.mrb[19].mxu0  ;;  %5769 = vmatprep.subr.bf16.mxu1 %v6416_v32 }
 0x129   : > { %v1448_v41 = vadd.f32 %v5375_v33, %v6985_v18  ;;  %v5378_v42 = vadd.f32 %v5377_v39, %v5376_v35  ;;  %v5477_v43 = vpop.f32.mrb[19].mxu1  ;;  %v6417_v33 = vld [vmem:[%s6964_s21 + $0xa0] sm:$0xff]  }
 0x12a   : > { %v5478_v44 = vadd.f32 %v5477_v43, %v5476_v37  ;;  %5770 = vmatpush3.bf16.msra.mxu1 %v6417_v33 }
 0x12b   : > { %v7022_v45 = vadd.f32 %v5475_v36, %v1448_v41  ;;  %v1451_v46 = vadd.f32 %v5378_v42, %v6985_v18 }
 0x12d   : > { %v7027_v49 = vadd.f32 %v5478_v44, %v1451_v46  ;;  %v5379_v50 = vpop.f32.mrb[20].mxu0 }
 0x12e   : > { %v5479_v51 = vpop.f32.mrb[20].mxu1  ;;  %v5380_v52 = vpop.f32.mrb[21].mxu0 }
 0x12f   : > { %v5381_v57 = vadd.f32 %v5380_v52, %v5379_v50  ;;  %v5480_v58 = vpop.f32.mrb[21].mxu1  ;;  %v5382_v59 = vpop.f32.mrb[22].mxu0  ;;  %v6418_v52 = vld [vmem:[%s6964_s21 + $0x68] sm:$0xff]  }
 0x130   : > { %v5481_v60 = vadd.f32 %v5480_v58, %v5479_v51  ;;  %v5482_v61 = vpop.f32.mrb[22].mxu1  ;;  %v5383_v62 = vpop.f32.mrb[23].mxu0  ;;  %v6420_v58 = vld [vmem:[%s6964_s21 + $0xe8] sm:$0xff]   ;;  %5743 = vmatprep.subr.bf16.mxu0 %v6418_v52 }
 0x131   : > { %v1456_v63 = vadd.f32 %v5381_v57, %v6985_v18  ;;  %v5384_v0 = vadd.f32 %v5383_v62, %v5382_v59  ;;  %v5483_v1 = vpop.f32.mrb[23].mxu1  ;;  %v6419_v57 = vld [vmem:[%s6964_s21 + $0x28] sm:$0xff]   ;;  %5771 = vmatprep.subr.bf16.mxu1 %v6420_v58 }
 0x132   : > { %v5484_v2 = vadd.f32 %v5483_v1, %v5482_v61  ;;  %v6421_v59 = vld [vmem:[%s6964_s21 + $0xa8] sm:$0xff]   ;;  %5744 = vmatpush3.bf16.msra.mxu0 %v6419_v57 }
 0x133   : > { %v7032_v3 = vadd.f32 %v5481_v60, %v1456_v63  ;;  %v1459_v4 = vadd.f32 %v5384_v0, %v6985_v18  ;;  %5772 = vmatpush3.bf16.msra.mxu1 %v6421_v59 }
 0x135   : > { %v7035_v5 = vadd.f32 %v5484_v2, %v1459_v4  ;;  %v5385_v7 = vpop.f32.mrb[24].mxu0 }
 0x136   : > { %v5485_v8 = vpop.f32.mrb[24].mxu1  ;;  %v5386_v9 = vpop.f32.mrb[25].mxu0 }
 0x137   : > { %v5387_v10 = vadd.f32 %v5386_v9, %v5385_v7  ;;  %v5486_v12 = vpop.f32.mrb[25].mxu1  ;;  %v5388_v13 = vpop.f32.mrb[26].mxu0  ;;  %v6422_v9 = vld [vmem:[%s6964_s21 + $0x70] sm:$0xff]  }
 0x138   : > { %v5487_v16 = vadd.f32 %v5486_v12, %v5485_v8  ;;  %v5488_v17 = vpop.f32.mrb[26].mxu1  ;;  %v5389_v19 = vpop.f32.mrb[27].mxu0  ;;  %5745 = vmatprep.subr.bf16.mxu0 %v6422_v9 }
 0x139   : > { %v1464_v20 = vadd.f32 %v5387_v10, %v6985_v18  ;;  %v5390_v21 = vadd.f32 %v5389_v19, %v5388_v13  ;;  %v5489_v22 = vpop.f32.mrb[27].mxu1  ;;  %v6423_v13 = vld [vmem:[%s6964_s21 + $0x30] sm:$0xff]   ;;  %v6426_v19 = vld [vmem:[%s6964_s21 + $0x78] sm:$0xff]  }
 0x13a   : > { %v5490_v23 = vadd.f32 %v5489_v22, %v5488_v17  ;;  %5746 = vmatpush3.bf16.msra.mxu0 %v6423_v13 }
 0x13b   : > { %v7040_v24 = vadd.f32 %v5487_v16, %v1464_v20  ;;  %v1467_v25 = vadd.f32 %v5390_v21, %v6985_v18  ;;  %5747 = vmatprep.subr.bf16.mxu0 %v6426_v19 }
 0x13d   : > { %v7043_v26 = vadd.f32 %v5490_v23, %v1467_v25  ;;  %v5391_v28 = vpop.f32.mrb[28].mxu0  ;;  %v6427_v23 = vld [vmem:[%s6964_s21 + $0x38] sm:$0xff]  }
 0x13e   : > { %v5491_v30 = vpop.f32.mrb[28].mxu1  ;;  %v5392_v31 = vpop.f32.mrb[29].mxu0  ;;  %5748 = vmatpush3.bf16.msra.mxu0 %v6427_v23 }
 0x13f   : > { %v5393_v34 = vadd.f32 %v5392_v31, %v5391_v28  ;;  %v5492_v35 = vpop.f32.mrb[29].mxu1  ;;  %v5394_v36 = vpop.f32.mrb[30].mxu0 }
 0x140   : > { %v5493_v37 = vadd.f32 %v5492_v35, %v5491_v30  ;;  %v5494_v39 = vpop.f32.mrb[30].mxu1  ;;  %v5395_v41 = vpop.f32.mrb[31].mxu0  ;;  %v6424_v35 = vld [vmem:[%s6964_s21 + $0xf0] sm:$0xff]  }
 0x141   : > { %v1472_v42 = vadd.f32 %v5393_v34, %v6985_v18  ;;  %v5396_v43 = vadd.f32 %v5395_v41, %v5394_v36  ;;  %v5495_v44 = vpop.f32.mrb[31].mxu1  ;;  %5773 = vmatprep.subr.bf16.mxu1 %v6424_v35 }
 0x142   : > { %v5496_v46 = vadd.f32 %v5495_v44, %v5494_v39  ;;  %v6425_v39 = vld [vmem:[%s6964_s21 + $0xb0] sm:$0xff]  }
 0x143   : > { %v7048_v47 = vadd.f32 %v5493_v37, %v1472_v42  ;;  %v1475_v48 = vadd.f32 %v5396_v43, %v6985_v18  ;;  %5774 = vmatpush3.bf16.msra.mxu1 %v6425_v39 }
 0x145   : > { %v7051_v50 = vadd.f32 %v5496_v46, %v1475_v48  ;;  %v5397_v51 = vpop.f32.mrb[32].mxu0  ;;  %v6428_v46 = vld [vmem:[%s6964_s21 + $0xf8] sm:$0xff]  }
 0x146   : > { %v5497_v53 = vpop.f32.mrb[32].mxu1  ;;  %v5398_v55 = vpop.f32.mrb[33].mxu0  ;;  %5775 = vmatprep.subr.bf16.mxu1 %v6428_v46 }
 0x147   : > { %v5399_v60 = vadd.f32 %v5398_v55, %v5397_v51  ;;  %v5498_v61 = vpop.f32.mrb[33].mxu1  ;;  %v5400_v62 = vpop.f32.mrb[34].mxu0  ;;  %v6430_v55 = vld [vmem:[%s6964_s21 + $0x140] sm:$0xff]  }
 0x148   : > { %v5499_v63 = vadd.f32 %v5498_v61, %v5497_v53  ;;  %v5500_v0 = vpop.f32.mrb[34].mxu1  ;;  %v5401_v1 = vpop.f32.mrb[35].mxu0  ;;  %v6429_v53 = vld [vmem:[%s6964_s21 + $0xb8] sm:$0xff]   ;;  %5789 = vmatprep.subr.bf16.mxu0 %v6430_v55 }
 0x149   : > { %v1480_v2 = vadd.f32 %v5399_v60, %v6985_v18  ;;  %v5402_v4 = vadd.f32 %v5401_v1, %v5400_v62  ;;  %v5501_v7 = vpop.f32.mrb[35].mxu1  ;;  %5776 = vmatpush3.bf16.msra.mxu1 %v6429_v53 }
 0x14a   : > { %v5502_v8 = vadd.f32 %v5501_v7, %v5500_v0 }
 0x14b   : > { %v7059_v10 = vadd.f32 %v5499_v63, %v1480_v2  ;;  %v1483_v12 = vadd.f32 %v5402_v4, %v6985_v18 }
 0x14d   : > { %v7063_v14 = vadd.f32 %v5502_v8, %v1483_v12  ;;  %v5403_v15 = vpop.f32.mrb[36].mxu0 }
 0x14e   : > { %v5503_v16 = vpop.f32.mrb[36].mxu1  ;;  %v5404_v17 = vpop.f32.mrb[37].mxu0 }
 0x14f   : > { %v5405_v20 = vadd.f32 %v5404_v17, %v5403_v15  ;;  %v5504_v21 = vpop.f32.mrb[37].mxu1  ;;  %v5406_v22 = vpop.f32.mrb[38].mxu0  ;;  %v6435_v15 = vld [vmem:[%s6964_s21 + $0x1c0] sm:$0xff]  }
 0x150   : > { %v5505_v25 = vadd.f32 %v5504_v21, %v5503_v16  ;;  %v5506_v28 = vpop.f32.mrb[38].mxu1  ;;  %v5407_v30 = vpop.f32.mrb[39].mxu0  ;;  %5817 = vmatprep.subr.bf16.mxu1 %v6435_v15 }
 0x151   : > { %v1488_v31 = vadd.f32 %v5405_v20, %v6985_v18  ;;  %v5408_v32 = vadd.f32 %v5407_v30, %v5406_v22  ;;  %v5507_v33 = vpop.f32.mrb[39].mxu1 }
 0x152   : > { %v5508_v34 = vadd.f32 %v5507_v33, %v5506_v28 }
 0x153   : > { %v7069_v36 = vadd.f32 %v5505_v25, %v1488_v31  ;;  %v1491_v37 = vadd.f32 %v5408_v32, %v6985_v18 }
 0x155   : > { %v7073_v41 = vadd.f32 %v5508_v34, %v1491_v37  ;;  %v5409_v42 = vpop.f32.mrb[40].mxu0 }
 0x156   : > { %v5509_v43 = vpop.f32.mrb[40].mxu1  ;;  %v5410_v44 = vpop.f32.mrb[41].mxu0 }
 0x157   : > { %v5411_v48 = vadd.f32 %v5410_v44, %v5409_v42  ;;  %v5510_v51 = vpop.f32.mrb[41].mxu1  ;;  %v5412_v52 = vpop.f32.mrb[42].mxu0 }
 0x158   : > { %v5511_v57 = vadd.f32 %v5510_v51, %v5509_v43  ;;  %v5512_v58 = vpop.f32.mrb[42].mxu1  ;;  %v5413_v59 = vpop.f32.mrb[43].mxu0 }
 0x159   : > { %v1496_v60 = vadd.f32 %v5411_v48, %v6985_v18  ;;  %v5414_v61 = vadd.f32 %v5413_v59, %v5412_v52  ;;  %v5513_v62 = vpop.f32.mrb[43].mxu1 }
 0x15a   : > { %v5514_v63 = vadd.f32 %v5513_v62, %v5512_v58 }
 0x15b   : > { %v7079_v0 = vadd.f32 %v5511_v57, %v1496_v60  ;;  %v1499_v1 = vadd.f32 %v5414_v61, %v6985_v18 }
 0x15d   : > { %v7082_v2 = vadd.f32 %v5514_v63, %v1499_v1  ;;  %v5415_v4 = vpop.f32.mrb[44].mxu0 }
 0x15e   : > { %v5515_v7 = vpop.f32.mrb[44].mxu1  ;;  %v5416_v8 = vpop.f32.mrb[45].mxu0 }
 0x15f   : > { %v5417_v9 = vadd.f32 %v5416_v8, %v5415_v4  ;;  %v5516_v12 = vpop.f32.mrb[45].mxu1  ;;  %v5418_v13 = vpop.f32.mrb[46].mxu0 }
 0x160   : > { %v5517_v16 = vadd.f32 %v5516_v12, %v5515_v7  ;;  %v5518_v17 = vpop.f32.mrb[46].mxu1  ;;  %v5419_v19 = vpop.f32.mrb[47].mxu0 }
 0x161   : > { %v1504_v20 = vadd.f32 %v5417_v9, %v6985_v18  ;;  %v5420_v21 = vadd.f32 %v5419_v19, %v5418_v13  ;;  %v5519_v22 = vpop.f32.mrb[47].mxu1 }
 0x162   : > { %v5520_v23 = vadd.f32 %v5519_v22, %v5518_v17 }
 0x163   : > { %v7086_v25 = vadd.f32 %v5517_v16, %v1504_v20  ;;  %v1507_v28 = vadd.f32 %v5420_v21, %v6985_v18 }
 0x165   : > { %v7089_v30 = vadd.f32 %v5520_v23, %v1507_v28  ;;  %v5421_v31 = vpop.f32.mrb[48].mxu0 }
 0x166   : > { %v5521_v32 = vpop.f32.mrb[48].mxu1  ;;  %v5422_v33 = vpop.f32.mrb[49].mxu0 }
 0x167   : > { %v5423_v34 = vadd.f32 %v5422_v33, %v5421_v31  ;;  %v5522_v35 = vpop.f32.mrb[49].mxu1  ;;  %v5424_v37 = vpop.f32.mrb[50].mxu0 }
 0x168   : > { %v5523_v39 = vadd.f32 %v5522_v35, %v5521_v32  ;;  %v5524_v42 = vpop.f32.mrb[50].mxu1  ;;  %v5425_v43 = vpop.f32.mrb[51].mxu0 }
 0x169   : > { %v1512_v44 = vadd.f32 %v5423_v34, %v6985_v18  ;;  %v5426_v46 = vadd.f32 %v5425_v43, %v5424_v37  ;;  %v5525_v48 = vpop.f32.mrb[51].mxu1  ;;  %v1671_v43 = vmax.f32 %v6994_v38, 0.0 }
 0x16a   : > { %v5526_v51 = vadd.f32 %v5525_v48, %v5524_v42 }
 0x16b   : > { %v7092_v52 = vadd.f32 %v5523_v39, %v1512_v44  ;;  %v1515_v53 = vadd.f32 %v5426_v46, %v6985_v18 }
 0x16d   : > { %v7095_v55 = vadd.f32 %v5526_v51, %v1515_v53  ;;  %v5427_v57 = vpop.f32.mrb[52].mxu0 }
 0x16e   : > { %v5527_v58 = vpop.f32.mrb[52].mxu1  ;;  %v5428_v59 = vpop.f32.mrb[53].mxu0 }
 0x16f   : > { %v5429_v60 = vadd.f32 %v5428_v59, %v5427_v57  ;;  %v5528_v61 = vpop.f32.mrb[53].mxu1  ;;  %v5430_v62 = vpop.f32.mrb[54].mxu0  ;;  %v1672_v57 = vmax.f32 %v6997_v40, 0.0  ;;  %v1673_v40 = vmax.f32 %v7000_v54, 0.0 }
 0x170   : > { %v5529_v63 = vadd.f32 %v5528_v61, %v5527_v58  ;;  %v5530_v1 = vpop.f32.mrb[54].mxu1  ;;  %v5431_v4 = vpop.f32.mrb[55].mxu0 }
 0x171   : > { %v1520_v7 = vadd.f32 %v5429_v60, %v6985_v18  ;;  %v5432_v8 = vadd.f32 %v5431_v4, %v5430_v62  ;;  %v5531_v9 = vpop.f32.mrb[55].mxu1 }
 0x172   : > { %v5532_v12 = vadd.f32 %v5531_v9, %v5530_v1 }
 0x173   : > { %v7098_v13 = vadd.f32 %v5529_v63, %v1520_v7  ;;  %v1523_v15 = vadd.f32 %v5432_v8, %v6985_v18 }
 0x175   : > { %v7101_v16 = vadd.f32 %v5532_v12, %v1523_v15  ;;  %v5549_v17 = vpop.f32.mrb[56].mxu0 }
 0x176   : > { %v5649_v19 = vpop.f32.mrb[56].mxu1  ;;  %v5550_v20 = vpop.f32.mrb[57].mxu0 }
 0x177   : > { %v5551_v21 = vadd.f32 %v5550_v20, %v5549_v17  ;;  %v5650_v22 = vpop.f32.mrb[57].mxu1  ;;  %v5552_v23 = vpop.f32.mrb[58].mxu0 }
 0x178   : > { %v5651_v28 = vadd.f32 %v5650_v22, %v5649_v19  ;;  %v5652_v31 = vpop.f32.mrb[58].mxu1  ;;  %v5553_v32 = vpop.f32.mrb[59].mxu0 }
 0x179   : > { %v2014_v33 = vadd.f32 %v5551_v21, %v6985_v18  ;;  %v5554_v34 = vadd.f32 %v5553_v32, %v5552_v23  ;;  %v5653_v35 = vpop.f32.mrb[59].mxu1 }
 0x17a   : > { %v5654_v37 = vadd.f32 %v5653_v35, %v5652_v31 }
 0x17b   : > { %v2159_v39 = vadd.f32 %v5651_v28, %v2014_v33  ;;  %v2017_v42 = vadd.f32 %v5554_v34, %v6985_v18  ;;  %v1674_v28 = vmax.f32 %v7003_v56, 0.0 }
 0x17d   : > { %v2269_v44 = vmax.f32 %v2159_v39, 0.0  ;;  %v2162_v46 = vadd.f32 %v5654_v37, %v2017_v42  ;;  %v5555_v48 = vpop.f32.mrb[60].mxu0 }
 0x17e   : > { %v5655_v51 = vpop.f32.mrb[60].mxu1  ;;  %v5556_v53 = vpop.f32.mrb[61].mxu0 }
 0x17f   : > { %v2297_v58 = vmax.f32 %v1671_v43, %v2269_v44  ;;  %v2270_v59 = vmax.f32 %v2162_v46, 0.0  ;;  %v5557_v60 = vadd.f32 %v5556_v53, %v5555_v48  ;;  %v5656_v61 = vpop.f32.mrb[61].mxu1  ;;  %v5558_v62 = vpop.f32.mrb[62].mxu0 }
 0x180   : > { %v5657_v63 = vadd.f32 %v5656_v61, %v5655_v51  ;;  %v5658_v1 = vpop.f32.mrb[62].mxu1  ;;  %v5559_v4 = vpop.f32.mrb[63].mxu0 }
 0x181   : > { %2325 = vst [vmem:[#allocation2] sm:$0xff] %v2297_v58  ;;  %v2298_v7 = vmax.f32 %v1672_v57, %v2270_v59  ;;  %v2022_v8 = vadd.f32 %v5557_v60, %v6985_v18  ;;  %v5560_v38 = vadd.f32 %v5559_v4, %v5558_v62  ;;  %v5659_v9 = vpop.f32.mrb[63].mxu1  ;;  %v1675_v62 = vmax.f32 %v7006_v6, 0.0 }
 0x182   : > { %v5660_v12 = vadd.f32 %v5659_v9, %v5658_v1 }
 0x183   : > { %2326 = vst [vmem:[#allocation2 + $0x8] sm:$0xff] %v2298_v7  ;;  %v2167_v15 = vadd.f32 %v5657_v63, %v2022_v8  ;;  %v2025_v17 = vadd.f32 %v5560_v38, %v6985_v18  ;;  %v1676_v38 = vmax.f32 %v7012_v11, 0.0 }
 0x185   : > { %v2271_v19 = vmax.f32 %v2167_v15, 0.0  ;;  %v2170_v20 = vadd.f32 %v5660_v12, %v2025_v17  ;;  %v5561_v21 = vpop.f32.mrb[64].mxu0 }
 0x186   : > { %v5661_v22 = vpop.f32.mrb[64].mxu1  ;;  %v5562_v23 = vpop.f32.mrb[65].mxu0 }
 0x187   : > { %v2299_v31 = vmax.f32 %v1673_v40, %v2271_v19  ;;  %v2272_v32 = vmax.f32 %v2170_v20, 0.0  ;;  %v5563_v33 = vadd.f32 %v5562_v23, %v5561_v21  ;;  %v5662_v34 = vpop.f32.mrb[65].mxu1  ;;  %v5564_v35 = vpop.f32.mrb[66].mxu0 }
 0x188   : > { %v2353_v37 = vld [vmem:[#allocation2] sm:$0x3f]  ;;  %v5663_v43 = vadd.f32 %v5662_v34, %v5661_v22  ;;  %v5664_v46 = vpop.f32.mrb[66].mxu1  ;;  %v5565_v48 = vpop.f32.mrb[67].mxu0 }
 0x189   : > { %v2371_v39 = vld [vmem:[#allocation2 + $0x1] sm:$0x3f]  ;;  %2354 = vst [vmem:[#allocation3] sm:$0x3f] %v2353_v37  ;;  %2327 = vst [vmem:[#allocation2 + $0x10] sm:$0xff] %v2299_v31  ;;  %v2300_v54 = vmax.f32 %v1674_v28, %v2272_v32  ;;  %v2030_v44 = vadd.f32 %v5563_v33, %v6985_v18  ;;  %v5566_v51 = vadd.f32 %v5565_v48, %v5564_v35  ;;  %v5665_v56 = vpop.f32.mrb[67].mxu1 }
 0x18a   : > { %v2385_v42 = vld [vmem:[#allocation2 + $0x1] sm:$0x3f]  ;;  %2372 = vst [vmem:[#allocation4 + $0x20] sm:$0x3f] %v2371_v39  ;;  %v2357_v53 = vld [vmem:[#allocation2 + $0x7] sm:$0x3f]  ;;  %v5666_v59 = vadd.f32 %v5665_v56, %v5664_v46 }
 0x18b   : > { %2386 = vst [vmem:[#allocation3 + $0x40] sm:$0x3f] %v2385_v42  ;;  %v2389_v57 = vld [vmem:[#allocation2 + $0x8] sm:$0x3f]  ;;  %2328 = vst [vmem:[#allocation2 + $0x18] sm:$0xff] %v2300_v54  ;;  %v2175_v58 = vadd.f32 %v5663_v43, %v2030_v44  ;;  %v2033_v61 = vadd.f32 %v5566_v51, %v6985_v18  ;;  %v1677_v39 = vmax.f32 %v7016_v27, 0.0 }
 0x18c   : > { %2358 = vst [vmem:[#allocation3 + $0x8] sm:$0x3f] %v2357_v53  ;;  %2390 = vst [vmem:[#allocation3 + $0x48] sm:$0x3f] %v2389_v57  ;;  %v2375_v60 = vld [vmem:[#allocation2 + $0x8] sm:$0x3f] }
 0x18d   : > { %2376 = vst [vmem:[#allocation4 + $0x28] sm:$0x3f] %v2375_v60  ;;  %v2273_v63 = vmax.f32 %v2175_v58, 0.0  ;;  %v5567_v1 = vpop.f32.mrb[68].mxu0  ;;  %v2178_v4 = vadd.f32 %v5666_v59, %v2033_v61  ;;  %v1678_v61 = vmax.f32 %v7019_v29, 0.0 }
 0x18e   : > { %v5667_v7 = vpop.f32.mrb[68].mxu1  ;;  %v5568_v8 = vpop.f32.mrb[69].mxu0  ;;  %v7120_v27 = vld [vmem:[%s6982_s24] ss:$0 sm:$0xff] }
 0x18f   : > { %v2301_v9 = vmax.f32 %v1675_v62, %v2273_v63  ;;  %v5569_v12 = vadd.f32 %v5568_v8, %v5567_v1  ;;  %v5668_v15 = vpop.f32.mrb[69].mxu1  ;;  %v5570_v17 = vpop.f32.mrb[70].mxu0  ;;  %v2274_v20 = vmax.f32 %v2178_v4, 0.0 }
 0x190   : > { %v2361_v40 = vld [vmem:[#allocation2 + $0xe] sm:$0x3f]  ;;  %v5669_v21 = vadd.f32 %v5668_v15, %v5667_v7  ;;  %v5670_v22 = vpop.f32.mrb[70].mxu1  ;;  %v5571_v23 = vpop.f32.mrb[71].mxu0 }
 0x191   : > { %v2379_v19 = vld [vmem:[#allocation2 + $0xf] sm:$0x3f]  ;;  %2362 = vst [vmem:[#allocation3 + $0x10] sm:$0x3f] %v2361_v40  ;;  %2329 = vst [vmem:[#allocation2 + $0x20] sm:$0xff] %v2301_v9  ;;  %v2038_v6 = vadd.f32 %v5569_v12, %v6985_v18  ;;  %v5671_v28 = vpop.f32.mrb[71].mxu1  ;;  %v2302_v31 = vmax.f32 %v1676_v38, %v2274_v20  ;;  %v5572_v32 = vadd.f32 %v5571_v23, %v5570_v17 }
 0x192   : > { %2380 = vst [vmem:[#allocation4 + $0x30] sm:$0x3f] %v2379_v19  ;;  %v5672_v33 = vadd.f32 %v5671_v28, %v5670_v22  ;;  %v2365_v11 = vld [vmem:[#allocation2 + $0x15] sm:$0x3f]  ;;  %v1679_v20 = vmax.f32 %v7022_v45, 0.0 }
 0x193   : > { %v2383_v34 = vld [vmem:[#allocation2 + $0x16] sm:$0x3f]  ;;  %v2183_v35 = vadd.f32 %v5669_v21, %v2038_v6  ;;  %2366 = vst [vmem:[#allocation3 + $0x18] sm:$0x3f] %v2365_v11  ;;  %2330 = vst [vmem:[#allocation2 + $0x28] sm:$0xff] %v2302_v31  ;;  %v2041_v37 = vadd.f32 %v5572_v32, %v6985_v18 }
 0x194   : > { %2384 = vst [vmem:[#allocation4 + $0x38] sm:$0x3f] %v2383_v34  ;;  %v1680_v34 = vmax.f32 %v7027_v49, 0.0 }
 0x195   : > { %v2275_v42 = vmax.f32 %v2183_v35, 0.0  ;;  %v5573_v43 = vpop.f32.mrb[72].mxu0  ;;  %v2186_v54 = vadd.f32 %v5672_v33, %v2041_v37 }
 0x196   : > { %v5673_v44 = vpop.f32.mrb[72].mxu1  ;;  %v5574_v46 = vpop.f32.mrb[73].mxu0 }
 0x197   : > { %v2303_v48 = vmax.f32 %v1677_v39, %v2275_v42  ;;  %v5575_v51 = vadd.f32 %v5574_v46, %v5573_v43  ;;  %v5674_v56 = vpop.f32.mrb[73].mxu1  ;;  %v5576_v53 = vpop.f32.mrb[74].mxu0  ;;  %v2276_v18 = vmax.f32 %v2186_v54, 0.0 }
 0x198   : > { %v2355_v57 = vld [vmem:[#allocation2 + $0x1c] sm:$0x3f]  ;;  %v5675_v60 = vadd.f32 %v5674_v56, %v5673_v44  ;;  %v5676_v63 = vpop.f32.mrb[74].mxu1  ;;  %v5577_v1 = vpop.f32.mrb[75].mxu0  ;;  %v1681_v56 = vmax.f32 %v7032_v3, 0.0 }
 0x199   : > { %v2369_v58 = vld [vmem:[#allocation2 + $0x1c] sm:$0x3f]  ;;  %2356 = vst [vmem:[#allocation4] sm:$0x3f] %v2355_v57  ;;  %2331 = vst [vmem:[#allocation2 + $0x30] sm:$0xff] %v2303_v48  ;;  %v2046_v62 = vadd.f32 %v7120_v27, %v5575_v51  ;;  %v5578_v4 = vadd.f32 %v5577_v1, %v5576_v53  ;;  %v5677_v7 = vpop.f32.mrb[75].mxu1  ;;  %v2304_v9 = vmax.f32 %v1678_v61, %v2276_v18 }
 0x19a   : > { %v2387_v59 = vld [vmem:[#allocation2 + $0x1d] sm:$0x3f]  ;;  %2370 = vst [vmem:[#allocation3 + $0x20] sm:$0x3f] %v2369_v58  ;;  %v2363_v8 = vld [vmem:[#allocation2 + $0x2a] sm:$0x3f]  ;;  %v5678_v15 = vadd.f32 %v5677_v7, %v5676_v63 }
 0x19b   : > { %2388 = vst [vmem:[#allocation4 + $0x40] sm:$0x3f] %v2387_v59  ;;  %v2377_v38 = vld [vmem:[#allocation2 + $0x2a] sm:$0x3f]  ;;  %v2191_v12 = vadd.f32 %v5675_v60, %v2046_v62  ;;  %v2373_v17 = vld [vmem:[#allocation2 + $0x23] sm:$0x3f]  ;;  %v2049_v29 = vadd.f32 %v7120_v27, %v5578_v4 }
 0x19c   : > { %2364 = vst [vmem:[#allocation4 + $0x10] sm:$0x3f] %v2363_v8  ;;  %2378 = vst [vmem:[#allocation3 + $0x30] sm:$0x3f] %v2377_v38  ;;  %v2359_v40 = vld [vmem:[#allocation2 + $0x23] sm:$0x3f] }
 0x19d   : > { %2374 = vst [vmem:[#allocation3 + $0x28] sm:$0x3f] %v2373_v17  ;;  %v2391_v19 = vld [vmem:[#allocation2 + $0x24] sm:$0x3f]  ;;  %2332 = vst [vmem:[#allocation2 + $0x38] sm:$0xff] %v2304_v9  ;;  %v2277_v21 = vmax.f32 %v2191_v12, 0.0  ;;  %v2194_v6 = vadd.f32 %v5678_v15, %v2049_v29 }
 0x19e   : > { %v5579_v22 = vpop.f32.mrb[76].mxu0  ;;  %2360 = vst [vmem:[#allocation4 + $0x8] sm:$0x3f] %v2359_v40  ;;  %2392 = vst [vmem:[#allocation4 + $0x48] sm:$0x3f] %v2391_v19  ;;  %v5679_v23 = vpop.f32.mrb[76].mxu1 }
 0x19f   : > { %v5580_v28 = vpop.f32.mrb[77].mxu0  ;;  %v2305_v31 = vmax.f32 %v1679_v20, %v2277_v21  ;;  %v5680_v33 = vpop.f32.mrb[77].mxu1  ;;  %v2278_v35 = vmax.f32 %v2194_v6, 0.0  ;;  %v1682_v8 = vmax.f32 %v7035_v5, 0.0 }
 0x1a0   : > { %v5581_v32 = vadd.f32 %v5580_v28, %v5579_v22  ;;  %v5582_v11 = vpop.f32.mrb[78].mxu0  ;;  %v5681_v37 = vadd.f32 %v5680_v33, %v5679_v23  ;;  %v5682_v39 = vpop.f32.mrb[78].mxu1  ;;  %v2381_v43 = vld [vmem:[#allocation2 + $0x31] sm:$0x3f] }
 0x1a1   : > { %v5583_v42 = vpop.f32.mrb[79].mxu0  ;;  %2333 = vst [vmem:[#allocation2 + $0x40] sm:$0xff] %v2305_v31  ;;  %v5683_v44 = vpop.f32.mrb[79].mxu1  ;;  %2382 = vst [vmem:[#allocation3 + $0x38] sm:$0x3f] %v2381_v43  ;;  %v2306_v48 = vmax.f32 %v1680_v34, %v2278_v35 }
 0x1a2   : > { %v2054_v45 = vadd.f32 %v7120_v27, %v5581_v32  ;;  %v5584_v54 = vadd.f32 %v5583_v42, %v5582_v11  ;;  %v2367_v46 = vld [vmem:[#allocation2 + $0x31] sm:$0x3f]  ;;  %v5684_v51 = vadd.f32 %v5683_v44, %v5682_v39 }
 0x1a3   : > { %2368 = vst [vmem:[#allocation4 + $0x18] sm:$0x3f] %v2367_v46  ;;  %2334 = vst [vmem:[#allocation2 + $0x48] sm:$0xff] %v2306_v48 }
 0x1a4   : > { %v2199_v53 = vadd.f32 %v5681_v37, %v2054_v45  ;;  %v2057_v49 = vadd.f32 %v7120_v27, %v5584_v54  ;;  %v2393_v57 = vld [vmem:[#allocation2 + $0x38] sm:$0x3f]  ;;  %v1683_v45 = vmax.f32 %v7040_v24, 0.0 }
 0x1a5   : > { %v2447_v58 = vld [vmem:[#allocation2 + $0x39] sm:$0x3f]  ;;  %v2395_v60 = vrot.slane %v2393_v57, 2  ;;  %v5585_v63 = vpop.f32.mrb[80].mxu0 }
 0x1a6   : > { %v2489_v59 = vld [vmem:[#allocation2 + $0x39] sm:$0x3f]  ;;  %v2449_v61 = vrot.slane %v2447_v58, 2  ;;  %v2279_v62 = vmax.f32 %v2199_v53, 0.0  ;;  %v2202_v1 = vadd.f32 %v5684_v51, %v2057_v49  ;;  %v5685_v4 = vpop.f32.mrb[80].mxu1  ;;  %v5586_v7 = vpop.f32.mrb[81].mxu0 }
 0x1a7   : > { %v2491_v18 = vrot.slane %v2489_v59, 2  ;;  %2397 = vst [vmem:[#allocation3 + $0x50] ss:$-76 sps:$4 sm:$0xcf] %v2395_v60   ;;  %v5587_v38 = vadd.f32 %v5586_v7, %v5585_v63  ;;  %v5686_v9 = vpop.f32.mrb[81].mxu1  ;;  %v5588_v12 = vpop.f32.mrb[82].mxu0 }
 0x1a8   : > { %2451 = vst [vmem:[#allocation4 + $0x70] ss:$-76 sps:$4 sm:$0xcf] %v2449_v61   ;;  %v2307_v3 = vmax.f32 %v1681_v56, %v2279_v62  ;;  %v2405_v15 = vld [vmem:[#allocation2 + $0x3f] sm:$0x3f]  ;;  %v5687_v40 = vadd.f32 %v5686_v9, %v5685_v4  ;;  %v2280_v22 = vmax.f32 %v2202_v1, 0.0 }
 0x1a9   : > { %2493 = vst [vmem:[#allocation3 + $0x90] ss:$-76 sps:$4 sm:$0xcf] %v2491_v18   ;;  %v2459_v17 = vld [vmem:[#allocation2 + $0x40] sm:$0x3f]  ;;  %v2407_v19 = vrot.slane %v2405_v15, 2  ;;  %v2062_v5 = vadd.f32 %v7120_v27, %v5587_v38 }
 0x1aa   : > { %v2501_v29 = vld [vmem:[#allocation2 + $0x40] sm:$0x3f]  ;;  %v2461_v20 = vrot.slane %v2459_v17, 2  ;;  %2335 = vst [vmem:[#allocation2 + $0x50] sm:$0xff] %v2307_v3  ;;  %v5688_v6 = vpop.f32.mrb[82].mxu1  ;;  %v5589_v23 = vpop.f32.mrb[83].mxu0  ;;  %v2308_v11 = vmax.f32 %v1682_v8, %v2280_v22 }
 0x1ab   : > { %v2503_v21 = vrot.slane %v2501_v29, 2  ;;  %v5590_v28 = vadd.f32 %v5589_v23, %v5588_v12  ;;  %v5689_v31 = vpop.f32.mrb[83].mxu1  ;;  %2409 = vst [vmem:[#allocation3 + $0x58] ss:$-76 sps:$4 sm:$0xcf] %v2407_v19   ;;  %v2207_v39 = vadd.f32 %v5687_v40, %v2062_v5  ;;  %v1684_v51 = vmax.f32 %v7043_v26, 0.0 }
 0x1ac   : > { %2463 = vst [vmem:[#allocation4 + $0x78] ss:$-76 sps:$4 sm:$0xcf] %v2461_v20   ;;  %v2417_v32 = vld [vmem:[#allocation2 + $0x46] sm:$0x3f]  ;;  %v5690_v34 = vadd.f32 %v5689_v31, %v5688_v6  ;;  %2336 = vst [vmem:[#allocation2 + $0x58] sm:$0xff] %v2308_v11 }
 0x1ad   : > { %2505 = vst [vmem:[#allocation3 + $0x98] ss:$-76 sps:$4 sm:$0xcf] %v2503_v21   ;;  %v2471_v33 = vld [vmem:[#allocation2 + $0x47] sm:$0x3f]  ;;  %v2419_v35 = vrot.slane %v2417_v32, 2  ;;  %v2065_v42 = vadd.f32 %v7120_v27, %v5590_v28 }
 0x1ae   : > { %v2473_v37 = vrot.slane %v2471_v33, 2  ;;  %v5591_v43 = vpop.f32.mrb[84].mxu0  ;;  %v2281_v54 = vmax.f32 %v2207_v39, 0.0  ;;  %v5691_v46 = vpop.f32.mrb[84].mxu1  ;;  %v1685_v26 = vmax.f32 %v7048_v47, 0.0  ;;  %v1686_v32 = vmax.f32 %v7051_v50, 0.0 }
 0x1af   : > { %2421 = vst [vmem:[#allocation3 + $0x60] ss:$-76 sps:$4 sm:$0xcf] %v2419_v35   ;;  %v2210_v44 = vadd.f32 %v5690_v34, %v2065_v42  ;;  %v5592_v48 = vpop.f32.mrb[85].mxu0  ;;  %v5692_v53 = vpop.f32.mrb[85].mxu1 }
 0x1b0   : > { %2475 = vst [vmem:[#allocation4 + $0x80] ss:$-76 sps:$4 sm:$0xcf] %v2473_v37   ;;  %v5593_v56 = vadd.f32 %v5592_v48, %v5591_v43  ;;  %v5594_v49 = vpop.f32.mrb[86].mxu0  ;;  %v2309_v59 = vmax.f32 %v1683_v45, %v2281_v54  ;;  %v5693_v61 = vadd.f32 %v5692_v53, %v5691_v46  ;;  %v5694_v18 = vpop.f32.mrb[86].mxu1 }
 0x1b1   : > { %v2429_v57 = vld [vmem:[#allocation2 + $0x4d] sm:$0x3f]  ;;  %v2282_v60 = vmax.f32 %v2210_v44, 0.0  ;;  %v5595_v1 = vpop.f32.mrb[87].mxu0  ;;  %v5695_v4 = vpop.f32.mrb[87].mxu1 }
 0x1b2   : > { %v2483_v58 = vld [vmem:[#allocation2 + $0x4e] sm:$0x3f]  ;;  %v2431_v62 = vrot.slane %v2429_v57, 2  ;;  %v2070_v24 = vadd.f32 %v7120_v27, %v5593_v56  ;;  %2337 = vst [vmem:[#allocation2 + $0x60] sm:$0xff] %v2309_v59  ;;  %v5596_v8 = vadd.f32 %v5595_v1, %v5594_v49  ;;  %v5696_v3 = vadd.f32 %v5695_v4, %v5694_v18 }
 0x1b3   : > { %v2485_v63 = vrot.slane %v2483_v58, 2  ;;  %v2310_v7 = vmax.f32 %v1684_v51, %v2282_v60  ;;  %v2399_v9 = vld [vmem:[#allocation2 + $0x54] sm:$0x3f] }
 0x1b4   : > { %2433 = vst [vmem:[#allocation3 + $0x68] ss:$-76 sps:$4 sm:$0xcf] %v2431_v62   ;;  %v2215_v38 = vadd.f32 %v5693_v61, %v2070_v24  ;;  %v2441_v12 = vld [vmem:[#allocation2 + $0x54] sm:$0x3f]  ;;  %v2073_v17 = vadd.f32 %v7120_v27, %v5596_v8  ;;  %v2401_v29 = vrot.slane %v2399_v9, 2 }
 0x1b5   : > { %2487 = vst [vmem:[#allocation4 + $0x88] ss:$-76 sps:$4 sm:$0xcf] %v2485_v63   ;;  %v2495_v15 = vld [vmem:[#allocation2 + $0x55] sm:$0x3f]  ;;  %2338 = vst [vmem:[#allocation2 + $0x68] sm:$0xff] %v2310_v7 }
 0x1b6   : > { %v2443_v40 = vrot.slane %v2441_v12, 2  ;;  %v2497_v19 = vrot.slane %v2495_v15, 2  ;;  %v2283_v20 = vmax.f32 %v2215_v38, 0.0  ;;  %v5597_v21 = vpop.f32.mrb[88].mxu0  ;;  %v2218_v22 = vadd.f32 %v5696_v3, %v2073_v17  ;;  %v5697_v6 = vpop.f32.mrb[88].mxu1 }
 0x1b7   : > { %v5598_v23 = vpop.f32.mrb[89].mxu0  ;;  %2403 = vst [vmem:[#allocation4 + $0x50] ss:$-76 sps:$4 sm:$0xcf] %v2401_v29   ;;  %v5698_v28 = vpop.f32.mrb[89].mxu1  ;;  %v1687_v62 = vmax.f32 %v7059_v10, 0.0 }
 0x1b8   : > { %2445 = vst [vmem:[#allocation3 + $0x70] ss:$-76 sps:$4 sm:$0xcf] %v2443_v40   ;;  %2499 = vst [vmem:[#allocation4 + $0x90] ss:$-76 sps:$4 sm:$0xcf] %v2497_v19   ;;  %v2311_v47 = vmax.f32 %v1685_v26, %v2283_v20  ;;  %v5599_v5 = vadd.f32 %v5598_v23, %v5597_v21  ;;  %v5699_v11 = vadd.f32 %v5698_v28, %v5697_v6 }
 0x1b9   : > { %v5600_v31 = vpop.f32.mrb[90].mxu0  ;;  %v2284_v33 = vmax.f32 %v2218_v22, 0.0  ;;  %v5700_v34 = vpop.f32.mrb[90].mxu1  ;;  %v2411_v37 = vld [vmem:[#allocation2 + $0x5b] sm:$0x3f]  ;;  %v1688_v3 = vmax.f32 %v7063_v14, 0.0 }
 0x1ba   : > { %v5601_v35 = vpop.f32.mrb[91].mxu0  ;;  %v2423_v39 = vld [vmem:[#allocation2 + $0x62] sm:$0x3f]  ;;  %v2453_v42 = vld [vmem:[#allocation2 + $0x5b] sm:$0x3f]  ;;  %2339 = vst [vmem:[#allocation2 + $0x70] sm:$0xff] %v2311_v47  ;;  %v2078_v43 = vadd.f32 %v7120_v27, %v5599_v5 }
 0x1bb   : > { %v5602_v45 = vadd.f32 %v5601_v35, %v5600_v31  ;;  %v2413_v54 = vrot.slane %v2411_v37, 2  ;;  %v2425_v44 = vrot.slane %v2423_v39, 2  ;;  %v2455_v46 = vrot.slane %v2453_v42, 2  ;;  %v2465_v48 = vld [vmem:[#allocation2 + $0x62] sm:$0x3f]  ;;  %v5701_v56 = vpop.f32.mrb[91].mxu1 }
 0x1bc   : > { %v2312_v51 = vmax.f32 %v1686_v32, %v2284_v33  ;;  %v2467_v53 = vrot.slane %v2465_v48, 2  ;;  %v2507_v49 = vld [vmem:[#allocation2 + $0x5c] sm:$0x3f]  ;;  %v2435_v50 = vld [vmem:[#allocation2 + $0x69] sm:$0x3f]  ;;  %v2223_v57 = vadd.f32 %v5699_v11, %v2078_v43  ;;  %v5702_v59 = vadd.f32 %v5701_v56, %v5700_v34 }
 0x1bd   : > { %v2081_v58 = vadd.f32 %v7120_v27, %v5602_v45  ;;  %2427 = vst [vmem:[#allocation4 + $0x60] ss:$-76 sps:$4 sm:$0xcf] %v2425_v44   ;;  %v2509_v60 = vrot.slane %v2507_v49, 2  ;;  %v2437_v61 = vrot.slane %v2435_v50, 2  ;;  %v5603_v4 = vpop.f32.mrb[92].mxu0 }
 0x1be   : > { %2415 = vst [vmem:[#allocation4 + $0x58] ss:$-76 sps:$4 sm:$0xcf] %v2413_v54   ;;  %2457 = vst [vmem:[#allocation3 + $0x78] ss:$-76 sps:$4 sm:$0xcf] %v2455_v46  }
 0x1bf   : > { %v2477_v18 = vld [vmem:[#allocation2 + $0x69] sm:$0x3f]  ;;  %2340 = vst [vmem:[#allocation2 + $0x78] sm:$0xff] %v2312_v51  ;;  %2469 = vst [vmem:[#allocation3 + $0x80] ss:$-76 sps:$4 sm:$0xcf] %v2467_v53   ;;  %v2226_v1 = vadd.f32 %v5702_v59, %v2081_v58 }
 0x1c0   : > { %v2479_v63 = vrot.slane %v2477_v18, 2  ;;  %v2285_v24 = vmax.f32 %v2223_v57, 0.0  ;;  %2511 = vst [vmem:[#allocation4 + $0x98] ss:$-76 sps:$4 sm:$0xcf] %v2509_v60   ;;  %v5703_v7 = vpop.f32.mrb[92].mxu1 }
 0x1c1   : > { %2439 = vst [vmem:[#allocation4 + $0x68] ss:$-76 sps:$4 sm:$0xcf] %v2437_v61   ;;  %v5604_v8 = vpop.f32.mrb[93].mxu0  ;;  %v2286_v38 = vmax.f32 %v2226_v1, 0.0  ;;  %v5704_v12 = vpop.f32.mrb[93].mxu1 }
 0x1c2   : > { %2481 = vst [vmem:[#allocation3 + $0x88] ss:$-76 sps:$4 sm:$0xcf] %v2479_v63   ;;  %v2313_v26 = vmax.f32 %v1687_v62, %v2285_v24  ;;  %v5605_v9 = vadd.f32 %v5604_v8, %v5603_v4  ;;  %v5606_v15 = vpop.f32.mrb[94].mxu0  ;;  %v2513_v17 = vld [vmem:[#allocation2 + $0x70] sm:$0x3f]  ;;  %v5705_v40 = vadd.f32 %v5704_v12, %v5703_v7 }
 0x1c3   : > { %v2567_v29 = vld [vmem:[#allocation2 + $0x71] sm:$0x3f]  ;;  %v2515_v19 = vrot.slane %v2513_v17, 4  ;;  %v2314_v22 = vmax.f32 %v1688_v3, %v2286_v38  ;;  %v5706_v6 = vpop.f32.mrb[94].mxu1  ;;  %v5607_v23 = vpop.f32.mrb[95].mxu0  ;;  %v1689_v43 = vmax.f32 %v7069_v36, 0.0 }
 0x1c4   : > { %v2609_v10 = vld [vmem:[#allocation2 + $0x71] sm:$0x3f]  ;;  %v2569_v20 = vrot.slane %v2567_v29, 4  ;;  %2341 = vst [vmem:[#allocation2 + $0x80] sm:$0xff] %v2313_v26  ;;  %v2086_v47 = vadd.f32 %v7120_v27, %v5605_v9  ;;  %v5608_v14 = vadd.f32 %v5607_v23, %v5606_v15  ;;  %v5707_v5 = vpop.f32.mrb[95].mxu1  ;;  %v1690_v46 = vmax.f32 %v7073_v41, 0.0 }
 0x1c5   : > { %v2611_v21 = vrot.slane %v2609_v10, 4  ;;  %2517 = vst [vmem:[#allocation3 + $0xa0] ss:$-76 sps:$4 sm:$0xf3] %v2515_v19   ;;  %2342 = vst [vmem:[#allocation2 + $0x88] sm:$0xff] %v2314_v22  ;;  %v5708_v33 = vadd.f32 %v5707_v5, %v5706_v6  ;;  %v5609_v42 = vpop.f32.mrb[96].mxu0 }
 0x1c6   : > { %2571 = vst [vmem:[#allocation4 + $0xc0] ss:$-76 sps:$4 sm:$0xf3] %v2569_v20   ;;  %v2525_v28 = vld [vmem:[#allocation2 + $0x77] sm:$0x3f]  ;;  %v2231_v37 = vadd.f32 %v5705_v40, %v2086_v47  ;;  %v2089_v39 = vadd.f32 %v7120_v27, %v5608_v14  ;;  %v5709_v54 = vpop.f32.mrb[96].mxu1 }
 0x1c7   : > { %2613 = vst [vmem:[#allocation3 + $0xe0] ss:$-76 sps:$4 sm:$0xf3] %v2611_v21   ;;  %v2579_v31 = vld [vmem:[#allocation2 + $0x78] sm:$0x3f]  ;;  %v2527_v11 = vrot.slane %v2525_v28, 4 }
 0x1c8   : > { %v2621_v32 = vld [vmem:[#allocation2 + $0x78] sm:$0x3f]  ;;  %v2581_v34 = vrot.slane %v2579_v31, 4  ;;  %v2287_v45 = vmax.f32 %v2231_v37, 0.0  ;;  %v5610_v44 = vpop.f32.mrb[97].mxu0  ;;  %v2234_v48 = vadd.f32 %v5708_v33, %v2089_v39  ;;  %v5710_v56 = vpop.f32.mrb[97].mxu1 }
 0x1c9   : > { %v2623_v35 = vrot.slane %v2621_v32, 4  ;;  %2529 = vst [vmem:[#allocation3 + $0xa8] ss:$-76 sps:$4 sm:$0xf3] %v2527_v11   ;;  %v5611_v51 = vadd.f32 %v5610_v44, %v5609_v42  ;;  %v5612_v53 = vpop.f32.mrb[98].mxu0  ;;  %v5711_v58 = vadd.f32 %v5710_v56, %v5709_v54  ;;  %v5712_v59 = vpop.f32.mrb[98].mxu1 }
 0x1ca   : > { %2583 = vst [vmem:[#allocation4 + $0xc8] ss:$-76 sps:$4 sm:$0xf3] %v2581_v34   ;;  %v2315_v57 = vmax.f32 %v1689_v43, %v2287_v45  ;;  %v5613_v60 = vpop.f32.mrb[99].mxu0  ;;  %v2288_v18 = vmax.f32 %v2234_v48, 0.0  ;;  %v5713_v63 = vpop.f32.mrb[99].mxu1 }
 0x1cb   : > { %2625 = vst [vmem:[#allocation3 + $0xe8] ss:$-76 sps:$4 sm:$0xf3] %v2623_v35   ;;  %v2537_v49 = vld [vmem:[#allocation2 + $0x7e] sm:$0x3f]  ;;  %v2094_v62 = vadd.f32 %v7120_v27, %v5611_v51  ;;  %v5614_v41 = vadd.f32 %v5613_v60, %v5612_v53  ;;  %v5714_v4 = vadd.f32 %v5713_v63, %v5712_v59  ;;  %v1691_v12 = vmax.f32 %v7079_v0, 0.0 }
 0x1cc   : > { %v2591_v50 = vld [vmem:[#allocation2 + $0x7f] sm:$0x3f]  ;;  %v2539_v61 = vrot.slane %v2537_v49, 4  ;;  %v2549_v24 = vld [vmem:[#allocation2 + $0x85] sm:$0x3f]  ;;  %2343 = vst [vmem:[#allocation2 + $0x90] sm:$0xff] %v2315_v57  ;;  %v2316_v3 = vmax.f32 %v1690_v46, %v2288_v18 }
 0x1cd   : > { %v2593_v36 = vrot.slane %v2591_v50, 4  ;;  %v2603_v1 = vld [vmem:[#allocation2 + $0x86] sm:$0x3f]  ;;  %v2551_v7 = vrot.slane %v2549_v24, 4  ;;  %v2239_v26 = vadd.f32 %v5711_v58, %v2094_v62  ;;  %v2097_v38 = vadd.f32 %v7120_v27, %v5614_v41  ;;  %v2904_v9 = vld [vmem:[#allocation3 + $0x50] sm:$0xff]  ;;  %v5615_v17 = vpop.f32.mrb[100].mxu0 }
 0x1ce   : > { %2541 = vst [vmem:[#allocation3 + $0xb0] ss:$-76 sps:$4 sm:$0xf3] %v2539_v61   ;;  %v2605_v8 = vrot.slane %v2603_v1, 4  ;;  %2344 = vst [vmem:[#allocation2 + $0x98] sm:$0xff] %v2316_v3  ;;  %v2895_v29 = vld [vmem:[#allocation3 + $0x8] sm:$0xff] }
 0x1cf   : > { %2595 = vst [vmem:[#allocation4 + $0xd0] ss:$-76 sps:$4 sm:$0xf3] %v2593_v36   ;;  %2553 = vst [vmem:[#allocation3 + $0xb8] ss:$-76 sps:$4 sm:$0xf3] %v2551_v7   ;;  %v2242_v40 = vadd.f32 %v5714_v4, %v2097_v38 }
 0x1d0   : > { %2607 = vst [vmem:[#allocation4 + $0xd8] ss:$-76 sps:$4 sm:$0xf3] %v2605_v8   ;;  %v2289_v15 = vmax.f32 %v2239_v26, 0.0  ;;  %v2905_v10 = vld [vmem:[#allocation3 + $0x58] sm:$0xff]  ;;  %v5715_v19 = vpop.f32.mrb[100].mxu1 }
 0x1d1   : > { %v5616_v20 = vpop.f32.mrb[101].mxu0  ;;  %v2925_v21 = vpack.c.bf16 %v2905_v10, %v2895_v29  ;;  %v2894_v22 = vld [vmem:[#allocation3] sm:$0xff]  ;;  %v5716_v14 = vpop.f32.mrb[101].mxu1  ;;  %v7153_v28 = vld [vmem:[%s6964_s21 + $0x148] sm:$0xff]   ;;  %v1692_v31 = vmax.f32 %v7082_v2, 0.0  ;;  %v2290_v32 = vmax.f32 %v2242_v40, 0.0 }
 0x1d2   : > { %v7150_v6 = vld [vmem:[%s6964_s21 + $0x100] sm:$0xff]   ;;  %v2317_v23 = vmax.f32 %v1691_v12, %v2289_v15  ;;  %v5617_v47 = vadd.f32 %v5616_v20, %v5615_v17  ;;  %v5618_v5 = vpop.f32.mrb[102].mxu0  ;;  %v2924_v0 = vpack.c.bf16 %v2904_v9, %v2894_v22  ;;  %v5717_v33 = vadd.f32 %v5716_v14, %v5715_v19  ;;  %v5718_v11 = vpop.f32.mrb[102].mxu1  ;;  %v7159_v48 = vld [vmem:[%s6964_s21 + $0x108] sm:$0xff]   ;;  %v7165_v57 = vld [vmem:[%s6964_s21 + $0x150] sm:$0xff]  }
 0x1d3   : > { %3512 = vmatprep.mubr.bf16.mxu0 %v2925_v21  ;;  %v5619_v34 = vpop.f32.mrb[103].mxu0  ;;  %v2519_v35 = vld [vmem:[#allocation2 + $0x8c] sm:$0x3f]  ;;  %v2318_v46 = vmax.f32 %v1692_v31, %v2290_v32  ;;  %v5719_v2 = vpop.f32.mrb[103].mxu1  ;;  %v1693_v51 = vmax.f32 %v7086_v25, 0.0  ;;  %v2897_v61 = vld [vmem:[#allocation3 + $0x18] sm:$0xff] }
 0x1d4   : > { %v2561_v37 = vld [vmem:[#allocation2 + $0x8c] sm:$0x3f]  ;;  %2345 = vst [vmem:[#allocation2 + $0xa0] sm:$0xff] %v2317_v23  ;;  %v2102_v42 = vadd.f32 %v7120_v27, %v5617_v47  ;;  %v5620_v43 = vadd.f32 %v5619_v34, %v5618_v5  ;;  %3513 = vmatmul.mubr.bf16.vlgmr.msra.gmra.mrb[112].mxu0 %v2924_v0  ;;  %v2521_v45 = vrot.slane %v2519_v35, 4  ;;  %v5720_v49 = vadd.f32 %v5719_v2, %v5718_v11  ;;  %v7171_v1 = vld [vmem:[%s6964_s21 + $0x180] sm:$0xff]   ;;  %v7174_v41 = vld [vmem:[%s6964_s21 + $0x158] sm:$0xff]  }
 0x1d5   : > { %v2615_v39 = vld [vmem:[#allocation2 + $0x8d] sm:$0x3f]  ;;  %v2563_v54 = vrot.slane %v2561_v37, 4  ;;  %5790 = vmatpush3.bf16.msra.mxu0 %v7150_v6  ;;  %v2906_v50 = vld [vmem:[#allocation3 + $0x60] sm:$0xff]  ;;  %v2531_v58 = vld [vmem:[#allocation2 + $0x93] sm:$0x3f] }
 0x1d6   : > { %v2617_v44 = vrot.slane %v2615_v39, 4  ;;  %v2247_v56 = vadd.f32 %v5717_v33, %v2102_v42  ;;  %v2105_v53 = vadd.f32 %v7120_v27, %v5620_v43  ;;  %5791 = vmatprep.subr.bf16.mxu0 %v7153_v28  ;;  %2523 = vst [vmem:[#allocation4 + $0xa0] ss:$-76 sps:$4 sm:$0xf3] %v2521_v45   ;;  %v2543_v59 = vld [vmem:[#allocation2 + $0x9a] sm:$0x3f] }
 0x1d7   : > { %2565 = vst [vmem:[#allocation3 + $0xc0] ss:$-76 sps:$4 sm:$0xf3] %v2563_v54   ;;  %v2573_v60 = vld [vmem:[#allocation2 + $0x93] sm:$0x3f]  ;;  %2346 = vst [vmem:[#allocation2 + $0xa8] sm:$0xff] %v2318_v46 }
 0x1d8   : > { %2619 = vst [vmem:[#allocation4 + $0xe0] ss:$-76 sps:$4 sm:$0xf3] %v2617_v44   ;;  %v7168_v25 = vld [vmem:[%s6964_s21 + $0x110] sm:$0xff]   ;;  %v2533_v36 = vrot.slane %v2531_v58, 4  ;;  %v2545_v18 = vrot.slane %v2543_v59, 4  ;;  %v2250_v8 = vadd.f32 %v5720_v49, %v2105_v53 }
 0x1d9   : > { %v2575_v62 = vrot.slane %v2573_v60, 4  ;;  %v2585_v63 = vld [vmem:[#allocation2 + $0x9a] sm:$0x3f]  ;;  %v2291_v24 = vmax.f32 %v2247_v56, 0.0  ;;  %v2627_v7 = vld [vmem:[#allocation2 + $0x94] sm:$0x3f]  ;;  %5792 = vmatpush3.bf16.msra.mxu0 %v7159_v48 }
 0x1da   : > { %v2587_v4 = vrot.slane %v2585_v63, 4  ;;  %v5621_v3 = vpop.f32.mrb[104].mxu0  ;;  %v5721_v26 = vpop.f32.mrb[104].mxu1  ;;  %v2907_v38 = vld [vmem:[#allocation3 + $0x68] sm:$0xff]  ;;  %v1694_v9 = vmax.f32 %v7089_v30, 0.0  ;;  %v2629_v12 = vrot.slane %v2627_v7, 4  ;;  %5793 = vmatprep.subr.bf16.mxu0 %v7165_v57 }
 0x1db   : > { %2547 = vst [vmem:[#allocation4 + $0xb0] ss:$-76 sps:$4 sm:$0xf3] %v2545_v18   ;;  %2535 = vst [vmem:[#allocation4 + $0xa8] ss:$-76 sps:$4 sm:$0xf3] %v2533_v36   ;;  %v2319_v15 = vmax.f32 %v1693_v51, %v2291_v24  ;;  %v2927_v10 = vpack.c.bf16 %v2907_v38, %v2897_v61 }
 0x1dc   : > { %2577 = vst [vmem:[#allocation3 + $0xc8] ss:$-76 sps:$4 sm:$0xf3] %v2575_v62   ;;  %v5622_v17 = vpop.f32.mrb[105].mxu0  ;;  %v5722_v29 = vpop.f32.mrb[105].mxu1  ;;  %v2896_v40 = vld [vmem:[#allocation3 + $0x10] sm:$0xff] }
 0x1dd   : > { %v7180_v19 = vld [vmem:[%s6964_s21 + $0x1c8] sm:$0xff]   ;;  %2589 = vst [vmem:[#allocation3 + $0xd0] ss:$-76 sps:$4 sm:$0xf3] %v2587_v4   ;;  %v2555_v20 = vld [vmem:[#allocation2 + $0xa1] sm:$0x3f]  ;;  %v5623_v23 = vadd.f32 %v5622_v17, %v5621_v3  ;;  %v5723_v47 = vadd.f32 %v5722_v29, %v5721_v26  ;;  %v2926_v14 = vpack.c.bf16 %v2906_v50, %v2896_v40  ;;  %3560 = vmatprep.mubr.bf16.mxu1 %v2927_v10 }
 0x1de   : > { %v2597_v21 = vld [vmem:[#allocation2 + $0xa1] sm:$0x3f]  ;;  %v2292_v22 = vmax.f32 %v2250_v8, 0.0  ;;  %v5624_v30 = vpop.f32.mrb[106].mxu0  ;;  %v2557_v5 = vrot.slane %v2555_v20, 4  ;;  %2347 = vst [vmem:[#allocation2 + $0xb0] sm:$0xff] %v2319_v15  ;;  %5794 = vmatpush3.bf16.msra.mxu0 %v7168_v25 }
 0x1df   : > { %2631 = vst [vmem:[#allocation4 + $0xe8] ss:$-76 sps:$4 sm:$0xf3] %v2629_v12   ;;  %v2599_v0 = vrot.slane %v2597_v21, 4  ;;  %v5724_v31 = vpop.f32.mrb[106].mxu1  ;;  %v5625_v32 = vpop.f32.mrb[107].mxu0  ;;  %v2110_v11 = vadd.f32 %v7120_v27, %v5623_v23  ;;  %3561 = vmatmul.mubr.bf16.vlgmr.msra.gmra.mrb[112].mxu1 %v2926_v14  ;;  %5795 = vmatprep.subr.bf16.mxu0 %v7174_v41 }
 0x1e0   : > { %v2320_v33 = vmax.f32 %v1694_v9, %v2292_v22  ;;  %v5626_v34 = vadd.f32 %v5625_v32, %v5624_v30  ;;  %v5725_v35 = vpop.f32.mrb[107].mxu1  ;;  %v7185_v37 = vld [vmem:[%s6964_s21 + $0x118] sm:$0xff]   ;;  %v7188_v39 = vld [vmem:[%s6964_s21 + $0x188] sm:$0xff]   ;;  %2559 = vst [vmem:[#allocation4 + $0xb8] ss:$-76 sps:$4 sm:$0xf3] %v2557_v5   ;;  %5818 = vmatpush3.bf16.msra.mxu1 %v7171_v1 }
 0x1e1   : > { %2601 = vst [vmem:[#allocation3 + $0xd8] ss:$-76 sps:$4 sm:$0xf3] %v2599_v0   ;;  %v5726_v42 = vadd.f32 %v5725_v35, %v5724_v31  ;;  %v7193_v43 = vld [vmem:[%s6964_s21 + $0x160] sm:$0xff]   ;;  %v2633_v45 = vld [vmem:[#allocation2 + $0xa8] sm:$0x3f]  ;;  %v2255_v44 = vadd.f32 %v5723_v47, %v2110_v11  ;;  %5819 = vmatprep.subr.bf16.mxu1 %v7180_v19 }
 0x1e2   : > { %v2713_v54 = vld [vmem:[#allocation2 + $0xa9] sm:$0x3f]  ;;  %2348 = vst [vmem:[#allocation2 + $0xb8] sm:$0xff] %v2320_v33  ;;  %v2113_v46 = vadd.f32 %v7120_v27, %v5626_v34  ;;  %v7198_v2 = vld [vmem:[%s6964_s21 + $0x1d0] sm:$0xff]   ;;  %v2635_v51 = vrot.slane %v2633_v45, 6  ;;  %v5627_v53 = vpop.f32.mrb[108].mxu0  ;;  %5796 = vmatpush3.bf16.msra.mxu0 %v7185_v37 }
 0x1e3   : > { %v2678_v56 = vld [vmem:[#allocation2 + $0xa9] sm:$0x3f]  ;;  %v2715_v49 = vrot.slane %v2713_v54, 6  ;;  %v1695_v58 = vmax.f32 %v7092_v52, 0.0  ;;  %v2293_v59 = vmax.f32 %v2255_v44, 0.0  ;;  %v5628_v61 = vpop.f32.mrb[109].mxu0  ;;  %5797 = vmatprep.subr.bf16.mxu0 %v7193_v43 }
 0x1e4   : > { %v2680_v50 = vrot.slane %v2678_v56, 6  ;;  %v2258_v60 = vadd.f32 %v5726_v42, %v2113_v46  ;;  %v5727_v36 = vpop.f32.mrb[108].mxu1  ;;  %v7203_v18 = vld [vmem:[%s6964_s21 + $0x120] sm:$0xff]   ;;  %2637 = vst [vmem:[#allocation3 + $0xa0] sm:$0xfc] %v2635_v51  ;;  %v5629_v62 = vadd.f32 %v5628_v61, %v5627_v53  ;;  %v5630_v63 = vpop.f32.mrb[110].mxu0  ;;  %5820 = vmatpush3.bf16.msra.mxu1 %v7188_v39 }
 0x1e5   : > { %v5728_v24 = vpop.f32.mrb[109].mxu1  ;;  %v7208_v4 = vld [vmem:[%s6964_s21 + $0x190] sm:$0xff]   ;;  %v7211_v7 = vld [vmem:[%s6964_s21 + $0x168] sm:$0xff]   ;;  %v7214_v52 = vld [vmem:[%s6964_s21 + $0x1d8] sm:$0xff]   ;;  %2717 = vst [vmem:[#allocation3 + $0xe0] sm:$0xfc] %v2715_v49  ;;  %v2321_v3 = vmax.f32 %v1695_v58, %v2293_v59  ;;  %5821 = vmatprep.subr.bf16.mxu1 %v7198_v2 }
 0x1e6   : > { %2682 = vst [vmem:[#allocation4 + $0xc0] sm:$0xfc] %v2680_v50  ;;  %v1696_v8 = vmax.f32 %v7095_v55, 0.0  ;;  %v2294_v26 = vmax.f32 %v2258_v60, 0.0  ;;  %v5631_v38 = vpop.f32.mrb[111].mxu0  ;;  %v5729_v9 = vadd.f32 %v5728_v24, %v5727_v36  ;;  %v5730_v12 = vpop.f32.mrb[110].mxu1  ;;  %v2118_v17 = vadd.f32 %v7120_v27, %v5629_v62  ;;  %5798 = vmatpush3.bf16.msra.mxu0 %v7203_v18 }
 0x1e7   : > { %v2643_v15 = vld [vmem:[#allocation2 + $0xaf] sm:$0x3f]  ;;  %v5632_v29 = vadd.f32 %v5631_v38, %v5630_v63  ;;  %v5731_v10 = vpop.f32.mrb[111].mxu1  ;;  %2349 = vst [vmem:[#allocation2 + $0xc0] sm:$0xff] %v2321_v3  ;;  %v7224_v47 = vld [vmem:[%s6964_s21 + $0x198] sm:$0xff]   ;;  %5799 = vmatprep.subr.bf16.mxu0 %v7211_v7  ;;  %v7234_v11 = vld [vmem:[%s6964_s21 + $0x1e0] sm:$0xff]  }
 0x1e8   : > { %v2645_v40 = vrot.slane %v2643_v15, 6  ;;  %v2723_v20 = vld [vmem:[#allocation2 + $0xb0] sm:$0x3f]  ;;  %v2322_v55 = vmax.f32 %v1696_v8, %v2294_v26  ;;  %v5732_v22 = vadd.f32 %v5731_v10, %v5730_v12  ;;  %v7221_v23 = vld [vmem:[%s6964_s21 + $0x128] sm:$0xff]   ;;  %v2263_v0 = vadd.f32 %v5729_v9, %v2118_v17  ;;  %5822 = vmatpush3.bf16.msra.mxu1 %v7208_v4  ;;  %v7245_v56 = vld [vmem:[%s6964_s21 + $0x1a0] sm:$0xff]  }
 0x1e9   : > { %v2688_v21 = vld [vmem:[#allocation2 + $0xb0] sm:$0x3f]  ;;  %v2725_v30 = vrot.slane %v2723_v20, 6  ;;  %v2121_v5 = vadd.f32 %v7120_v27, %v5632_v29  ;;  %v2653_v32 = vld [vmem:[#allocation2 + $0xb6] sm:$0x3f]  ;;  %5823 = vmatprep.subr.bf16.mxu1 %v7214_v52  ;;  %v1697_v35 = vmax.f32 %v7098_v13, 0.0 }
 0x1ea   : > { %v2690_v14 = vrot.slane %v2688_v21, 6  ;;  %2647 = vst [vmem:[#allocation3 + $0xa8] sm:$0xfc] %v2645_v40  ;;  %v7230_v31 = vld [vmem:[%s6964_s21 + $0x170] sm:$0xff]   ;;  %2350 = vst [vmem:[#allocation2 + $0xc8] sm:$0xff] %v2322_v55  ;;  %v2655_v34 = vrot.slane %v2653_v32, 6  ;;  %5800 = vmatpush3.bf16.msra.mxu0 %v7221_v23 }
 0x1eb   : > { %v2698_v33 = vld [vmem:[#allocation2 + $0xb7] sm:$0x3f]  ;;  %2727 = vst [vmem:[#allocation3 + $0xe8] sm:$0xfc] %v2725_v30  ;;  %v2295_v42 = vmax.f32 %v2263_v0, 0.0  ;;  %v2266_v45 = vadd.f32 %v5732_v22, %v2121_v5  ;;  %v1698_v44 = vmax.f32 %v7101_v16, 0.0  ;;  %5801 = vmatprep.subr.bf16.mxu0 %v7230_v31 }
 0x1ec   : > { %2692 = vst [vmem:[#allocation4 + $0xc8] sm:$0xfc] %v2690_v14  ;;  %v2700_v27 = vrot.slane %v2698_v33, 6  ;;  %v7239_v54 = vld [vmem:[%s6964_s21 + $0x130] sm:$0xff]   ;;  %2657 = vst [vmem:[#allocation3 + $0xb0] sm:$0xfc] %v2655_v34  ;;  %5824 = vmatpush3.bf16.msra.mxu1 %v7224_v47 }
 0x1ed   : > { %v2323_v46 = vmax.f32 %v1697_v35, %v2295_v42  ;;  %v2296_v51 = vmax.f32 %v2266_v45, 0.0  ;;  %v7248_v13 = vld [vmem:[%s6964_s21 + $0x178] sm:$0xff]   ;;  %5825 = vmatprep.subr.bf16.mxu1 %v7234_v11  ;;  %v7252_v53 = vld [vmem:[%s6964_s21 + $0x1e8] sm:$0xff]   ;;  %v2914_v50 = vld [vmem:[#allocation3 + $0xa0] sm:$0xff] }
 0x1ee   : > { %2702 = vst [vmem:[#allocation4 + $0xd0] sm:$0xfc] %v2700_v27  ;;  %v2663_v16 = vld [vmem:[#allocation2 + $0xbd] sm:$0x3f]  ;;  %5802 = vmatpush3.bf16.msra.mxu0 %v7239_v54  ;;  %v7261_v24 = vld [vmem:[%s6964_s21 + $0x1a8] sm:$0xff]   ;;  %v2934_v26 = vpack.c.bf16 %v2914_v50, %v2914_v50  ;;  %v7268_v10 = vld [vmem:[%s6964_s21 + $0x1f0] sm:$0xff]  }
 0x1ef   : > { %2351 = vst [vmem:[#allocation2 + $0xd0] sm:$0xff] %v2323_v46  ;;  %v2324_v49 = vmax.f32 %v1698_v44, %v2296_v51  ;;  %v2708_v58 = vld [vmem:[#allocation2 + $0xbe] sm:$0x3f]  ;;  %v2665_v36 = vrot.slane %v2663_v16, 6  ;;  %5803 = vmatprep.subr.bf16.mxu0 %v7248_v13  ;;  %v2899_v38 = vld [vmem:[#allocation3 + $0x28] sm:$0xff]  ;;  %v7272_v20 = vld [vmem:[%s6964_s21 + $0x1b0] sm:$0xff]  }
 0x1f0   : > { %v2909_v60 = vld [vmem:[#allocation3 + $0x78] sm:$0xff]  ;;  %v2710_v62 = vrot.slane %v2708_v58, 6  ;;  %5826 = vmatpush3.bf16.msra.mxu1 %v7245_v56  ;;  %v7265_v9 = vld [vmem:[%s6964_s21 + $0x240] sm:$0xff]   ;;  %v2908_v5 = vld [vmem:[#allocation3 + $0x70] sm:$0xff] }
 0x1f1   : > { %v2915_v59 = vld [vmem:[#allocation3 + $0xa8] sm:$0xff]  ;;  %v7256_v61 = vld [vmem:[%s6964_s21 + $0x138] sm:$0xff]   ;;  %2352 = vst [vmem:[#allocation2 + $0xd8] sm:$0xff] %v2324_v49  ;;  %5827 = vmatprep.subr.bf16.mxu1 %v7252_v53  ;;  %2667 = vst [vmem:[#allocation3 + $0xb8] sm:$0xfc] %v2665_v36  ;;  %v2929_v29 = vpack.c.bf16 %v2909_v60, %v2899_v38 }
 0x1f2   : > { %v2935_v63 = vpack.c.bf16 %v2915_v59, %v2915_v59  ;;  %v2673_v8 = vld [vmem:[#allocation2 + $0xc4] sm:$0x3f]  ;;  %2712 = vst [vmem:[#allocation4 + $0xd8] sm:$0xfc] %v2710_v62  ;;  %5804 = vmatpush3.bf16.msra.mxu0 %v7256_v61  ;;  %v7275_v21 = vld [vmem:[%s6964_s21 + $0x1f8] sm:$0xff]   ;;  %v7297_v38 = vld [vmem:[%s6964_s21 + $0x250] sm:$0xff]  }
 0x1f3   : > { %v2638_v3 = vld [vmem:[#allocation2 + $0xc4] sm:$0x3f]  ;;  %v2675_v12 = vrot.slane %v2673_v8, 6  ;;  %5845 = vmatprep.subr.bf16.mxu0 %v7265_v9  ;;  %v2916_v35 = vld [vmem:[#allocation3 + $0xb0] sm:$0xff]  ;;  %v7289_v8 = vld [vmem:[%s6964_s21 + $0x1b8] sm:$0xff]  }
 0x1f4   : > { %v2640_v15 = vrot.slane %v2638_v3, 6  ;;  %v2718_v17 = vld [vmem:[#allocation2 + $0xc5] sm:$0x3f]  ;;  %3520 = vmatprep.mubr.bf16.mxu0 %v2935_v63  ;;  %5828 = vmatpush3.bf16.msra.mxu1 %v7261_v24  ;;  %v2936_v62 = vpack.c.bf16 %v2916_v35, %v2916_v35  ;;  %v2901_v63 = vld [vmem:[#allocation3 + $0x38] sm:$0xff] }
 0x1f5   : > { %v2720_v40 = vrot.slane %v2718_v17, 6  ;;  %3521 = vmatmul.mubr.bf16.gmra.mrb[116].mxu0 %v2934_v26  ;;  %2677 = vst [vmem:[#allocation3 + $0xc0] sm:$0xfc] %v2675_v12  ;;  %5829 = vmatprep.subr.bf16.mxu1 %v7268_v10  ;;  %v2898_v14 = vld [vmem:[#allocation3 + $0x20] sm:$0xff]  ;;  %v2911_v51 = vld [vmem:[#allocation3 + $0x88] sm:$0xff] }
 0x1f6   : > { %2642 = vst [vmem:[#allocation4 + $0xa0] sm:$0xfc] %v2640_v15  ;;  %3608 = vmatprep.mubr.bf16.mxu0 %v2929_v29  ;;  %v2683_v55 = vld [vmem:[#allocation2 + $0xcb] sm:$0x3f]  ;;  %v2693_v22 = vld [vmem:[#allocation2 + $0xd2] sm:$0x3f]  ;;  %v2928_v59 = vpack.c.bf16 %v2908_v5, %v2898_v14  ;;  %v2931_v3 = vpack.c.bf16 %v2911_v51, %v2901_v63 }
 0x1f7   : > { %2722 = vst [vmem:[#allocation4 + $0xe0] sm:$0xfc] %v2720_v40  ;;  %v2648_v30 = vld [vmem:[#allocation2 + $0xcb] sm:$0x3f]  ;;  %v7281_v0 = vld [vmem:[%s6964_s21 + $0x200] sm:$0xff]   ;;  %v2685_v32 = vrot.slane %v2683_v55, 6 }
 0x1f8   : > { %v2695_v33 = vrot.slane %v2693_v22, 6  ;;  %v2650_v34 = vrot.slane %v2648_v30, 6  ;;  %v2658_v27 = vld [vmem:[#allocation2 + $0xd2] sm:$0x3f]  ;;  %v2703_v42 = vld [vmem:[#allocation2 + $0xd9] sm:$0x3f]  ;;  %5830 = vmatpush3.bf16.msra.mxu1 %v7272_v20 }
 0x1f9   : > { %v2668_v45 = vld [vmem:[#allocation2 + $0xd9] sm:$0x3f]  ;;  %v2660_v44 = vrot.slane %v2658_v27, 6  ;;  %2687 = vst [vmem:[#allocation3 + $0xc8] sm:$0xfc] %v2685_v32  ;;  %v2705_v49 = vrot.slane %v2703_v42, 6  ;;  %5831 = vmatprep.subr.bf16.mxu1 %v7275_v21 }
 0x1fa   : > { %v2917_v46 = vld [vmem:[#allocation3 + $0xb8] sm:$0xff]  ;;  %2697 = vst [vmem:[#allocation3 + $0xd0] sm:$0xfc] %v2695_v33  ;;  %2652 = vst [vmem:[#allocation4 + $0xa8] sm:$0xfc] %v2650_v34  ;;  %v2670_v50 = vrot.slane %v2668_v45, 6 }
 0x1fb   : > { %v2728_v16 = vld [vmem:[#allocation2 + $0xcc] sm:$0x3f]  ;;  %v2937_v58 = vpack.c.bf16 %v2917_v46, %v2917_v46  ;;  %2662 = vst [vmem:[#allocation4 + $0xb0] sm:$0xfc] %v2660_v44  ;;  %2707 = vst [vmem:[#allocation3 + $0xd8] sm:$0xfc] %v2705_v49 }
 0x1fc   : > { %v7285_v60 = vld [vmem:[%s6964_s21 + $0x248] sm:$0xff]   ;;  %v2730_v36 = vrot.slane %v2728_v16, 6  ;;  %2672 = vst [vmem:[#allocation4 + $0xb8] sm:$0xfc] %v2670_v50  ;;  %5832 = vmatpush3.bf16.msra.mxu1 %v7289_v8  ;;  %v2918_v12 = vld [vmem:[#allocation3 + $0xc0] sm:$0xff]  ;;  %v7303_v55 = vld [vmem:[%s6964_s21 + $0x210] sm:$0xff]  }
 0x1fd   : > { %3568 = vmatprep.mubr.bf16.mxu1 %v2937_v58  ;;  %3609 = vmatmul.mubr.bf16.vlgmr.msra.gmra.mrb[120].mxu0 %v2928_v59  ;;  %v7293_v26 = vld [vmem:[%s6964_s21 + $0x208] sm:$0xff]   ;;  %v6542_v17 = vld [vmem:[%s6964_s21 + $0x40] sm:$0xff]   ;;  %v2938_v22 = vpack.c.bf16 %v2918_v12, %v2918_v12  ;;  %v2900_v30 = vld [vmem:[#allocation3 + $0x30] sm:$0xff] }
 0x1fe   : > { %2732 = vst [vmem:[#allocation4 + $0xe8] sm:$0xfc] %v2730_v36  ;;  %3569 = vmatmul.mubr.bf16.gmra.mrb[116].mxu1 %v2936_v62  ;;  %5846 = vmatpush3.bf16.msra.mxu0 %v7281_v0  ;;  %v2910_v29 = vld [vmem:[#allocation3 + $0x80] sm:$0xff]  ;;  %v2913_v5 = vld [vmem:[#allocation3 + $0x98] sm:$0xff]  ;;  %v2903_v27 = vld [vmem:[#allocation3 + $0x48] sm:$0xff] }
 0x1ff   : > { %3656 = vmatprep.mubr.bf16.mxu1 %v2931_v3  ;;  %5847 = vmatprep.subr.bf16.mxu0 %v7285_v60  ;;  %v2930_v32 = vpack.c.bf16 %v2910_v29, %v2900_v30  ;;  %v7307_v34 = vld [vmem:[%s6964_s21 + $0x258] sm:$0xff]   ;;  %v2933_v35 = vpack.c.bf16 %v2913_v5, %v2903_v27  ;;  %v6543_v45 = vld [vmem:[%s6964_s21] sm:$0xff]   ;;  %v6544_v46 = vld [vmem:[%s6964_s21 + $0x48] sm:$0xff]  }
 0x200   : > { %v2919_v15 = vld [vmem:[#allocation3 + $0xc8] sm:$0xff]  ;;  %5873 = vmatprep.subr.bf16.mxu1 %v6542_v17  ;;  %v7311_v42 = vld [vmem:[%s6964_s21 + $0x218] sm:$0xff]   ;;  %v7315_v44 = vld [vmem:[%s6964_s21 + $0x260] sm:$0xff]  }
 0x201   : > { %v2939_v40 = vpack.c.bf16 %v2919_v15, %v2919_v15  ;;  %v2920_v51 = vld [vmem:[#allocation3 + $0xd0] sm:$0xff]  ;;  %v7321_v49 = vld [vmem:[%s6964_s21 + $0x220] sm:$0xff]   ;;  %v2955_v50 = vld [vmem:[#allocation4 + $0x58] sm:$0xff] }
 0x202   : > { %5848 = vmatpush3.bf16.msra.mxu0 %v7293_v26  ;;  %v2921_v14 = vld [vmem:[#allocation3 + $0xd8] sm:$0xff]  ;;  %v6545_v16 = vld [vmem:[%s6964_s21 + $0x8] sm:$0xff]   ;;  %v6546_v58 = vld [vmem:[%s6964_s21 + $0x50] sm:$0xff]   ;;  %v2940_v59 = vpack.c.bf16 %v2920_v51, %v2920_v51 }
 0x203   : > { %5849 = vmatprep.subr.bf16.mxu0 %v7297_v38  ;;  %3616 = vmatprep.mubr.bf16.mxu0 %v2939_v40  ;;  %v2941_v33 = vpack.c.bf16 %v2921_v14, %v2921_v14  ;;  %v2945_v36 = vld [vmem:[#allocation4 + $0x8] sm:$0xff]  ;;  %v7327_v62 = vld [vmem:[%s6964_s21 + $0x268] sm:$0xff]   ;;  %v6547_v12 = vld [vmem:[%s6964_s21 + $0x10] sm:$0xff]  }
 0x204   : > { %v2975_v63 = vpack.c.bf16 %v2955_v50, %v2945_v36  ;;  %v7331_v3 = vld [vmem:[%s6964_s21 + $0x228] sm:$0xff]   ;;  %v7335_v15 = vld [vmem:[%s6964_s21 + $0x270] sm:$0xff]   ;;  %v6548_v17 = vld [vmem:[%s6964_s21 + $0x58] sm:$0xff]  }
 0x205   : > { %3617 = vmatmul.mubr.bf16.gmra.mrb[124].mxu0 %v2938_v22  ;;  %v7341_v29 = vld [vmem:[%s6964_s21 + $0x230] sm:$0xff]   ;;  %v6549_v40 = vld [vmem:[%s6964_s21 + $0x18] sm:$0xff]   ;;  %v6550_v30 = vld [vmem:[%s6964_s21 + $0x60] sm:$0xff]  }
 0x206   : > { %3657 = vmatmul.mubr.bf16.vlgmr.msra.gmra.mrb[120].mxu1 %v2930_v32  ;;  %5850 = vmatpush3.bf16.msra.mxu0 %v7303_v55  ;;  %v7346_v22 = vld [vmem:[%s6964_s21 + $0x278] sm:$0xff]   ;;  %v6551_v5 = vld [vmem:[%s6964_s21 + $0x20] sm:$0xff]   ;;  %v6552_v32 = vld [vmem:[%s6964_s21 + $0x68] sm:$0xff]  }
 0x207   : > { %5874 = vmatpush3.bf16.msra.mxu1 %v6543_v45  ;;  %3664 = vmatprep.mubr.bf16.mxu1 %v2941_v33  ;;  %v7351_v14 = vld [vmem:[%s6964_s21 + $0x238] sm:$0xff]   ;;  %v2912_v33 = vld [vmem:[#allocation3 + $0x90] sm:$0xff]  ;;  %v2923_v27 = vld [vmem:[#allocation3 + $0xe8] sm:$0xff] }
 0x208   : > { %3704 = vmatprep.mubr.bf16.mxu0 %v2933_v35  ;;  %5851 = vmatprep.subr.bf16.mxu0 %v7307_v34  ;;  %v2902_v35 = vld [vmem:[#allocation3 + $0x40] sm:$0xff]  ;;  %v6553_v45 = vld [vmem:[%s6964_s21 + $0x28] sm:$0xff]   ;;  %v6555_v50 = vld [vmem:[%s6964_s21 + $0x70] sm:$0xff]  }
 0x209   : > { %5875 = vmatprep.subr.bf16.mxu1 %v6544_v46  ;;  %v2932_v46 = vpack.c.bf16 %v2912_v33, %v2902_v35  ;;  %v6554_v51 = vld [vmem:[%s6964_s21 + $0xc0] sm:$0xff]   ;;  %v6558_v36 = vld [vmem:[%s6964_s21 + $0xc8] sm:$0xff]   ;;  %v6562_v35 = vld [vmem:[%s6964_s21 + $0xd0] sm:$0xff]  }
 0x20a   : > { %5852 = vmatpush3.bf16.msra.mxu0 %v7311_v42 }
 0x20b   : > { %5876 = vmatpush3.bf16.msra.mxu1 %v6545_v16  ;;  %5853 = vmatprep.subr.bf16.mxu0 %v7315_v44  ;;  %v2943_v16 = vpack.c.bf16 %v2923_v27, %v2923_v27  ;;  %v2944_v27 = vld [vmem:[#allocation4] sm:$0xff] }
 0x20c   : > { %5877 = vmatprep.subr.bf16.mxu1 %v6546_v58  ;;  %v6556_v58 = vld [vmem:[%s6964_s21 + $0x80] sm:$0xff]  }
 0x20e   : > { %3665 = vmatmul.mubr.bf16.gmra.mrb[124].mxu1 %v2940_v59  ;;  %5854 = vmatpush3.bf16.msra.mxu0 %v7321_v49  ;;  %v6557_v59 = vld [vmem:[%s6964_s21 + $0x30] sm:$0xff]  }
 0x20f   : > { %5878 = vmatpush3.bf16.msra.mxu1 %v6547_v12  ;;  %3755 = vmatprep.mubr.bf16.mxu1 %v2975_v63  ;;  %v6559_v63 = vld [vmem:[%s6964_s21 + $0x78] sm:$0xff]   ;;  %v2922_v12 = vld [vmem:[#allocation3 + $0xe0] sm:$0xff] }
 0x210   : > { %5855 = vmatprep.subr.bf16.mxu0 %v7327_v62  ;;  %5879 = vmatprep.subr.bf16.mxu1 %v6548_v17  ;;  %v2954_v17 = vld [vmem:[#allocation4 + $0x50] sm:$0xff]  ;;  %v2942_v33 = vpack.c.bf16 %v2922_v12, %v2922_v12  ;;  %v2959_v12 = vld [vmem:[#allocation4 + $0x78] sm:$0xff] }
 0x212   : > { %5856 = vmatpush3.bf16.msra.mxu0 %v7331_v3 }
 0x213   : > { %5880 = vmatpush3.bf16.msra.mxu1 %v6549_v40  ;;  %5857 = vmatprep.subr.bf16.mxu0 %v7335_v15  ;;  %v6560_v40 = vld [vmem:[%s6964_s21 + $0x88] sm:$0xff]  }
 0x214   : > { %5881 = vmatprep.subr.bf16.mxu1 %v6550_v30  ;;  %v2965_v30 = vld [vmem:[#allocation4 + $0xa8] sm:$0xff] }
 0x216   : > { %5858 = vmatpush3.bf16.msra.mxu0 %v7341_v29 }
 0x217   : > { %5882 = vmatpush3.bf16.msra.mxu1 %v6551_v5  ;;  %5859 = vmatprep.subr.bf16.mxu0 %v7346_v22  ;;  %v2957_v5 = vld [vmem:[#allocation4 + $0x68] sm:$0xff] }
 0x218   : > { %5883 = vmatprep.subr.bf16.mxu1 %v6552_v32  ;;  %v6561_v32 = vld [vmem:[%s6964_s21 + $0x38] sm:$0xff]  }
 0x21a   : > { %5860 = vmatpush3.bf16.msra.mxu0 %v7351_v14 }
 0x21b   : > { %5884 = vmatpush3.bf16.msra.mxu1 %v6553_v45  ;;  %5901 = vmatprep.subr.bf16.mxu0 %v6554_v51  ;;  %v2974_v45 = vpack.c.bf16 %v2954_v17, %v2944_v27  ;;  %v2947_v51 = vld [vmem:[#allocation4 + $0x18] sm:$0xff]  ;;  %v6567_v17 = vld [vmem:[%s6964_s21 + $0xe0] sm:$0xff]   ;;  %v2956_v27 = vld [vmem:[#allocation4 + $0x60] sm:$0xff] }
 0x21c   : > { %5885 = vmatprep.subr.bf16.mxu1 %v6555_v50  ;;  %v2985_v50 = vpack.c.bf16 %v2965_v30, %v2965_v30  ;;  %v2949_v30 = vld [vmem:[#allocation4 + $0x28] sm:$0xff] }
 0x21d   : > { %3705 = vmatmul.mubr.bf16.vlgmr.msra.gmra.mrb[128].mxu0 %v2932_v46  ;;  %v6563_v46 = vld [vmem:[%s6964_s21 + $0x140] sm:$0xff]  }
 0x21e   : > { %3712 = vmatprep.mubr.bf16.mxu0 %v2943_v16  ;;  %5902 = vmatpush3.bf16.msra.mxu0 %v6556_v58  ;;  %v2977_v16 = vpack.c.bf16 %v2957_v5, %v2947_v51  ;;  %v6564_v58 = vld [vmem:[%s6964_s21 + $0x90] sm:$0xff]   ;;  %v6569_v5 = vld [vmem:[%s6964_s21 + $0xe8] sm:$0xff]  }
 0x21f   : > { %5886 = vmatpush3.bf16.msra.mxu1 %v6557_v59  ;;  %5903 = vmatprep.subr.bf16.mxu0 %v6558_v36  ;;  %v6565_v59 = vld [vmem:[%s6964_s21 + $0xd8] sm:$0xff]   ;;  %v2964_v36 = vld [vmem:[#allocation4 + $0xa0] sm:$0xff] }
 0x220   : > { %5887 = vmatprep.subr.bf16.mxu1 %v6559_v63  ;;  %v6566_v63 = vld [vmem:[%s6964_s21 + $0x98] sm:$0xff]  }
 0x222   : > { %5904 = vmatpush3.bf16.msra.mxu0 %v6560_v40  ;;  %v2984_v40 = vpack.c.bf16 %v2964_v36, %v2964_v36 }
 0x223   : > { %5888 = vmatpush3.bf16.msra.mxu1 %v6561_v32  ;;  %5905 = vmatprep.subr.bf16.mxu0 %v6562_v35  ;;  %v6570_v32 = vld [vmem:[%s6964_s21 + $0xa8] sm:$0xff]   ;;  %v2946_v35 = vld [vmem:[#allocation4 + $0x10] sm:$0xff] }
 0x224   : > { %5929 = vmatprep.subr.bf16.mxu1 %v6563_v46  ;;  %v6575_v46 = vld [vmem:[%s6964_s21 + $0x1c0] sm:$0xff]  }
 0x225   : > { %3713 = vmatmul.mubr.bf16.gmra.mrb[132].mxu0 %v2942_v33  ;;  %v6573_v33 = vld [vmem:[%s6964_s21 + $0xf8] sm:$0xff]  }
 0x226   : > { %3756 = vmatmul.mubr.bf16.vlgmr.msra.gmra.mrb[128].mxu1 %v2974_v45  ;;  %5906 = vmatpush3.bf16.msra.mxu0 %v6564_v58  ;;  %v2976_v45 = vpack.c.bf16 %v2956_v27, %v2946_v35  ;;  %v6487_v35 = vld [vmem:[%s7438_s16 + $0x10] sm:$0xff]  }
 0x227   : > { %3763 = vmatprep.mubr.bf16.mxu1 %v2985_v50  ;;  %3803 = vmatprep.mubr.bf16.mxu0 %v2977_v16  ;;  %v2951_v50 = vld [vmem:[#allocation4 + $0x38] sm:$0xff] }
 0x228   : > { %5930 = vmatpush3.bf16.msra.mxu1 %v7150_v6  ;;  %5907 = vmatprep.subr.bf16.mxu0 %v6565_v59  ;;  %v2979_v6 = vpack.c.bf16 %v2959_v12, %v2949_v30  ;;  %v6478_v12 = vld [vmem:[%s7438_s16 + $0x40] sm:$0xff]  }
 0x229   : > { %5931 = vmatprep.subr.bf16.mxu1 %v7153_v28  ;;  %v6568_v28 = vld [vmem:[%s6964_s21 + $0xa0] sm:$0xff]  }
 0x22a   : > { %5908 = vmatpush3.bf16.msra.mxu0 %v6566_v63  ;;  %v6481_v30 = vld [vmem:[%s7438_s16 + $0x80] sm:$0xff]  }
 0x22b   : > { %5909 = vmatprep.subr.bf16.mxu0 %v6567_v17  ;;  %v6479_v17 = vld [vmem:[%s7438_s16] sm:$0xff]  }
 0x22c   : > { %5932 = vmatpush3.bf16.msra.mxu1 %v7159_v48  ;;  %v6571_v48 = vld [vmem:[%s6964_s21 + $0xf0] sm:$0xff]  }
 0x22d   : > { %5933 = vmatprep.subr.bf16.mxu1 %v7165_v57  ;;  %v6572_v57 = vld [vmem:[%s6964_s21 + $0xb0] sm:$0xff]  }
 0x22e   : > { %3764 = vmatmul.mubr.bf16.gmra.mrb[132].mxu1 %v2984_v40  ;;  %5910 = vmatpush3.bf16.msra.mxu0 %v6568_v28  ;;  %v6480_v40 = vld [vmem:[%s7438_s16 + $0xc0] sm:$0xff]   ;;  %v6483_v28 = vld [vmem:[%s7438_s16 + $0x8] sm:$0xff]  }
 0x22f   : > { %3851 = vmatprep.mubr.bf16.mxu1 %v2979_v6  ;;  %5911 = vmatprep.subr.bf16.mxu0 %v6569_v5  ;;  %v6482_v6 = vld [vmem:[%s7438_s16 + $0x48] sm:$0xff]  }
 0x230   : > { %5934 = vmatpush3.bf16.msra.mxu1 %v7168_v25  ;;  %v2967_v25 = vld [vmem:[#allocation4 + $0xb8] sm:$0xff] }
 0x231   : > { %5935 = vmatprep.subr.bf16.mxu1 %v7174_v41  ;;  %v6574_v41 = vld [vmem:[%s6964_s21 + $0xb8] sm:$0xff]  }
 0x232   : > { %5912 = vmatpush3.bf16.msra.mxu0 %v6570_v32  ;;  %v6484_v32 = vld [vmem:[%s7438_s16 + $0xc8] sm:$0xff]  }
 0x233   : > { %5913 = vmatprep.subr.bf16.mxu0 %v6571_v48 }
 0x234   : > { %5936 = vmatpush3.bf16.msra.mxu1 %v7185_v37  ;;  %v2987_v37 = vpack.c.bf16 %v2967_v25, %v2967_v25  ;;  %v6486_v25 = vld [vmem:[%s7438_s16 + $0x50] sm:$0xff]  }
 0x235   : > { %5937 = vmatprep.subr.bf16.mxu1 %v7193_v43  ;;  %v2966_v43 = vld [vmem:[#allocation4 + $0xb0] sm:$0xff] }
 0x236   : > { %5914 = vmatpush3.bf16.msra.mxu0 %v6572_v57  ;;  %v2986_v51 = vpack.c.bf16 %v2966_v43, %v2966_v43  ;;  %v6485_v57 = vld [vmem:[%s7438_s16 + $0x88] sm:$0xff]   ;;  %v6491_v43 = vld [vmem:[%s7438_s16 + $0x18] sm:$0xff]  }
 0x237   : > { %5915 = vmatprep.subr.bf16.mxu0 %v6573_v33 }
 0x238   : > { %5938 = vmatpush3.bf16.msra.mxu1 %v7203_v18  ;;  %v2961_v18 = vld [vmem:[#allocation4 + $0x88] sm:$0xff] }
 0x239   : > { %5939 = vmatprep.subr.bf16.mxu1 %v7211_v7  ;;  %v2958_v7 = vld [vmem:[#allocation4 + $0x70] sm:$0xff] }
 0x23a   : > { %5916 = vmatpush3.bf16.msra.mxu0 %v6574_v41 }
 0x23b   : > { %5957 = vmatprep.subr.bf16.mxu0 %v6575_v46  ;;  %v6489_v46 = vld [vmem:[%s7438_s16 + $0x90] sm:$0xff]  }
 0x23c   : > { %5940 = vmatpush3.bf16.msra.mxu1 %v7221_v23  ;;  %v2969_v23 = vld [vmem:[#allocation4 + $0xc8] sm:$0xff] }
 0x23d   : > { %3804 = vmatmul.mubr.bf16.vlgmr.msra.gmra.mrb[136].mxu0 %v2976_v45  ;;  %5941 = vmatprep.subr.bf16.mxu1 %v7230_v31  ;;  %v2948_v31 = vld [vmem:[#allocation4 + $0x20] sm:$0xff] }
 0x23e   : > { %3811 = vmatprep.mubr.bf16.mxu0 %v2987_v37  ;;  %5958 = vmatpush3.bf16.msra.mxu0 %v7171_v1  ;;  %v2981_v1 = vpack.c.bf16 %v2961_v18, %v2951_v50  ;;  %v6488_v45 = vld [vmem:[%s7438_s16 + $0xd0] sm:$0xff]   ;;  %v6490_v37 = vld [vmem:[%s7438_s16 + $0x58] sm:$0xff]  }
 0x23f   : > { %5959 = vmatprep.subr.bf16.mxu0 %v7180_v19  ;;  %v2978_v19 = vpack.c.bf16 %v2958_v7, %v2948_v31  ;;  %v6492_v7 = vld [vmem:[%s7438_s16 + $0xd8] sm:$0xff]  }
 0x240   : > { %5942 = vmatpush3.bf16.msra.mxu1 %v7239_v54  ;;  %v2989_v54 = vpack.c.bf16 %v2969_v23, %v2969_v23 }
 0x241   : > { %5943 = vmatprep.subr.bf16.mxu1 %v7248_v13 }
 0x242   : > { %5960 = vmatpush3.bf16.msra.mxu0 %v7188_v39  ;;  %v2968_v39 = vld [vmem:[#allocation4 + $0xc0] sm:$0xff] }
 0x243   : > { %5961 = vmatprep.subr.bf16.mxu0 %v7198_v2  ;;  %v2963_v2 = vld [vmem:[#allocation4 + $0x98] sm:$0xff]  ;;  %v2988_v13 = vpack.c.bf16 %v2968_v39, %v2968_v39 }
 0x244   : > { %5944 = vmatpush3.bf16.msra.mxu1 %v7256_v61 }
 0x245   : > { %3812 = vmatmul.mubr.bf16.gmra.mrb[140].mxu0 %v2986_v51  ;;  %5985 = vmatprep.subr.bf16.mxu1 %v7265_v9  ;;  %v2962_v9 = vld [vmem:[#allocation4 + $0x90] sm:$0xff] }
 0x246   : > { %5962 = vmatpush3.bf16.msra.mxu0 %v7208_v4  ;;  %3899 = vmatprep.mubr.bf16.mxu0 %v2981_v1  ;;  %v2953_v4 = vld [vmem:[#allocation4 + $0x48] sm:$0xff] }
 0x247   : > { %3852 = vmatmul.mubr.bf16.vlgmr.msra.gmra.mrb[136].mxu1 %v2978_v19  ;;  %5963 = vmatprep.subr.bf16.mxu0 %v7214_v52  ;;  %v2983_v52 = vpack.c.bf16 %v2963_v2, %v2953_v4  ;;  %v6493_v19 = vld [vmem:[%s7438_s16 + $0x98] sm:$0xff]  }
 0x248   : > { %3859 = vmatprep.mubr.bf16.mxu1 %v2989_v54  ;;  %5986 = vmatpush3.bf16.msra.mxu1 %v7281_v0  ;;  %v6494_v54 = vld [vmem:[%s7438_s16 + $0x60] sm:$0xff]  }
 0x249   : > { %5987 = vmatprep.subr.bf16.mxu1 %v7285_v60 }
 0x24a   : > { %5964 = vmatpush3.bf16.msra.mxu0 %v7224_v47  ;;  %v2960_v47 = vld [vmem:[#allocation4 + $0x80] sm:$0xff] }
 0x24b   : > { %5965 = vmatprep.subr.bf16.mxu0 %v7234_v11  ;;  %v2971_v11 = vld [vmem:[#allocation4 + $0xd8] sm:$0xff] }
 0x24c   : > { %5988 = vmatpush3.bf16.msra.mxu1 %v7293_v26  ;;  %v2991_v61 = vpack.c.bf16 %v2971_v11, %v2971_v11 }
 0x24d   : > { %5989 = vmatprep.subr.bf16.mxu1 %v7297_v38 }
 0x24e   : > { %5966 = vmatpush3.bf16.msra.mxu0 %v7245_v56  ;;  %v2950_v56 = vld [vmem:[#allocation4 + $0x30] sm:$0xff] }
 0x24f   : > { %3860 = vmatmul.mubr.bf16.gmra.mrb[140].mxu1 %v2988_v13  ;;  %5967 = vmatprep.subr.bf16.mxu0 %v7252_v53  ;;  %v2980_v53 = vpack.c.bf16 %v2960_v47, %v2950_v56  ;;  %v6495_v56 = vld [vmem:[%s7438_s16 + $0x20] sm:$0xff]  }
 0x250   : > { %5990 = vmatpush3.bf16.msra.mxu1 %v7303_v55  ;;  %3947 = vmatprep.mubr.bf16.mxu1 %v2983_v52 }
 0x251   : > { %5991 = vmatprep.subr.bf16.mxu1 %v7307_v34 }
 0x252   : > { %5968 = vmatpush3.bf16.msra.mxu0 %v7261_v24  ;;  %v2970_v24 = vld [vmem:[#allocation4 + $0xd0] sm:$0xff] }
 0x253   : > { %5969 = vmatprep.subr.bf16.mxu0 %v7268_v10  ;;  %v2990_v10 = vpack.c.bf16 %v2970_v24, %v2970_v24 }
 0x254   : > { %5992 = vmatpush3.bf16.msra.mxu1 %v7311_v42 }
 0x255   : > { %5993 = vmatprep.subr.bf16.mxu1 %v7315_v44 }
 0x256   : > { %5970 = vmatpush3.bf16.msra.mxu0 %v7272_v20  ;;  %v2973_v20 = vld [vmem:[#allocation4 + $0xe8] sm:$0xff] }
 0x257   : > { %5971 = vmatprep.subr.bf16.mxu0 %v7275_v21  ;;  %v2952_v21 = vld [vmem:[#allocation4 + $0x40] sm:$0xff]  ;;  %v2993_v60 = vpack.c.bf16 %v2973_v20, %v2973_v20 }
 0x258   : > { %5994 = vmatpush3.bf16.msra.mxu1 %v7321_v49  ;;  %v2982_v0 = vpack.c.bf16 %v2962_v9, %v2952_v21  ;;  %v6497_v9 = vld [vmem:[%s7438_s16 + $0xa0] sm:$0xff]   ;;  %v6499_v21 = vld [vmem:[%s7438_s16 + $0x28] sm:$0xff]  }
 0x259   : > { %5995 = vmatprep.subr.bf16.mxu1 %v7327_v62  ;;  %v7430_v62 = vld [vmem:[%s687_s27] ss:$0 sm:$0xff] }
 0x25a   : > { %5972 = vmatpush3.bf16.msra.mxu0 %v7289_v8  ;;  %v2972_v8 = vld [vmem:[#allocation4 + $0xe0] sm:$0xff] }
 0x25b   : > { %v2992_v26 = vpack.c.bf16 %v2972_v8, %v2972_v8  ;;  %6013 = vmatprep.subr.bf16.mxu0 %v6478_v12  ;;  %v6500_v8 = vld [vmem:[%s7438_s16 + $0xe8] sm:$0xff]  }
 0x25c   : > { %5996 = vmatpush3.bf16.msra.mxu1 %v7331_v3 }
 0x25d   : > { %3900 = vmatmul.mubr.bf16.vlgmr.msra.gmra.mrb[144].mxu0 %v2980_v53  ;;  %5997 = vmatprep.subr.bf16.mxu1 %v7335_v15 }
 0x25e   : > { %3907 = vmatprep.mubr.bf16.mxu0 %v2991_v61  ;;  %6014 = vmatpush3.bf16.msra.mxu0 %v6479_v17  ;;  %v6496_v61 = vld [vmem:[%s7438_s16 + $0xe0] sm:$0xff]   ;;  %v6507_v17 = vld [vmem:[%s7438_s16 + $0x38] sm:$0xff]  }
 0x25f   : > { %6015 = vmatprep.subr.bf16.mxu0 %v6482_v6 }
 0x260   : > { %5998 = vmatpush3.bf16.msra.mxu1 %v7341_v29 }
 0x261   : > { %5999 = vmatprep.subr.bf16.mxu1 %v7346_v22 }
 0x262   : > { %6016 = vmatpush3.bf16.msra.mxu0 %v6483_v28 }
 0x263   : > { %6017 = vmatprep.subr.bf16.mxu0 %v6486_v25 }
 0x264   : > { %6000 = vmatpush3.bf16.msra.mxu1 %v7351_v14 }
 0x265   : > { %3908 = vmatmul.mubr.bf16.gmra.mrb[148].mxu0 %v2990_v10  ;;  %6035 = vmatprep.subr.bf16.mxu1 %v6480_v40  ;;  %v6498_v10 = vld [vmem:[%s7438_s16 + $0x68] sm:$0xff]  }
 0x266   : > { %6018 = vmatpush3.bf16.msra.mxu0 %v6487_v35 }
 0x267   : > { %3948 = vmatmul.mubr.bf16.vlgmr.msra.gmra.mrb[144].mxu1 %v2982_v0  ;;  %6019 = vmatprep.subr.bf16.mxu0 %v6490_v37 }
 0x268   : > { %3955 = vmatprep.mubr.bf16.mxu1 %v2993_v60  ;;  %6036 = vmatpush3.bf16.msra.mxu1 %v6481_v30  ;;  %v6508_v30 = vld [vmem:[%s7438_s16 + $0xf8] sm:$0xff]  }
 0x269   : > { %6037 = vmatprep.subr.bf16.mxu1 %v6484_v32 }
 0x26a   : > { %6020 = vmatpush3.bf16.msra.mxu0 %v6491_v43 }
 0x26b   : > { %6021 = vmatprep.subr.bf16.mxu0 %v6494_v54 }
 0x26c   : > { %6038 = vmatpush3.bf16.msra.mxu1 %v6485_v57 }
 0x26d   : > { %6039 = vmatprep.subr.bf16.mxu1 %v6488_v45 }
 0x26e   : > { %6022 = vmatpush3.bf16.msra.mxu0 %v6495_v56 }
 0x26f   : > { %3956 = vmatmul.mubr.bf16.gmra.mrb[148].mxu1 %v2992_v26  ;;  %6023 = vmatprep.subr.bf16.mxu0 %v6498_v10  ;;  %v6501_v26 = vld [vmem:[%s7438_s16 + $0xa8] sm:$0xff]  }
 0x270   : > { %6040 = vmatpush3.bf16.msra.mxu1 %v6489_v46 }
 0x271   : > { %6041 = vmatprep.subr.bf16.mxu1 %v6492_v7 }
 0x272   : > { %6024 = vmatpush3.bf16.msra.mxu0 %v6499_v21 }
 0x274   : > { %6042 = vmatpush3.bf16.msra.mxu1 %v6493_v19 }
 0x275   : > { %6043 = vmatprep.subr.bf16.mxu1 %v6496_v61 }
 0x278   : > { %6044 = vmatpush3.bf16.msra.mxu1 %v6497_v9 }
 0x279   : > { %6045 = vmatprep.subr.bf16.mxu1 %v6500_v8 }
 0x27c   : > { %6046 = vmatpush3.bf16.msra.mxu1 %v6501_v26 }
 0x2a7   : > { %v5749_v38 = vpop.f32.mrb[112].mxu0 }
 0x2a8   : > { %v5750_v55 = vpop.f32.mrb[113].mxu0 }
 0x2a9   : > { %v5751_v34 = vadd.f32 %v5750_v55, %v5749_v38  ;;  %v5752_v42 = vpop.f32.mrb[114].mxu0 }
 0x2aa   : > { %v5753_v44 = vpop.f32.mrb[115].mxu0 }
 0x2ab   : > { %v5754_v49 = vadd.f32 %v5753_v44, %v5752_v42  ;;  %v3515_v29 = vadd.f32 %v5751_v34, %v7430_v62 }
 0x2ad   : > { %v3518_v58 = vadd.f32 %v5754_v49, %v7430_v62 }
 0x2b2   : > { %v5777_v3 = vpop.f32.mrb[112].mxu1 }
 0x2b3   : > { %v5778_v15 = vpop.f32.mrb[113].mxu1 }
 0x2b4   : > { %v5779_v22 = vadd.f32 %v5778_v15, %v5777_v3  ;;  %v5780_v14 = vpop.f32.mrb[114].mxu1 }
 0x2b5   : > { %v5781_v16 = vpop.f32.mrb[115].mxu1 }
 0x2b6   : > { %v3563_v59 = vadd.f32 %v5779_v22, %v3515_v29  ;;  %v5782_v36 = vadd.f32 %v5781_v16, %v5780_v14  ;;  %v6502_v29 = vld [vmem:[%s7438_s16 + $0x70] sm:$0xff]  }
 0x2b7   : > { %v6503_v16 = vld [vmem:[%s7438_s16 + $0x30] sm:$0xff]   ;;  %6025 = vmatprep.subr.bf16.mxu0 %v6502_v29 }
 0x2b8   : > { %v3566_v63 = vadd.f32 %v5782_v36, %v3518_v58  ;;  %v6504_v58 = vld [vmem:[%s7438_s16 + $0xf0] sm:$0xff]   ;;  %6026 = vmatpush3.bf16.msra.mxu0 %v6503_v16 }
 0x2b9   : > { %v6505_v36 = vld [vmem:[%s7438_s16 + $0xb0] sm:$0xff]   ;;  %6047 = vmatprep.subr.bf16.mxu1 %v6504_v58 }
 0x2ba   : > { %6048 = vmatpush3.bf16.msra.mxu1 %v6505_v36 }
 0x2bb   : > { %6049 = vmatprep.subr.bf16.mxu1 %v6508_v30 }
 0x2c8   : > { %v5755_v5 = vpop.f32.mrb[116].mxu0 }
 0x2c9   : > { %v5756_v48 = vpop.f32.mrb[117].mxu0 }
 0x2ca   : > { %v5757_v33 = vadd.f32 %v5756_v48, %v5755_v5  ;;  %v5758_v27 = vpop.f32.mrb[118].mxu0  ;;  %v6509_v5 = vld [vmem:[%s7438_s16 + $0xb8] sm:$0xff]   ;;  %v6512_v48 = vld [vmem:[%s7438_s16 + $0x140] sm:$0xff]  }
 0x2cb   : > { %v5759_v41 = vpop.f32.mrb[119].mxu0  ;;  %6050 = vmatpush3.bf16.msra.mxu1 %v6509_v5 }
 0x2cc   : > { %v3523_v39 = vadd.f32 %v5757_v33, %v7430_v62 }
 0x2d0   : > { %v5805_v18 = vpop.f32.mrb[120].mxu0 }
 0x2d1   : > { %v5783_v51 = vpop.f32.mrb[116].mxu1  ;;  %v5806_v23 = vpop.f32.mrb[121].mxu0 }
 0x2d2   : > { %v5784_v50 = vpop.f32.mrb[117].mxu1  ;;  %v5807_v31 = vadd.f32 %v5806_v23, %v5805_v18  ;;  %v5808_v1 = vpop.f32.mrb[122].mxu0 }
 0x2d3   : > { %v5785_v2 = vadd.f32 %v5784_v50, %v5783_v51  ;;  %v5786_v13 = vpop.f32.mrb[118].mxu1  ;;  %v5809_v4 = vpop.f32.mrb[123].mxu0 }
 0x2d4   : > { %v3611_v52 = vadd.f32 %v5807_v31, %v3563_v59  ;;  %v5787_v47 = vpop.f32.mrb[119].mxu1  ;;  %v5810_v11 = vadd.f32 %v5809_v4, %v5808_v1 }
 0x2d5   : > { %v3571_v53 = vadd.f32 %v5785_v2, %v3523_v39 }
 0x2d6   : > { %v3614_v24 = vadd.f32 %v5810_v11, %v3566_v63  ;;  %v6506_v63 = vld [vmem:[%s7438_s16 + $0x78] sm:$0xff]  }
 0x2d7   : > { %6027 = vmatprep.subr.bf16.mxu0 %v6506_v63 }
 0x2d8   : > { %v5811_v20 = vpop.f32.mrb[124].mxu0  ;;  %6028 = vmatpush3.bf16.msra.mxu0 %v6507_v17 }
 0x2d9   : > { %v5833_v0 = vpop.f32.mrb[120].mxu1  ;;  %v5812_v60 = vpop.f32.mrb[125].mxu0  ;;  %6057 = vmatprep.subr.bf16.mxu0 %v6512_v48 }
 0x2da   : > { %v5813_v38 = vadd.f32 %v5812_v60, %v5811_v20  ;;  %v5834_v55 = vpop.f32.mrb[121].mxu1  ;;  %v5814_v34 = vpop.f32.mrb[126].mxu0 }
 0x2db   : > { %v5835_v42 = vadd.f32 %v5834_v55, %v5833_v0  ;;  %v5836_v44 = vpop.f32.mrb[122].mxu1  ;;  %v5815_v49 = vpop.f32.mrb[127].mxu0 }
 0x2dc   : > { %v3619_v3 = vadd.f32 %v5813_v38, %v3571_v53  ;;  %v5837_v15 = vpop.f32.mrb[123].mxu1 }
 0x2dd   : > { %v3659_v22 = vadd.f32 %v5835_v42, %v3611_v52  ;;  %v5838_v14 = vadd.f32 %v5837_v15, %v5836_v44 }
 0x2df   : > { %v3662_v59 = vadd.f32 %v5838_v14, %v3614_v24 }
 0x2e1   : > { %v5839_v12 = vpop.f32.mrb[124].mxu1 }
 0x2e2   : > { %v5840_v40 = vpop.f32.mrb[125].mxu1 }
 0x2e3   : > { %v5841_v6 = vadd.f32 %v5840_v40, %v5839_v12  ;;  %v5842_v28 = vpop.f32.mrb[126].mxu1 }
 0x2e4   : > { %v5843_v32 = vpop.f32.mrb[127].mxu1 }
 0x2e5   : > { %v3667_v57 = vadd.f32 %v5841_v6, %v3619_v3 }
 0x2f0   : > { %v5861_v33 = vpop.f32.mrb[128].mxu0 }
 0x2f1   : > { %v5862_v27 = vpop.f32.mrb[129].mxu0 }
 0x2f2   : > { %v5863_v25 = vadd.f32 %v5862_v27, %v5861_v33  ;;  %v5864_v41 = vpop.f32.mrb[130].mxu0 }
 0x2f3   : > { %v5865_v35 = vpop.f32.mrb[131].mxu0 }
 0x2f4   : > { %v7474_v45 = vadd.f32 %v5863_v25, %v3659_v22  ;;  %v5866_v46 = vadd.f32 %v5865_v35, %v5864_v41 }
 0x2f6   : > { %v7476_v37 = vadd.f32 %v5866_v46, %v3662_v59 }
 0x2f8   : > { %v5867_v43 = vpop.f32.mrb[132].mxu0 }
 0x2f9   : > { %v5889_v18 = vpop.f32.mrb[128].mxu1  ;;  %v5868_v7 = vpop.f32.mrb[133].mxu0 }
 0x2fa   : > { %v5869_v51 = vadd.f32 %v5868_v7, %v5867_v43  ;;  %v5890_v23 = vpop.f32.mrb[129].mxu1  ;;  %v5870_v50 = vpop.f32.mrb[134].mxu0 }
 0x2fb   : > { %v5891_v31 = vadd.f32 %v5890_v23, %v5889_v18  ;;  %v5892_v1 = vpop.f32.mrb[130].mxu1  ;;  %v5871_v19 = vpop.f32.mrb[135].mxu0 }
 0x2fc   : > { %v7478_v54 = vadd.f32 %v5869_v51, %v3667_v57  ;;  %v5893_v39 = vpop.f32.mrb[131].mxu1 }
 0x2fd   : > { %v5894_v2 = vadd.f32 %v5893_v39, %v5892_v1  ;;  %v3758_v61 = vadd.f32 %v5891_v31, %v7430_v62  ;;  %v3720_v1 = vmax.f32 %v7474_v45, 0.0 }
 0x2ff   : > { %v3761_v20 = vadd.f32 %v5894_v2, %v7430_v62  ;;  %v3721_v2 = vmax.f32 %v7476_v37, 0.0 }
 0x301   : > { %v5895_v13 = vpop.f32.mrb[132].mxu1 }
 0x302   : > { %v5896_v4 = vpop.f32.mrb[133].mxu1 }
 0x303   : > { %v5897_v52 = vadd.f32 %v5896_v4, %v5895_v13  ;;  %v5898_v47 = vpop.f32.mrb[134].mxu1 }
 0x304   : > { %v5899_v11 = vpop.f32.mrb[135].mxu1 }
 0x305   : > { %v3766_v38 = vadd.f32 %v5897_v52, %v7430_v62 }
 0x310   : > { %v5917_v56 = vpop.f32.mrb[136].mxu0 }
 0x311   : > { %v5918_v53 = vpop.f32.mrb[137].mxu0 }
 0x312   : > { %v5919_v24 = vadd.f32 %v5918_v53, %v5917_v56  ;;  %v5920_v9 = vpop.f32.mrb[138].mxu0 }
 0x313   : > { %v5921_v10 = vpop.f32.mrb[139].mxu0 }
 0x314   : > { %v3806_v21 = vadd.f32 %v5919_v24, %v3758_v61  ;;  %v5922_v0 = vadd.f32 %v5921_v10, %v5920_v9  ;;  %v3722_v9 = vmax.f32 %v7478_v54, 0.0 }
 0x316   : > { %v3809_v60 = vadd.f32 %v5922_v0, %v3761_v20 }
 0x318   : > { %v5923_v8 = vpop.f32.mrb[140].mxu0 }
 0x319   : > { %v5924_v26 = vpop.f32.mrb[141].mxu0 }
 0x31a   : > { %v5945_v55 = vpop.f32.mrb[136].mxu1  ;;  %v5925_v34 = vadd.f32 %v5924_v26, %v5923_v8  ;;  %v5926_v42 = vpop.f32.mrb[142].mxu0 }
 0x31b   : > { %v5946_v44 = vpop.f32.mrb[137].mxu1  ;;  %v5927_v49 = vpop.f32.mrb[143].mxu0 }
 0x31c   : > { %v3814_v3 = vadd.f32 %v5925_v34, %v3766_v38  ;;  %v5947_v15 = vadd.f32 %v5946_v44, %v5945_v55  ;;  %v5948_v29 = vpop.f32.mrb[138].mxu1 }
 0x31d   : > { %v5949_v22 = vpop.f32.mrb[139].mxu1 }
 0x31e   : > { %v3854_v14 = vadd.f32 %v5947_v15, %v3806_v21  ;;  %v5950_v16 = vadd.f32 %v5949_v22, %v5948_v29 }
 0x320   : > { %v3857_v58 = vadd.f32 %v5950_v16, %v3809_v60 }
 0x322   : > { %v5951_v59 = vpop.f32.mrb[140].mxu1 }
 0x323   : > { %v5952_v36 = vpop.f32.mrb[141].mxu1 }
 0x324   : > { %v5953_v63 = vadd.f32 %v5952_v36, %v5951_v59  ;;  %v5954_v12 = vpop.f32.mrb[142].mxu1 }
 0x325   : > { %v5955_v17 = vpop.f32.mrb[143].mxu1 }
 0x326   : > { %v3862_v40 = vadd.f32 %v5953_v63, %v3814_v3 }
 0x330   : > { %v5973_v30 = vpop.f32.mrb[144].mxu0 }
 0x331   : > { %v5974_v62 = vpop.f32.mrb[145].mxu0 }
 0x332   : > { %v5975_v6 = vadd.f32 %v5974_v62, %v5973_v30  ;;  %v5976_v28 = vpop.f32.mrb[146].mxu0 }
 0x333   : > { %v5977_v5 = vpop.f32.mrb[147].mxu0 }
 0x334   : > { %v3902_v32 = vadd.f32 %v5975_v6, %v3854_v14  ;;  %v5978_v48 = vadd.f32 %v5977_v5, %v5976_v28 }
 0x336   : > { %v3905_v57 = vadd.f32 %v5978_v48, %v3857_v58 }
 0x338   : > { %v5979_v33 = vpop.f32.mrb[148].mxu0 }
 0x339   : > { %v5980_v27 = vpop.f32.mrb[149].mxu0 }
 0x33a   : > { %v6001_v25 = vpop.f32.mrb[144].mxu1  ;;  %v5981_v41 = vadd.f32 %v5980_v27, %v5979_v33  ;;  %v5982_v35 = vpop.f32.mrb[150].mxu0  ;;  %v6515_v33 = vld [vmem:[%s7438_s16 + $0x148] sm:$0xff]  }
 0x33b   : > { %v6002_v46 = vpop.f32.mrb[145].mxu1  ;;  %v5983_v43 = vpop.f32.mrb[151].mxu0  ;;  %v6518_v35 = vld [vmem:[%s7438_s16 + $0x110] sm:$0xff]  }
 0x33c   : > { %v3910_v18 = vadd.f32 %v5981_v41, %v3862_v40  ;;  %v6003_v7 = vadd.f32 %v6002_v46, %v6001_v25  ;;  %v6004_v51 = vpop.f32.mrb[146].mxu1  ;;  %v6516_v25 = vld [vmem:[%s7438_s16 + $0x108] sm:$0xff]   ;;  %v6517_v41 = vld [vmem:[%s7438_s16 + $0x150] sm:$0xff]   ;;  %v6519_v46 = vld [vmem:[%s7438_s16 + $0x158] sm:$0xff]  }
 0x33d   : > { %v6005_v23 = vpop.f32.mrb[147].mxu1  ;;  %v6520_v43 = vld [vmem:[%s7438_s16 + $0x118] sm:$0xff]  }
 0x33e   : > { %v3950_v50 = vadd.f32 %v6003_v7, %v3902_v32  ;;  %v6006_v31 = vadd.f32 %v6005_v23, %v6004_v51  ;;  %v6513_v32 = vld [vmem:[%s7438_s16 + $0x100] sm:$0xff]   ;;  %v6523_v51 = vld [vmem:[%s7438_s16 + $0x168] sm:$0xff]  }
 0x33f   : > { %v6522_v7 = vld [vmem:[%s7438_s16 + $0x120] sm:$0xff]   ;;  %v6524_v23 = vld [vmem:[%s7438_s16 + $0x128] sm:$0xff]  }
 0x340   : > { %v3963_v19 = vmax.f32 %v3950_v50, 0.0  ;;  %v3953_v39 = vadd.f32 %v6006_v31, %v3905_v57  ;;  %v6525_v50 = vld [vmem:[%s7438_s16 + $0x170] sm:$0xff]  }
 0x341   : > { %v6526_v31 = vld [vmem:[%s7438_s16 + $0x130] sm:$0xff]  }
 0x342   : > { %v3966_v13 = vmax.f32 %v3720_v1, %v3963_v19  ;;  %v3964_v4 = vmax.f32 %v3953_v39, 0.0  ;;  %v6007_v52 = vpop.f32.mrb[148].mxu1  ;;  %v6527_v1 = vld [vmem:[%s7438_s16 + $0x178] sm:$0xff]  }
 0x343   : > { %v6008_v47 = vpop.f32.mrb[149].mxu1  ;;  %v6528_v19 = vld [vmem:[%s7438_s16 + $0x138] sm:$0xff]  }
 0x344   : > { %3969 = vst [vmem:[#allocation5] sm:$0xff] %v3966_v13  ;;  %v3967_v11 = vmax.f32 %v3721_v2, %v3964_v4  ;;  %v6009_v56 = vadd.f32 %v6008_v47, %v6007_v52  ;;  %v6010_v53 = vpop.f32.mrb[150].mxu1  ;;  %v6529_v2 = vld [vmem:[%s706_s22] sm:$0xff]   ;;  %v6584_v13 = vmov 0.0   ;;  %v6530_v4 = vld [vmem:[%s706_s22 + $0x8] sm:$0xff]   ;;  %v6531_v52 = vld [vmem:[%s706_s22 + $0x10] sm:$0xff]  }
 0x345   : > { %v6011_v61 = vpop.f32.mrb[151].mxu1  ;;  %6105 = vmatprep.subr.bf16.mxu1 %v6584_v13  ;;  %v6532_v47 = vld [vmem:[%s706_s22 + $0x18] sm:$0xff]   ;;  %v6535_v53 = vld [vmem:[%s706_s22 + $0x30] sm:$0xff]  }
 0x346   : > { %3970 = vst [vmem:[#allocation5 + $0x8] sm:$0xff] %v3967_v11  ;;  %v3958_v24 = vadd.f32 %v6009_v56, %v3910_v18  ;;  %v6521_v18 = vld [vmem:[%s7438_s16 + $0x160] sm:$0xff]   ;;  %v6534_v56 = vld [vmem:[%s706_s22 + $0x28] sm:$0xff]   ;;  %v6536_v61 = vld [vmem:[%s706_s22 + $0x38] sm:$0xff]   ;;  %s701_s16 = scalar_lea.vmem %s7571_s9, %s7579_s19 }
 0x347   : > { %v6533_v11 = vld [vmem:[%s706_s22 + $0x20] sm:$0xff]   ;;  %s7523_s22 = scalar_lea.vmem %s7576_s14, %s5332_s17  ;;  %s5039_s17 = sshll.u32 %s7579_s19, 2 }
 0x348   : > { %v3965_v10 = vmax.f32 %v3958_v24, 0.0 }
 0x34a   : > { %v3968_v20 = vmax.f32 %v3722_v9, %v3965_v10  ;;  %v5266_v10 = vld [vmem:[%s695_s25] ss:$0 sm:$0xff]  ;;  %s709_s25 = scalar_lea.vmem %s7573_s11, %s7579_s19 }
 0x34b   : > { %v3972_v45 = vld [vmem:[#allocation5] sm:$0x1]  ;;  %v3974_v21 = vld [vmem:[#allocation5 + $0x1] sm:$0x1]  ;;  %v3976_v0 = vld [vmem:[#allocation5 + $0x2] sm:$0x1] }
 0x34c   : > { %v3978_v60 = vld [vmem:[#allocation5 + $0x3] sm:$0x1]  ;;  %v3980_v37 = vld [vmem:[#allocation5 + $0x4] sm:$0x1]  ;;  %v3982_v8 = vld [vmem:[#allocation5 + $0x5] sm:$0x1] }
 0x34d   : > { %3973 = vst [vmem:[#allocation6] sm:$0x1] %v3972_v45  ;;  %3975 = vst [vmem:[#allocation6 + $0x4] sm:$0x1] %v3974_v21  ;;  %v3984_v26 = vld [vmem:[#allocation5 + $0x6] sm:$0x1] }
 0x34e   : > { %3977 = vst [vmem:[#allocation6 + $0x8] sm:$0x1] %v3976_v0  ;;  %3971 = vst [vmem:[#allocation5 + $0x10] sm:$0xff] %v3968_v20  ;;  %v3986_v38 = vld [vmem:[#allocation5 + $0x7] sm:$0x1] }
 0x34f   : > { %3979 = vst [vmem:[#allocation6 + $0xc] sm:$0x1] %v3978_v60  ;;  %3981 = vst [vmem:[#allocation6 + $0x10] sm:$0x1] %v3980_v37  ;;  %v3988_v55 = vld [vmem:[#allocation5 + $0x8] sm:$0x1] }
 0x350   : > { %3983 = vst [vmem:[#allocation6 + $0x14] sm:$0x1] %v3982_v8  ;;  %3985 = vst [vmem:[#allocation6 + $0x1] sm:$0x1] %v3984_v26  ;;  %v3990_v54 = vld [vmem:[#allocation5 + $0x9] sm:$0x1] }
 0x351   : > { %3987 = vst [vmem:[#allocation6 + $0x5] sm:$0x1] %v3986_v38  ;;  %v3992_v34 = vld [vmem:[#allocation5 + $0xa] sm:$0x1]  ;;  %v3994_v42 = vld [vmem:[#allocation5 + $0xb] sm:$0x1] }
 0x352   : > { %3989 = vst [vmem:[#allocation6 + $0x9] sm:$0x1] %v3988_v55  ;;  %v3996_v44 = vld [vmem:[#allocation5 + $0xc] sm:$0x1]  ;;  %v3998_v49 = vld [vmem:[#allocation5 + $0xd] sm:$0x1] }
 0x353   : > { %v4000_v3 = vld [vmem:[#allocation5 + $0xe] sm:$0x1]  ;;  %3991 = vst [vmem:[#allocation6 + $0xd] sm:$0x1] %v3990_v54  ;;  %3993 = vst [vmem:[#allocation6 + $0x11] sm:$0x1] %v3992_v34 }
 0x354   : > { %3995 = vst [vmem:[#allocation6 + $0x15] sm:$0x1] %v3994_v42  ;;  %v4002_v15 = vld [vmem:[#allocation5 + $0xf] sm:$0x1]  ;;  %3997 = vst [vmem:[#allocation6 + $0x2] sm:$0x1] %v3996_v44 }
 0x355   : > { %3999 = vst [vmem:[#allocation6 + $0x6] sm:$0x1] %v3998_v49  ;;  %4001 = vst [vmem:[#allocation6 + $0xa] sm:$0x1] %v4000_v3  ;;  %v4004_v29 = vld [vmem:[#allocation5 + $0x10] sm:$0x1] }
 0x356   : > { %4003 = vst [vmem:[#allocation6 + $0xe] sm:$0x1] %v4002_v15  ;;  %v4006_v22 = vld [vmem:[#allocation5 + $0x11] sm:$0x1]  ;;  %v4008_v14 = vld [vmem:[#allocation5 + $0x12] sm:$0x1] }
 0x357   : > { %v4010_v16 = vld [vmem:[#allocation5 + $0x13] sm:$0x1]  ;;  %v4012_v58 = vld [vmem:[#allocation5 + $0x14] sm:$0x1]  ;;  %v4014_v59 = vld [vmem:[#allocation5 + $0x15] sm:$0x1] }
 0x358   : > { %4005 = vst [vmem:[#allocation6 + $0x12] sm:$0x1] %v4004_v29  ;;  %4007 = vst [vmem:[#allocation6 + $0x16] sm:$0x1] %v4006_v22  ;;  %v4016_v36 = vld [vmem:[#allocation5 + $0x16] sm:$0x1] }
 0x359   : > { %4009 = vst [vmem:[#allocation6 + $0x3] sm:$0x1] %v4008_v14  ;;  %v4018_v63 = vld [vmem:[#allocation5 + $0x17] sm:$0x1]  ;;  %4011 = vst [vmem:[#allocation6 + $0x7] sm:$0x1] %v4010_v16 }
 0x35a   : > { %4013 = vst [vmem:[#allocation6 + $0xb] sm:$0x1] %v4012_v58  ;;  %4015 = vst [vmem:[#allocation6 + $0xf] sm:$0x1] %v4014_v59 }
 0x35b   : > { %4017 = vst [vmem:[#allocation6 + $0x13] sm:$0x1] %v4016_v36  ;;  %4019 = vst [vmem:[#allocation6 + $0x17] sm:$0x1] %v4018_v63 }
 0x360   : > { %v4020_v12 = vld [vmem:[#allocation6] sm:$0xff] }
 0x361   : > { %v4021_v17 = vld [vmem:[#allocation6 + $0x8] sm:$0xff]  ;;  %v4026_v40 = vcombine.high %v4020_v12, %v4020_v12  ;;  %v4032_v48 = vpack.c.bf16 %v4020_v12, %v4020_v12 }
 0x362   : > { %v4027_v30 = vcombine.high %v4021_v17, %v4021_v17  ;;  %v4022_v62 = vld [vmem:[#allocation6 + $0x10] sm:$0xff]  ;;  %v4034_v57 = vpack.c.bf16 %v4021_v17, %v4021_v17 }
 0x363   : > { %v4028_v6 = vcombine.high %v4022_v62, %v4022_v62  ;;  %v4033_v28 = vpack.c.bf16 %v4026_v40, %v4026_v40  ;;  %v4036_v39 = vpack.c.bf16 %v4022_v62, %v4022_v62 }
 0x364   : > { %v4035_v5 = vpack.c.bf16 %v4027_v30, %v4027_v30 }
 0x365   : > { %4461 = vmatprep.mubr.bf16.mxu0 %v4033_v28  ;;  %v4037_v27 = vpack.c.bf16 %v4028_v6, %v4028_v6 }
 0x366   : > { %4501 = vmatprep.mubr.bf16.mxu1 %v4035_v5  ;;  %4462 = vmatmul.mubr.bf16.vlgmr.msra.gmra.mrb[152].mxu0 %v4032_v48 }
 0x367   : > { %4502 = vmatmul.mubr.bf16.vlgmr.msra.gmra.mrb[152].mxu1 %v4034_v57  ;;  %6058 = vmatpush3.bf16.msra.mxu0 %v6513_v32 }
 0x368   : > { %4541 = vmatprep.mubr.bf16.mxu0 %v4037_v27  ;;  %6059 = vmatprep.subr.bf16.mxu0 %v6515_v33  ;;  %v5315_v27 = vld [vmem:[%s698_s28] ss:$0 sm:$0xff]  ;;  %s712_s28 = scalar_lea.vmem %s7574_s12, %s7579_s19 }
 0x369   : > { %6106 = vmatpush3.bf16.msra.mxu1 %v6529_v2  ;;  %6121 = vmatprep.mubr.msk.bf16.mxu1 %vm6585_vm0, %v6584_v13 }
 0x36a   : > { %6107 = vmatprep.subr.bf16.mxu1 %v6584_v13 }
 0x36b   : > { %6060 = vmatpush3.bf16.msra.mxu0 %v6516_v25 }
 0x36c   : > { %6061 = vmatprep.subr.bf16.mxu0 %v6517_v41  ;;  %v5316_v41 = vld [vmem:[%s701_s16] ss:$0 sm:$0xff]  ;;  %s715_s16 = scalar_lea.vmem %s7575_s13, %s7579_s19 }
 0x36d   : > { %6108 = vmatpush3.bf16.msra.mxu1 %v6530_v4  ;;  %v4746_v4 = vld [vmem:[%s7523_s22 + $0x38] sm:$0xff] }
 0x36e   : > { %6109 = vmatprep.subr.bf16.mxu1 %v6584_v13 }
 0x36f   : > { %6062 = vmatpush3.bf16.msra.mxu0 %v6518_v35 }
 0x370   : > { %6063 = vmatprep.subr.bf16.mxu0 %v6519_v46 }
 0x371   : > { %6110 = vmatpush3.bf16.msra.mxu1 %v6531_v52 }
 0x372   : > { %6111 = vmatprep.subr.bf16.mxu1 %v6584_v13 }
 0x373   : > { %6064 = vmatpush3.bf16.msra.mxu0 %v6520_v43 }
 0x374   : > { %6065 = vmatprep.subr.bf16.mxu0 %v6521_v18  ;;  %v4739_v18 = vld [vmem:[%s7523_s22] sm:$0xff] }
 0x375   : > { %6112 = vmatpush3.bf16.msra.mxu1 %v6532_v47  ;;  %v4747_v47 = vld [vmem:[%s7523_s22 + $0x40] sm:$0xff] }
 0x376   : > { %6113 = vmatprep.subr.bf16.mxu1 %v6584_v13 }
 0x377   : > { %6066 = vmatpush3.bf16.msra.mxu0 %v6522_v7  ;;  %v4740_v7 = vld [vmem:[%s7523_s22 + $0x8] sm:$0xff] }
 0x378   : > { %6067 = vmatprep.subr.bf16.mxu0 %v6523_v51  ;;  %v6161_v51 = vpack.c.bf16 %v4740_v7, %v4739_v18 }
 0x379   : > { %6114 = vmatpush3.bf16.msra.mxu1 %v6533_v11  ;;  %v4748_v11 = vld [vmem:[%s7523_s22 + $0x48] sm:$0xff] }
 0x37a   : > { %6115 = vmatprep.subr.bf16.mxu1 %v6584_v13 }
 0x37b   : > { %6068 = vmatpush3.bf16.msra.mxu0 %v6524_v23  ;;  %v6586_v23 = vmov 0.0|0.0  }
 0x37c   : > { %6069 = vmatprep.subr.bf16.mxu0 %v6525_v50  ;;  %v4741_v50 = vld [vmem:[%s7523_s22 + $0x10] sm:$0xff] }
 0x37d   : > { %6116 = vmatpush3.bf16.msra.mxu1 %v6534_v56  ;;  %v6173_v56 = vpack.c.bf16 %v4748_v11, %v4747_v47 }
 0x37e   : > { %6117 = vmatprep.subr.bf16.mxu1 %v6584_v13 }
 0x37f   : > { %6070 = vmatpush3.bf16.msra.mxu0 %v6526_v31  ;;  %v4742_v31 = vld [vmem:[%s7523_s22 + $0x18] sm:$0xff] }
 0x380   : > { %6071 = vmatprep.subr.bf16.mxu0 %v6527_v1  ;;  %v6164_v1 = vpack.c.bf16 %v4742_v31, %v4741_v50 }
 0x381   : > { %6118 = vmatpush3.bf16.msra.mxu1 %v6535_v53  ;;  %v4749_v53 = vld [vmem:[%s7523_s22 + $0x50] sm:$0xff] }
 0x382   : > { %6119 = vmatprep.subr.bf16.mxu1 %v6584_v13 }
 0x383   : > { %6072 = vmatpush3.bf16.msra.mxu0 %v6528_v19  ;;  %v4743_v19 = vld [vmem:[%s7523_s22 + $0x20] sm:$0xff] }
 0x384   : > { %6160 = vmatprep.subr.bf16.mxu0 %v6586_v23 }
 0x385   : > { %6120 = vmatpush3.bf16.msra.mxu1 %v6536_v61  ;;  %v4750_v61 = vld [vmem:[%s7523_s22 + $0x58] sm:$0xff] }
 0x386   : > { %4542 = vmatmul.mubr.bf16.vlgmr.msra.gmra.mrb[156].mxu0 %v4036_v39  ;;  %v4744_v39 = vld [vmem:[%s7523_s22 + $0x28] sm:$0xff] }
 0x387   : > { %6157 = vmatprep.mubr.msk.f32.mxu0 %vm6585_vm0, %v6584_v13  ;;  %6162 = vmatpush3.bf16.msra.mxu0 %v6161_v51  ;;  %v6167_v2 = vpack.c.bf16 %v4744_v39, %v4743_v19  ;;  %v4745_v13 = vld [vmem:[%s7523_s22 + $0x30] sm:$0xff] }
 0x388   : > { %6163 = vmatprep.subr.bf16.mxu0 %v6586_v23  ;;  %v6170_v52 = vpack.c.bf16 %v4746_v4, %v4745_v13 }
 0x38b   : > { %6165 = vmatpush3.bf16.msra.mxu0 %v6164_v1 }
 0x38c   : > { %6166 = vmatprep.subr.bf16.mxu0 %v6586_v23 }
 0x38f   : > { %6168 = vmatpush3.bf16.msra.mxu0 %v6167_v2 }
 0x390   : > { %6169 = vmatprep.subr.bf16.mxu0 %v6586_v23 }
 0x393   : > { %6171 = vmatpush3.bf16.msra.mxu0 %v6170_v52 }
 0x394   : > { %6172 = vmatprep.subr.bf16.mxu0 %v6586_v23 }
 0x397   : > { %6174 = vmatpush3.bf16.msra.mxu0 %v6173_v56 }
 0x398   : > { %6175 = vmatprep.subr.bf16.mxu0 %v6586_v23 }
 0x439   : > { %v6029_v24 = vpop.f32.mrb[152].mxu0 }
 0x43a   : > { %v6051_v9 = vpop.f32.mrb[152].mxu1  ;;  %v6030_v20 = vpop.f32.mrb[153].mxu0 }
 0x43b   : > { %v6052_v45 = vpop.f32.mrb[153].mxu1  ;;  %v6031_v21 = vadd.f32 %v6030_v20, %v6029_v24  ;;  %v6032_v60 = vpop.f32.mrb[154].mxu0  ;;  %v6176_v24 = vpack.c.bf16 %v4750_v61, %v4749_v53 }
 0x43c   : > { %v6053_v0 = vadd.f32 %v6052_v45, %v6051_v9  ;;  %v6054_v37 = vpop.f32.mrb[154].mxu1  ;;  %v6033_v8 = vpop.f32.mrb[155].mxu0  ;;  %v4751_v9 = vld [vmem:[%s7523_s22 + $0x60] sm:$0xff]  ;;  %v4753_v45 = vld [vmem:[%s7523_s22 + $0x70] sm:$0xff] }
 0x43d   : > { %v6055_v26 = vpop.f32.mrb[155].mxu1  ;;  %v4464_v38 = vadd.f32 %v6031_v21, %v5266_v10  ;;  %6177 = vmatpush3.bf16.msra.mxu0 %v6176_v24  ;;  %v4752_v10 = vld [vmem:[%s7523_s22 + $0x68] sm:$0xff]  ;;  %v4754_v21 = vld [vmem:[%s7523_s22 + $0x78] sm:$0xff]  ;;  %v5317_v60 = vld [vmem:[%s709_s25] ss:$0 sm:$0xff]  ;;  %s724_s22 = scalar_lea.vmem %s7577_s15, %s5039_s17 }
 0x43e   : > { %6178 = vmatprep.subr.bf16.mxu0 %v6586_v23  ;;  %v6179_v20 = vpack.c.bf16 %v4752_v10, %v4751_v9 }
 0x43f   : > { %v4504_v55 = vadd.f32 %v6053_v0, %v4464_v38  ;;  %v6182_v0 = vpack.c.bf16 %v4754_v21, %v4753_v45 }
 0x441   : > { %6180 = vmatpush3.bf16.msra.mxu0 %v6179_v20 }
 0x442   : > { %6181 = vmatprep.subr.bf16.mxu0 %v6586_v23 }
 0x445   : > { %6183 = vmatpush3.bf16.msra.mxu0 %v6182_v0 }
 0x459   : > { %v6073_v54 = vpop.f32.mrb[156].mxu0 }
 0x45a   : > { %v6074_v34 = vpop.f32.mrb[157].mxu0 }
 0x45b   : > { %v6075_v42 = vadd.f32 %v6074_v34, %v6073_v54  ;;  %v6076_v44 = vpop.f32.mrb[158].mxu0 }
 0x45c   : > { %v6077_v49 = vpop.f32.mrb[159].mxu0 }
 0x45d   : > { %v4544_v3 = vadd.f32 %v6075_v42, %v4504_v55 }
 0x45f   : > { %v4549_v15 = vmax.f32 %v4544_v3, 0.0 }
 0x461   : > { %v4551_v29 = vsel %vm4550_vm1, %v4549_v15, 0.0 }
 0x462   : > { %v4552_v22 = vrot.slane %v4551_v29, 4 }
 0x464   : > { %v4553_v14 = vadd.f32 %v4552_v22, %v4551_v29 }
 0x466   : > { %v4554_v16 = vrot.slane %v4553_v14, 2 }
 0x468   : > { %v4555_v58 = vadd.f32 %v4554_v16, %v4553_v14 }
 0x46a   : > { %v4556_v59 = vrot.slane %v4555_v58, 1 }
 0x46c   : > { %v4557_v36 = vadd.f32 %v4556_v59, %v4555_v58 }
 0x46e   : > { %v4559_v63 = vmul.f32 0.25, %v4557_v36 }
 0x470   : > { %v4560_v12 = vsub.f32 %v4549_v15, %v4559_v63 }
 0x472   : > { %v4561_v17 = vmul.f32 %v4560_v12, %v4560_v12 }
 0x474   : > { %v4562_v40 = vsel %vm4550_vm1, %v4561_v17, 0.0 }
 0x475   : > { %v4563_v30 = vrot.slane %v4562_v40, 4 }
 0x477   : > { %v4564_v62 = vadd.f32 %v4563_v30, %v4562_v40 }
 0x479   : > { %v4565_v6 = vrot.slane %v4564_v62, 2 }
 0x47b   : > { %v4566_v28 = vadd.f32 %v4565_v6, %v4564_v62 }
 0x47d   : > { %v4567_v5 = vrot.slane %v4566_v28, 1 }
 0x47f   : > { %v4568_v32 = vadd.f32 %v4567_v5, %v4566_v28  ;;  %v5326_v28 = vld [vmem:[%s712_s28] ss:$0 sm:$0xff] }
 0x481   : > { %v4569_v48 = vmul.f32 0.25, %v4568_v32  ;;  %v5327_v32 = vld [vmem:[%s715_s16] ss:$0 sm:$0xff] }
 0x483   : > { %v4570_v57 = vadd.f32 1e-05, %v4569_v48 }
 0x485   : > { %6537 = vrsqrt.f32 %v4570_v57 }
 0x48f   : > { %v6538_v33 = vpop.eup %6537 }
 0x490   : > { %v4572_v25 = vmul.f32 %v6538_v33, %v4560_v12 }
 0x492   : > { %v4580_v35 = vmul.f32 %v5315_v27, %v4572_v25 }
 0x494   : > { %v4588_v46 = vadd.f32 %v5316_v41, %v4580_v35 }
 0x496   : > { %v4589_v43 = vpack.c.bf16 %v4588_v46, %v4588_v46 }
 0x498   : > { %6122 = vmatmul.mubr.bf16.vlgmr.msra.gmra.mrb[156].mxu1 %v4589_v43 }
 0x56b   : > { %v4695_v37 = vpop.f32.mrb[156].mxu1 }
 0x56c   : > { %v4696_v8 = vadd.f32 %v5317_v60, %v4695_v37  ;;  %v6123_v26 = vpop.f32.mrb[157].mxu1 }
 0x56d   : > { %v4698_v38 = vpop.f32.mrb[158].mxu1 }
 0x56e   : > { %v4701_v55 = vmax.f32 %v4696_v8, 0.0  ;;  %v6124_v54 = vpop.f32.mrb[159].mxu1 }
 0x570   : > { %v4702_v34 = vsel %vm4550_vm1, %v4701_v55, 0.0 }
 0x571   : > { %v4703_v42 = vrot.slane %v4702_v34, 4 }
 0x573   : > { %v4704_v44 = vadd.f32 %v4703_v42, %v4702_v34 }
 0x575   : > { %v4705_v49 = vrot.slane %v4704_v44, 2 }
 0x577   : > { %v4706_v3 = vadd.f32 %v4705_v49, %v4704_v44 }
 0x579   : > { %v4707_v15 = vrot.slane %v4706_v3, 1 }
 0x57b   : > { %v4708_v29 = vadd.f32 %v4707_v15, %v4706_v3 }
 0x57d   : > { %v4709_v22 = vmul.f32 0.25, %v4708_v29 }
 0x57f   : > { %v4710_v14 = vsub.f32 %v4701_v55, %v4709_v22 }
 0x581   : > { %v4711_v16 = vmul.f32 %v4710_v14, %v4710_v14 }
 0x583   : > { %v4712_v58 = vsel %vm4550_vm1, %v4711_v16, 0.0 }
 0x584   : > { %v4713_v59 = vrot.slane %v4712_v58, 4 }
 0x586   : > { %v4714_v36 = vadd.f32 %v4713_v59, %v4712_v58 }
 0x588   : > { %v4715_v63 = vrot.slane %v4714_v36, 2 }
 0x58a   : > { %v4716_v12 = vadd.f32 %v4715_v63, %v4714_v36 }
 0x58c   : > { %v4717_v17 = vrot.slane %v4716_v12, 1 }
 0x58e   : > { %v4718_v40 = vadd.f32 %v4717_v17, %v4716_v12 }
 0x590   : > { %v4719_v30 = vmul.f32 0.25, %v4718_v40 }
 0x592   : > { %v4720_v62 = vadd.f32 1e-05, %v4719_v30 }
 0x594   : > { %6539 = vrsqrt.f32 %v4720_v62 }
 0x59e   : > { %v6540_v6 = vpop.eup %6539 }
 0x59f   : > { %v4722_v5 = vmul.f32 %v6540_v6, %v4710_v14 }
 0x5a1   : > { %v4730_v48 = vmul.f32 %v5326_v28, %v4722_v5 }
 0x5a3   : > { %v4738_v57 = vadd.f32 %v5327_v32, %v4730_v48 }
 0x5a5   : > { %6158 = vmatmul.mubr.f32.vlgmr.msra.gmra.mrb[160].mxu0 %v4738_v57 }
 0x678   : > { %v4821_v33 = vpop.f32.mrb[160].mxu0 }
 0x679   : > { %4826 = vst.msk [vmem:[%s724_s22] sm:$0xf] %vm4825_vm2, %v4821_v33  ;;  %v6159_v27 = vpop.f32.mrb[161].mxu0 }
 0x67a PF: > { %s25_s18 = sadd.s32 1, %s6582_s18  }
 0x67b   : > { %p22_p4 = scmp.ge.s32.totalorder %s25_s18, 4  }
 0x67d   :  { %24 = sbr.rel (!%p22_p4) target bundleno = 1 (0x1), region = 152 }

</bundles_post_ra>
